<compile_context>
chip_gen: v5e
topology: v5e:2x2
jax: 0.10.0
libtpu: 0.0.40
codegen_flags: <defaults>
</compile_context>

<pallas_src>
import functools

import jax
import jax.numpy as jnp
from jax.experimental import pallas as pl
from jax.experimental.pallas import tpu as pltpu


# -----------------------------------------------------------------------------
# Helpers
# -----------------------------------------------------------------------------
def _pick_tile(dim, target, align):
    """Largest multiple of `align` <= target that divides dim (else full dim)."""
    if dim <= target:
        return dim
    t = (target // align) * align
    while t >= align:
        if dim % t == 0:
            return t
        t -= align
    return dim


def _pick_time_block(T):
    for cand in (8, 4, 2, 1):
        if T % cand == 0:
            return cand
    return 1


# -----------------------------------------------------------------------------
# Pallas kernels
# -----------------------------------------------------------------------------
def _matmul_bias_kernel(x_ref, w_ref, b_ref, o_ref):
    """o = x @ w + b  (x, w in bf16, f32 MXU accumulation, bias f32)."""
    o_ref[...] = (jnp.dot(x_ref[...], w_ref[...],
                          preferred_element_type=jnp.float32)
                  + b_ref[...]).astype(o_ref.dtype)


def _bilstm_recurrence_kernel(gates_ref, whh_ref,
                              hseq_ref, hfin_ref, cfin_ref,
                              h_sc, c_sc):
    """Fused bidirectional LSTM recurrence.

    grid = (2 directions ["parallel"], T//Tb time blocks ["arbitrary"])
      gates_ref : (Tb, B, 4H) f32   precomputed x@W_ih^T + b_ih + b_hh for this block
                                    (time-reversed via index_map for the backward dir)
      whh_ref   : (H, 4H)     bf16  hidden-to-hidden weights (resident across time)
      hseq_ref  : (Tb, B, H)  bf16  slice of the (T, B, 2H) fused output
                                    (direction selects the feature half via index_map)
      hfin_ref  : (B, H)      f32   final hidden state for this direction
      cfin_ref  : (B, H)      f32   final cell   state for this direction
      h_sc,c_sc : (B, H)      f32   VMEM scratch carrying the recurrent state
    """
    d = pl.program_id(0)
    tb = pl.program_id(1)
    n_tb = pl.num_programs(1)
    Tb = gates_ref.shape[0]
    H = h_sc.shape[-1]

    @pl.when(tb == 0)
    def _():
        h_sc[...] = jnp.zeros_like(h_sc)
        c_sc[...] = jnp.zeros_like(c_sc)
        # Initialize the (resident) final-state buffers so they are never garbage.
        hfin_ref[...] = jnp.zeros_like(hfin_ref)
        cfin_ref[...] = jnp.zeros_like(cfin_ref)

    w_hh = whh_ref[...]                      # (H, 4H) bf16

    def step(s, carry):
        h, c = carry
        # forward (d==0): idx = s ; backward (d==1): idx = Tb-1-s (in-block reversal)
        idx = s + d * (Tb - 1 - 2 * s)
        g_x = gates_ref[pl.ds(idx, 1)]       # (1, B, 4H) f32
        g = g_x[0] + jnp.dot(h.astype(w_hh.dtype), w_hh,
                             preferred_element_type=jnp.float32)
        i_g = jax.nn.sigmoid(g[:, 0 * H:1 * H])
        f_g = jax.nn.sigmoid(g[:, 1 * H:2 * H])
        g_g = jnp.tanh(g[:, 2 * H:3 * H])
        o_g = jax.nn.sigmoid(g[:, 3 * H:4 * H])
        c_new = f_g * c + i_g * g_g
        h_new = o_g * jnp.tanh(c_new)
        hseq_ref[pl.ds(idx, 1)] = h_new[None].astype(hseq_ref.dtype)
        return h_new, c_new

    h_last, c_last = jax.lax.fori_loop(0, Tb, step, (h_sc[...], c_sc[...]),
                                       unroll=True)
    h_sc[...] = h_last
    c_sc[...] = c_last

    @pl.when(tb == n_tb - 1)
    def _():
        hfin_ref[...] = h_last
        cfin_ref[...] = c_last


# -----------------------------------------------------------------------------
# pallas_call wrappers
# -----------------------------------------------------------------------------
def input_projection(x2d, wih_t, bias):
    """Hoisted input projection for BOTH directions.

    x2d   : (M, K)     bf16   (M = T*B, K = layer input features)
    wih_t : (2, K, 4H) bf16
    bias  : (2, 1, 4H) f32    (b_ih + b_hh per direction)
    returns (2, M, 4H) f32
    """
    M, K = x2d.shape
    N = wih_t.shape[-1]
    tm = _pick_tile(M, 256, 8)
    tn = _pick_tile(N, 512, 128)
    grid = (2, M // tm, N // tn)

    return pl.pallas_call(
        _matmul_bias_kernel,
        grid_spec=pltpu.PrefetchScalarGridSpec(
            num_scalar_prefetch=0,
            grid=grid,
            in_specs=[
                pl.BlockSpec((tm, K), lambda d, m, n: (m, 0)),
                pl.BlockSpec((None, K, tn), lambda d, m, n: (d, 0, n)),
                pl.BlockSpec((None, 1, tn), lambda d, m, n: (d, 0, n)),
            ],
            out_specs=pl.BlockSpec((None, tm, tn), lambda d, m, n: (d, m, n)),
        ),
        out_shape=jax.ShapeDtypeStruct((2, M, N), jnp.float32),
        compiler_params=pltpu.CompilerParams(
            dimension_semantics=("parallel", "parallel", "parallel")),
    )(x2d, wih_t, bias)


def lstm_bidir_layer(gates, whh_t, *, T, B, H):
    """Run the fused forward+backward recurrence of one layer.

    gates : (2, T, B, 4H) f32   precomputed input projections (+ fused bias)
    whh_t : (2, H, 4H)    bf16
    returns (hseq (T, B, 2H) bf16, hfin (2, B, H) f32, cfin (2, B, H) f32)
    """
    assert H % 128 == 0, "nhid must be a multiple of 128 (pad nhid) for the lane-dense fused output"
    Tb = _pick_time_block(T)
    n_tb = T // Tb

    def rev(d, tb):                     # fwd: tb ; bwd: n_tb-1-tb  (block-level reversal)
        return tb + d * (n_tb - 1 - 2 * tb)

    grid_spec = pltpu.PrefetchScalarGridSpec(
        num_scalar_prefetch=0,
        grid=(2, n_tb),
        in_specs=[
            pl.BlockSpec((None, Tb, B, 4 * H), lambda d, tb: (d, rev(d, tb), 0, 0)),
            pl.BlockSpec((None, H, 4 * H), lambda d, tb: (d, 0, 0)),
        ],
        out_specs=[
            # direction selects which H-wide half of the (T, B, 2H) output we write
            pl.BlockSpec((Tb, B, H), lambda d, tb: (rev(d, tb), 0, d)),
            pl.BlockSpec((None, B, H), lambda d, tb: (d, 0, 0)),
            pl.BlockSpec((None, B, H), lambda d, tb: (d, 0, 0)),
        ],
        scratch_shapes=[
            pltpu.VMEM((B, H), jnp.float32),
            pltpu.VMEM((B, H), jnp.float32),
        ],
    )

    hseq, hfin, cfin = pl.pallas_call(
        _bilstm_recurrence_kernel,
        grid_spec=grid_spec,
        out_shape=(
            jax.ShapeDtypeStruct((T, B, 2 * H), jnp.bfloat16),
            jax.ShapeDtypeStruct((2, B, H), jnp.float32),
            jax.ShapeDtypeStruct((2, B, H), jnp.float32),
        ),
        compiler_params=pltpu.CompilerParams(
            dimension_semantics=("parallel", "arbitrary")),
    )(gates, whh_t)
    return hseq, hfin, cfin


def linear_decoder(x2d, wdec_t, bias):
    """x2d (M, 2H) bf16, wdec_t (2H, ntoken) bf16, bias (1, ntoken) f32 -> (M, ntoken) f32."""
    M, K = x2d.shape
    N = wdec_t.shape[-1]
    tm = _pick_tile(M, 256, 8)
    tn = _pick_tile(N, 512, 128)
    grid = (M // tm, N // tn)

    return pl.pallas_call(
        _matmul_bias_kernel,
        grid_spec=pltpu.PrefetchScalarGridSpec(
            num_scalar_prefetch=0,
            grid=grid,
            in_specs=[
                pl.BlockSpec((tm, K), lambda m, n: (m, 0)),
                pl.BlockSpec((K, tn), lambda m, n: (0, n)),
                pl.BlockSpec((1, tn), lambda m, n: (0, n)),
            ],
            out_specs=pl.BlockSpec((tm, tn), lambda m, n: (m, n)),
        ),
        out_shape=jax.ShapeDtypeStruct((M, N), jnp.float32),
        compiler_params=pltpu.CompilerParams(
            dimension_semantics=("parallel", "parallel")),
    )(x2d, wdec_t, bias)


# -----------------------------------------------------------------------------
# Parameters (raw PyTorch-style shapes + one-time packed/transposed version)
# -----------------------------------------------------------------------------
def init_params(key, nvocab, ntoken, ninp, nhid, nlayers):
    params = {}
    initrange = 0.1
    k = 1.0 / jnp.sqrt(jnp.float32(nhid))

    key, sub = jax.random.split(key)
    emb = jax.random.uniform(sub, (nvocab, ninp), jnp.float32, -initrange, initrange)
    emb = emb.at[0].set(0.0)                     # padding_idx=0
    params["embedding"] = emb

    for layer in range(nlayers):
        in_sz = ninp if layer == 0 else 2 * nhid
        for suffix in ("", "_reverse"):
            key, k1, k2, k3, k4 = jax.random.split(key, 5)
            params[f"w_ih_l{layer}{suffix}"] = jax.random.uniform(
                k1, (4 * nhid, in_sz), jnp.float32, -k, k)
            params[f"w_hh_l{layer}{suffix}"] = jax.random.uniform(
                k2, (4 * nhid, nhid), jnp.float32, -k, k)
            params[f"b_ih_l{layer}{suffix}"] = jax.random.uniform(
                k3, (4 * nhid,), jnp.float32, -k, k)
            params[f"b_hh_l{layer}{suffix}"] = jax.random.uniform(
                k4, (4 * nhid,), jnp.float32, -k, k)

    key, sub = jax.random.split(key)
    params["w_dec"] = jax.random.uniform(sub, (ntoken, 2 * nhid), jnp.float32,
                                         -initrange, initrange)
    params["b_dec"] = jnp.zeros((ntoken,), jnp.float32)
    return params


def prepare_params(raw, nlayers, nhid, ninp):
    """Pre-transpose / pre-fuse / stack / bf16-cast all weights ONCE."""
    p = {"embedding": raw["embedding"]}
    for l in range(nlayers):
        wih = jnp.stack([raw[f"w_ih_l{l}"], raw[f"w_ih_l{l}_reverse"]], 0)      # (2, 4H, F_in)
        whh = jnp.stack([raw[f"w_hh_l{l}"], raw[f"w_hh_l{l}_reverse"]], 0)      # (2, 4H, H)
        b = jnp.stack([raw[f"b_ih_l{l}"] + raw[f"b_hh_l{l}"],
                       raw[f"b_ih_l{l}_reverse"] + raw[f"b_hh_l{l}_reverse"]], 0)
        p[f"wih_t_l{l}"] = jnp.transpose(wih, (0, 2, 1)).astype(jnp.bfloat16)   # (2, F_in, 4H)
        p[f"whh_t_l{l}"] = jnp.transpose(whh, (0, 2, 1)).astype(jnp.bfloat16)   # (2, H, 4H)
        p[f"bias_l{l}"] = b.reshape(2, 1, 4 * nhid).astype(jnp.float32)
    p["wdec_t"] = jnp.transpose(raw["w_dec"]).astype(jnp.bfloat16)              # (2H, ntoken)
    p["b_dec"] = raw["b_dec"].reshape(1, -1).astype(jnp.float32)
    return p


# -----------------------------------------------------------------------------
# Full forward pass (matches Bilstm.forward with dropout=0.0, batch_first=True)
# -----------------------------------------------------------------------------
@functools.partial(jax.jit, static_argnums=(2, 3))
def bilstm_forward(x_ids, params, nlayers, nhid):
    """x_ids: (B, T) int32 token ids.
    Returns (decoded (B, T, ntoken) f32, (h_n, c_n)) with
    h_n, c_n of shape (nlayers*2, B, nhid) — PyTorch layer/direction ordering.
    """
    B, T = x_ids.shape
    # Embedding gather directly in time-major layout; dropout=0.0 is identity.
    emb = jnp.take(params["embedding"], jnp.transpose(x_ids), axis=0)      # (T, B, ninp) f32
    layer_in = emb.astype(jnp.bfloat16)                                    # (T, B, F_in)

    h_list, c_list = [], []
    for l in range(nlayers):
        F_in = layer_in.shape[-1]
        gates = input_projection(layer_in.reshape(T * B, F_in),
                                 params[f"wih_t_l{l}"], params[f"bias_l{l}"])
        gates = gates.reshape(2, T, B, 4 * nhid)
        hseq, hfin, cfin = lstm_bidir_layer(gates, params[f"whh_t_l{l}"],
                                            T=T, B=B, H=nhid)
        h_list.append(hfin)
        c_list.append(cfin)
        layer_in = hseq                                                    # (T, B, 2H) bf16

    h_n = jnp.concatenate(h_list, axis=0)                                  # (2*nlayers, B, H)
    c_n = jnp.concatenate(c_list, axis=0)

    output = jnp.transpose(layer_in, (1, 0, 2))                            # (B, T, 2H) bf16
    decoded = linear_decoder(output.reshape(B * T, 2 * nhid),
                             params["wdec_t"], params["b_dec"])
    ntoken = params["wdec_t"].shape[-1]
    decoded = decoded.reshape(B, T, ntoken)
    return decoded, (h_n, c_n)


# -----------------------------------------------------------------------------
# Pure-JAX f32 reference (for a loose numerical sanity check)
# -----------------------------------------------------------------------------
@functools.partial(jax.jit, static_argnums=(2, 3))
def reference_forward(x_ids, raw, nlayers, nhid):
    B, T = x_ids.shape
    emb = jnp.take(raw["embedding"], x_ids, axis=0)          # (B, T, ninp)
    inp = jnp.transpose(emb, (1, 0, 2))                      # (T, B, ninp)
    h_fin, c_fin = [], []
    for l in range(nlayers):
        outs = []
        for sfx, rev in (("", False), ("_reverse", True)):
            wih = raw[f"w_ih_l{l}{sfx}"]
            whh = raw[f"w_hh_l{l}{sfx}"]
            b = raw[f"b_ih_l{l}{sfx}"] + raw[f"b_hh_l{l}{sfx}"]
            xs = inp[::-1] if rev else inp
            h = jnp.zeros((B, nhid), jnp.float32)
            c = jnp.zeros((B, nhid), jnp.float32)
            hs = []
            for t in range(T):
                g = xs[t] @ wih.T + h @ whh.T + b
                i = jax.nn.sigmoid(g[:, :nhid])
                f = jax.nn.sigmoid(g[:, nhid:2 * nhid])
                gg = jnp.tanh(g[:, 2 * nhid:3 * nhid])
                o = jax.nn.sigmoid(g[:, 3 * nhid:])
                c = f * c + i * gg
                h = o * jnp.tanh(c)
                hs.append(h)
            hseq = jnp.stack(hs, 0)
            if rev:
                hseq = hseq[::-1]
            outs.append(hseq)
            h_fin.append(h)
            c_fin.append(c)
        inp = jnp.concatenate(outs, -1)
    out = jnp.transpose(inp, (1, 0, 2))
    dec = out @ raw["w_dec"].T + raw["b_dec"]
    return dec, (jnp.stack(h_fin, 0), jnp.stack(c_fin, 0))


# -----------------------------------------------------------------------------
if __name__ == "__main__":
    # Small but TPU-friendly shapes: B multiple of 8, nhid multiple of 128.
    nvocab, ntoken, ninp, nhid, nlayers = 64, 128, 128, 128, 2
    B, T = 8, 16

    key = jax.random.PRNGKey(0)
    key_p, key_x = jax.random.split(key)
    raw = init_params(key_p, nvocab, ntoken, ninp, nhid, nlayers)
    params = prepare_params(raw, nlayers, nhid, ninp)

    x = jax.random.randint(key_x, (B, T), 0, nvocab, dtype=jnp.int32)

    decoded, (h_n, c_n) = bilstm_forward(x, params, nlayers, nhid)
    jax.block_until_ready((decoded, h_n, c_n))

    assert decoded.shape == (B, T, ntoken)
    assert h_n.shape == (nlayers * 2, B, nhid)
    assert c_n.shape == (nlayers * 2, B, nhid)

    # Loose check vs f32 reference (kernel uses bf16 matmul operands).
    dec_ref, (h_ref, c_ref) = reference_forward(x, raw, nlayers, nhid)
    err_d = float(jnp.max(jnp.abs(decoded.astype(jnp.float32) - dec_ref)))
    err_h = float(jnp.max(jnp.abs(h_n - h_ref)))
    err_c = float(jnp.max(jnp.abs(c_n - c_ref)))
    assert err_d < 3e-2 and err_h < 3e-2 and err_c < 3e-2, (err_d, err_h, err_c)

    print("KERNEL_OK")
</pallas_src>

<mosaic_0001>
module attributes {stable_mosaic.version = 11 : i64} {
  func.func @_matmul_bias_kernel(%arg0: i32, %arg1: i32, %arg2: i32, %arg3: memref<128x256xbf16, #tpu.memory_space<vmem>>, %arg4: memref<1x256x512xbf16, #tpu.memory_space<vmem>>, %arg5: memref<1x1x512xf32, #tpu.memory_space<vmem>>, %arg6: memref<1x128x512xf32, #tpu.memory_space<vmem>>) attributes {dimension_semantics = [#tpu.dimension_semantics<parallel>, #tpu.dimension_semantics<parallel>, #tpu.dimension_semantics<parallel>], iteration_bounds = array<i64: 2, 1, 1>, scalar_prefetch = 0 : i64, scratch_operands = 0 : i64, tpu.core_type = #tpu.core_type<tc>, window_params = [{transform_indices = @transform_0, window_bounds = array<i64: 128, 256>}, {transform_indices = @transform_1, window_bounds = array<i64: 1, 256, 512>}, {transform_indices = @transform_2, window_bounds = array<i64: 1, 1, 512>}, {transform_indices = @transform_3, window_bounds = array<i64: 1, 128, 512>}]} {
    %c0 = arith.constant 0 : index
    %c0_0 = arith.constant 0 : index
    %0 = vector.load %arg3[%c0, %c0_0] : memref<128x256xbf16, #tpu.memory_space<vmem>>, vector<128x256xbf16>
    %c0_1 = arith.constant 0 : index
    %c0_2 = arith.constant 0 : index
    %c0_3 = arith.constant 0 : index
    %1 = vector.load %arg4[%c0_1, %c0_2, %c0_3] : memref<1x256x512xbf16, #tpu.memory_space<vmem>>, vector<1x256x512xbf16>
    %2 = vector.shape_cast %1 : vector<1x256x512xbf16> to vector<256x512xbf16>
    %cst = arith.constant dense<0.000000e+00> : vector<128x512xf32>
    %3 = tpu.matmul %0, %2, %cst {dimension_numbers = #tpu.dot_dimension_numbers<[1], [0], [0], [1], [0, 0, 1, 1], [], []>} : vector<128x256xbf16>, vector<256x512xbf16>, vector<128x512xf32> -> vector<128x512xf32>
    %c0_4 = arith.constant 0 : index
    %c0_5 = arith.constant 0 : index
    %c0_6 = arith.constant 0 : index
    %4 = vector.load %arg5[%c0_4, %c0_5, %c0_6] : memref<1x1x512xf32, #tpu.memory_space<vmem>>, vector<1x1x512xf32>
    %5 = vector.shape_cast %4 : vector<1x1x512xf32> to vector<1x512xf32>
    %6 = vector.broadcast %5 : vector<1x512xf32> to vector<128x512xf32>
    %7 = arith.addf %3, %6 : vector<128x512xf32>
    %c0_7 = arith.constant 0 : index
    %c0_8 = arith.constant 0 : index
    %c0_9 = arith.constant 0 : index
    %8 = vector.load %arg6[%c0_7, %c0_8, %c0_9] : memref<1x128x512xf32, #tpu.memory_space<vmem>>, vector<1x128x512xf32>
    %9 = vector.shape_cast %8 : vector<1x128x512xf32> to vector<128x512xf32>
    %10 = vector.shape_cast %7 : vector<128x512xf32> to vector<1x128x512xf32>
    tpu.vector_store %arg6[%c0_7, %c0_8, %c0_9], %10 {strides = array<i32>} : memref<1x128x512xf32, #tpu.memory_space<vmem>>, vector<1x128x512xf32>,
    return
  }
  func.func @transform_0(%arg0: i32, %arg1: i32, %arg2: i32) -> (i32, i32) {
    %c0_i32 = arith.constant 0 : i32
    %c0_i32_0 = arith.constant 0 : i32
    return %arg1, %c0_i32 : i32, i32
  }
  func.func @transform_1(%arg0: i32, %arg1: i32, %arg2: i32) -> (i32, i32, i32) {
    %c0_i32 = arith.constant 0 : i32
    %c0_i32_0 = arith.constant 0 : i32
    return %arg0, %c0_i32, %arg2 : i32, i32, i32
  }
  func.func @transform_2(%arg0: i32, %arg1: i32, %arg2: i32) -> (i32, i32, i32) {
    %c0_i32 = arith.constant 0 : i32
    %c0_i32_0 = arith.constant 0 : i32
    return %arg0, %c0_i32, %arg2 : i32, i32, i32
  }
  func.func @transform_3(%arg0: i32, %arg1: i32, %arg2: i32) -> (i32, i32, i32) {
    %c0_i32 = arith.constant 0 : i32
    return %arg0, %arg1, %arg2 : i32, i32, i32
  }
}

module attributes {stable_mosaic.version = 11 : i64} {
  func.func @_matmul_bias_kernel(%arg0: i32, %arg1: i32, %arg2: i32, %arg3: memref<128x128xbf16, #tpu.memory_space<vmem>>, %arg4: memref<1x128x512xbf16, #tpu.memory_space<vmem>>, %arg5: memref<1x1x512xf32, #tpu.memory_space<vmem>>, %arg6: memref<1x128x512xf32, #tpu.memory_space<vmem>>) attributes {dimension_semantics = [#tpu.dimension_semantics<parallel>, #tpu.dimension_semantics<parallel>, #tpu.dimension_semantics<parallel>], iteration_bounds = array<i64: 2, 1, 1>, scalar_prefetch = 0 : i64, scratch_operands = 0 : i64, tpu.core_type = #tpu.core_type<tc>, window_params = [{transform_indices = @transform_0, window_bounds = array<i64: 128, 128>}, {transform_indices = @transform_1, window_bounds = array<i64: 1, 128, 512>}, {transform_indices = @transform_2, window_bounds = array<i64: 1, 1, 512>}, {transform_indices = @transform_3, window_bounds = array<i64: 1, 128, 512>}]} {
    %c0 = arith.constant 0 : index
    %c0_0 = arith.constant 0 : index
    %0 = vector.load %arg3[%c0, %c0_0] : memref<128x128xbf16, #tpu.memory_space<vmem>>, vector<128x128xbf16>
    %c0_1 = arith.constant 0 : index
    %c0_2 = arith.constant 0 : index
    %c0_3 = arith.constant 0 : index
    %1 = vector.load %arg4[%c0_1, %c0_2, %c0_3] : memref<1x128x512xbf16, #tpu.memory_space<vmem>>, vector<1x128x512xbf16>
    %2 = vector.shape_cast %1 : vector<1x128x512xbf16> to vector<128x512xbf16>
    %cst = arith.constant dense<0.000000e+00> : vector<128x512xf32>
    %3 = tpu.matmul %0, %2, %cst {dimension_numbers = #tpu.dot_dimension_numbers<[1], [0], [0], [1], [0, 0, 1, 1], [], []>} : vector<128x128xbf16>, vector<128x512xbf16>, vector<128x512xf32> -> vector<128x512xf32>
    %c0_4 = arith.constant 0 : index
    %c0_5 = arith.constant 0 : index
    %c0_6 = arith.constant 0 : index
    %4 = vector.load %arg5[%c0_4, %c0_5, %c0_6] : memref<1x1x512xf32, #tpu.memory_space<vmem>>, vector<1x1x512xf32>
    %5 = vector.shape_cast %4 : vector<1x1x512xf32> to vector<1x512xf32>
    %6 = vector.broadcast %5 : vector<1x512xf32> to vector<128x512xf32>
    %7 = arith.addf %3, %6 : vector<128x512xf32>
    %c0_7 = arith.constant 0 : index
    %c0_8 = arith.constant 0 : index
    %c0_9 = arith.constant 0 : index
    %8 = vector.load %arg6[%c0_7, %c0_8, %c0_9] : memref<1x128x512xf32, #tpu.memory_space<vmem>>, vector<1x128x512xf32>
    %9 = vector.shape_cast %8 : vector<1x128x512xf32> to vector<128x512xf32>
    %10 = vector.shape_cast %7 : vector<128x512xf32> to vector<1x128x512xf32>
    tpu.vector_store %arg6[%c0_7, %c0_8, %c0_9], %10 {strides = array<i32>} : memref<1x128x512xf32, #tpu.memory_space<vmem>>, vector<1x128x512xf32>,
    return
  }
  func.func @transform_0(%arg0: i32, %arg1: i32, %arg2: i32) -> (i32, i32) {
    %c0_i32 = arith.constant 0 : i32
    %c0_i32_0 = arith.constant 0 : i32
    return %arg1, %c0_i32 : i32, i32
  }
  func.func @transform_1(%arg0: i32, %arg1: i32, %arg2: i32) -> (i32, i32, i32) {
    %c0_i32 = arith.constant 0 : i32
    %c0_i32_0 = arith.constant 0 : i32
    return %arg0, %c0_i32, %arg2 : i32, i32, i32
  }
  func.func @transform_2(%arg0: i32, %arg1: i32, %arg2: i32) -> (i32, i32, i32) {
    %c0_i32 = arith.constant 0 : i32
    %c0_i32_0 = arith.constant 0 : i32
    return %arg0, %c0_i32, %arg2 : i32, i32, i32
  }
  func.func @transform_3(%arg0: i32, %arg1: i32, %arg2: i32) -> (i32, i32, i32) {
    %c0_i32 = arith.constant 0 : i32
    return %arg0, %arg1, %arg2 : i32, i32, i32
  }
}

module attributes {stable_mosaic.version = 11 : i64} {
  func.func @_bilstm_recurrence_kernel(%arg0: i32, %arg1: i32, %arg2: memref<1x8x8x512xf32, #tpu.memory_space<vmem>>, %arg3: memref<1x128x512xbf16, #tpu.memory_space<vmem>>, %arg4: memref<8x8x128xbf16, #tpu.memory_space<vmem>>, %arg5: memref<1x8x128xf32, #tpu.memory_space<vmem>>, %arg6: memref<1x8x128xf32, #tpu.memory_space<vmem>>, %arg7: memref<8x128xf32, #tpu.memory_space<vmem>>, %arg8: memref<8x128xf32, #tpu.memory_space<vmem>>) attributes {dimension_semantics = [#tpu.dimension_semantics<parallel>, #tpu.dimension_semantics<arbitrary>], iteration_bounds = array<i64: 2, 2>, scalar_prefetch = 0 : i64, scratch_operands = 2 : i64, tpu.core_type = #tpu.core_type<tc>, window_params = [{transform_indices = @transform_0, window_bounds = array<i64: 1, 8, 8, 512>}, {transform_indices = @transform_1, window_bounds = array<i64: 1, 128, 512>}, {transform_indices = @transform_2, window_bounds = array<i64: 8, 8, 128>}, {transform_indices = @transform_3, window_bounds = array<i64: 1, 8, 128>}, {transform_indices = @transform_4, window_bounds = array<i64: 1, 8, 128>}]} {
    %c0_i32 = arith.constant 0 : i32
    %0 = arith.cmpi eq, %arg1, %c0_i32 : i32
    %1 = arith.extui %0 : i1 to i32
    %c0_i32_0 = arith.constant 0 : i32
    %2 = arith.cmpi ne, %1, %c0_i32_0 : i32
    scf.if %2 {
      %cst_101 = arith.constant 0.000000e+00 : f32
      %332 = vector.broadcast %cst_101 : f32 to vector<8x128xf32>
      %c0_102 = arith.constant 0 : index
      %c0_103 = arith.constant 0 : index
      %333 = vector.load %arg7[%c0_102, %c0_103] : memref<8x128xf32, #tpu.memory_space<vmem>>, vector<8x128xf32>
      tpu.vector_store %arg7[%c0_102, %c0_103], %332 {strides = array<i32>} : memref<8x128xf32, #tpu.memory_space<vmem>>, vector<8x128xf32>,
      %cst_104 = arith.constant 0.000000e+00 : f32
      %334 = vector.broadcast %cst_104 : f32 to vector<8x128xf32>
      %c0_105 = arith.constant 0 : index
      %c0_106 = arith.constant 0 : index
      %335 = vector.load %arg8[%c0_105, %c0_106] : memref<8x128xf32, #tpu.memory_space<vmem>>, vector<8x128xf32>
      tpu.vector_store %arg8[%c0_105, %c0_106], %334 {strides = array<i32>} : memref<8x128xf32, #tpu.memory_space<vmem>>, vector<8x128xf32>,
      %cst_107 = arith.constant 0.000000e+00 : f32
      %336 = vector.broadcast %cst_107 : f32 to vector<8x128xf32>
      %c0_108 = arith.constant 0 : index
      %c0_109 = arith.constant 0 : index
      %c0_110 = arith.constant 0 : index
      %337 = vector.load %arg5[%c0_108, %c0_109, %c0_110] : memref<1x8x128xf32, #tpu.memory_space<vmem>>, vector<1x8x128xf32>
      %338 = vector.shape_cast %337 : vector<1x8x128xf32> to vector<8x128xf32>
      %339 = vector.shape_cast %336 : vector<8x128xf32> to vector<1x8x128xf32>
      tpu.vector_store %arg5[%c0_108, %c0_109, %c0_110], %339 {strides = array<i32>} : memref<1x8x128xf32, #tpu.memory_space<vmem>>, vector<1x8x128xf32>,
      %cst_111 = arith.constant 0.000000e+00 : f32
      %340 = vector.broadcast %cst_111 : f32 to vector<8x128xf32>
      %c0_112 = arith.constant 0 : index
      %c0_113 = arith.constant 0 : index
      %c0_114 = arith.constant 0 : index
      %341 = vector.load %arg6[%c0_112, %c0_113, %c0_114] : memref<1x8x128xf32, #tpu.memory_space<vmem>>, vector<1x8x128xf32>
      %342 = vector.shape_cast %341 : vector<1x8x128xf32> to vector<8x128xf32>
      %343 = vector.shape_cast %340 : vector<8x128xf32> to vector<1x8x128xf32>
      tpu.vector_store %arg6[%c0_112, %c0_113, %c0_114], %343 {strides = array<i32>} : memref<1x8x128xf32, #tpu.memory_space<vmem>>, vector<1x8x128xf32>,
    } else {
    }
    %c0 = arith.constant 0 : index
    %c0_1 = arith.constant 0 : index
    %c0_2 = arith.constant 0 : index
    %3 = vector.load %arg3[%c0, %c0_1, %c0_2] : memref<1x128x512xbf16, #tpu.memory_space<vmem>>, vector<1x128x512xbf16>
    %4 = vector.shape_cast %3 : vector<1x128x512xbf16> to vector<128x512xbf16>
    %c0_3 = arith.constant 0 : index
    %c0_4 = arith.constant 0 : index
    %5 = vector.load %arg7[%c0_3, %c0_4] : memref<8x128xf32, #tpu.memory_space<vmem>>, vector<8x128xf32>
    %c0_5 = arith.constant 0 : index
    %c0_6 = arith.constant 0 : index
    %6 = vector.load %arg8[%c0_5, %c0_6] : memref<8x128xf32, #tpu.memory_space<vmem>>, vector<8x128xf32>
    %c0_i32_7 = arith.constant 0 : i32
    %c2_i32 = arith.constant 2 : i32
    %7 = arith.muli %c2_i32, %c0_i32_7 : i32
    %c7_i32 = arith.constant 7 : i32
    %8 = arith.subi %c7_i32, %7 : i32
    %9 = arith.muli %arg0, %8 : i32
    %10 = arith.addi %c0_i32_7, %9 : i32
    %c0_8 = arith.constant 0 : index
    %11 = arith.index_cast %10 : i32 to index
    %c0_9 = arith.constant 0 : index
    %c0_10 = arith.constant 0 : index
    %12 = vector.load %arg2[%c0_8, %11, %c0_9, %c0_10] : memref<1x8x8x512xf32, #tpu.memory_space<vmem>>, vector<1x1x8x512xf32>
    %13 = vector.shape_cast %12 : vector<1x1x8x512xf32> to vector<1x8x512xf32>
    %14 = vector.shape_cast %13 : vector<1x8x512xf32> to vector<8x512xf32>
    %15 = arith.truncf %5 : vector<8x128xf32> to vector<8x128xbf16>
    %cst = arith.constant dense<0.000000e+00> : vector<8x512xf32>
    %16 = tpu.matmul %15, %4, %cst {dimension_numbers = #tpu.dot_dimension_numbers<[1], [0], [0], [1], [0, 0, 1, 1], [], []>} : vector<8x128xbf16>, vector<128x512xbf16>, vector<8x512xf32> -> vector<8x512xf32>
    %17 = arith.addf %14, %16 : vector<8x512xf32>
    %18 = vector.extract_strided_slice %17 {offsets = [0, 0], sizes = [8, 128], strides = [1, 1]} : vector<8x512xf32> to vector<8x128xf32>
    %19 = arith.negf %18 : vector<8x128xf32>
    %20 = math.exp %19 : vector<8x128xf32>
    %cst_11 = arith.constant 1.000000e+00 : f32
    %21 = vector.broadcast %cst_11 : f32 to vector<8x128xf32>
    %22 = arith.addf %21, %20 : vector<8x128xf32>
    %23 = arith.divf %21, %22 : vector<8x128xf32>
    %24 = vector.extract_strided_slice %17 {offsets = [0, 128], sizes = [8, 128], strides = [1, 1]} : vector<8x512xf32> to vector<8x128xf32>
    %25 = arith.negf %24 : vector<8x128xf32>
    %26 = math.exp %25 : vector<8x128xf32>
    %cst_12 = arith.constant 1.000000e+00 : f32
    %27 = vector.broadcast %cst_12 : f32 to vector<8x128xf32>
    %28 = arith.addf %27, %26 : vector<8x128xf32>
    %29 = arith.divf %27, %28 : vector<8x128xf32>
    %30 = vector.extract_strided_slice %17 {offsets = [0, 256], sizes = [8, 128], strides = [1, 1]} : vector<8x512xf32> to vector<8x128xf32>
    %31 = math.tanh %30 : vector<8x128xf32>
    %32 = vector.extract_strided_slice %17 {offsets = [0, 384], sizes = [8, 128], strides = [1, 1]} : vector<8x512xf32> to vector<8x128xf32>
    %33 = arith.negf %32 : vector<8x128xf32>
    %34 = math.exp %33 : vector<8x128xf32>
    %cst_13 = arith.constant 1.000000e+00 : f32
    %35 = vector.broadcast %cst_13 : f32 to vector<8x128xf32>
    %36 = arith.addf %35, %34 : vector<8x128xf32>
    %37 = arith.divf %35, %36 : vector<8x128xf32>
    %38 = arith.mulf %29, %6 : vector<8x128xf32>
    %39 = arith.mulf %23, %31 : vector<8x128xf32>
    %40 = arith.addf %38, %39 : vector<8x128xf32>
    %41 = math.tanh %40 : vector<8x128xf32>
    %42 = arith.mulf %37, %41 : vector<8x128xf32>
    %43 = vector.shape_cast %42 : vector<8x128xf32> to vector<1x8x128xf32>
    %44 = arith.truncf %43 : vector<1x8x128xf32> to vector<1x8x128xbf16>
    %45 = arith.index_cast %10 : i32 to index
    %c0_14 = arith.constant 0 : index
    %c0_15 = arith.constant 0 : index
    %46 = vector.load %arg4[%45, %c0_14, %c0_15] : memref<8x8x128xbf16, #tpu.memory_space<vmem>>, vector<1x8x128xbf16>
    tpu.vector_store %arg4[%45, %c0_14, %c0_15], %44 {strides = array<i32>} : memref<8x8x128xbf16, #tpu.memory_space<vmem>>, vector<1x8x128xbf16>,
    %c1_i32 = arith.constant 1 : i32
    %c2_i32_16 = arith.constant 2 : i32
    %47 = arith.muli %c2_i32_16, %c1_i32 : i32
    %c7_i32_17 = arith.constant 7 : i32
    %48 = arith.subi %c7_i32_17, %47 : i32
    %49 = arith.muli %arg0, %48 : i32
    %50 = arith.addi %c1_i32, %49 : i32
    %c0_18 = arith.constant 0 : index
    %51 = arith.index_cast %50 : i32 to index
    %c0_19 = arith.constant 0 : index
    %c0_20 = arith.constant 0 : index
    %52 = vector.load %arg2[%c0_18, %51, %c0_19, %c0_20] : memref<1x8x8x512xf32, #tpu.memory_space<vmem>>, vector<1x1x8x512xf32>
    %53 = vector.shape_cast %52 : vector<1x1x8x512xf32> to vector<1x8x512xf32>
    %54 = vector.shape_cast %53 : vector<1x8x512xf32> to vector<8x512xf32>
    %55 = arith.truncf %42 : vector<8x128xf32> to vector<8x128xbf16>
    %cst_21 = arith.constant dense<0.000000e+00> : vector<8x512xf32>
    %56 = tpu.matmul %55, %4, %cst_21 {dimension_numbers = #tpu.dot_dimension_numbers<[1], [0], [0], [1], [0, 0, 1, 1], [], []>} : vector<8x128xbf16>, vector<128x512xbf16>, vector<8x512xf32> -> vector<8x512xf32>
    %57 = arith.addf %54, %56 : vector<8x512xf32>
    %58 = vector.extract_strided_slice %57 {offsets = [0, 0], sizes = [8, 128], strides = [1, 1]} : vector<8x512xf32> to vector<8x128xf32>
    %59 = arith.negf %58 : vector<8x128xf32>
    %60 = math.exp %59 : vector<8x128xf32>
    %cst_22 = arith.constant 1.000000e+00 : f32
    %61 = vector.broadcast %cst_22 : f32 to vector<8x128xf32>
    %62 = arith.addf %61, %60 : vector<8x128xf32>
    %63 = arith.divf %61, %62 : vector<8x128xf32>
    %64 = vector.extract_strided_slice %57 {offsets = [0, 128], sizes = [8, 128], strides = [1, 1]} : vector<8x512xf32> to vector<8x128xf32>
    %65 = arith.negf %64 : vector<8x128xf32>
    %66 = math.exp %65 : vector<8x128xf32>
    %cst_23 = arith.constant 1.000000e+00 : f32
    %67 = vector.broadcast %cst_23 : f32 to vector<8x128xf32>
    %68 = arith.addf %67, %66 : vector<8x128xf32>
    %69 = arith.divf %67, %68 : vector<8x128xf32>
    %70 = vector.extract_strided_slice %57 {offsets = [0, 256], sizes = [8, 128], strides = [1, 1]} : vector<8x512xf32> to vector<8x128xf32>
    %71 = math.tanh %70 : vector<8x128xf32>
    %72 = vector.extract_strided_slice %57 {offsets = [0, 384], sizes = [8, 128], strides = [1, 1]} : vector<8x512xf32> to vector<8x128xf32>
    %73 = arith.negf %72 : vector<8x128xf32>
    %74 = math.exp %73 : vector<8x128xf32>
    %cst_24 = arith.constant 1.000000e+00 : f32
    %75 = vector.broadcast %cst_24 : f32 to vector<8x128xf32>
    %76 = arith.addf %75, %74 : vector<8x128xf32>
    %77 = arith.divf %75, %76 : vector<8x128xf32>
    %78 = arith.mulf %69, %40 : vector<8x128xf32>
    %79 = arith.mulf %63, %71 : vector<8x128xf32>
    %80 = arith.addf %78, %79 : vector<8x128xf32>
    %81 = math.tanh %80 : vector<8x128xf32>
    %82 = arith.mulf %77, %81 : vector<8x128xf32>
    %83 = vector.shape_cast %82 : vector<8x128xf32> to vector<1x8x128xf32>
    %84 = arith.truncf %83 : vector<1x8x128xf32> to vector<1x8x128xbf16>
    %85 = arith.index_cast %50 : i32 to index
    %c0_25 = arith.constant 0 : index
    %c0_26 = arith.constant 0 : index
    %86 = vector.load %arg4[%85, %c0_25, %c0_26] : memref<8x8x128xbf16, #tpu.memory_space<vmem>>, vector<1x8x128xbf16>
    tpu.vector_store %arg4[%85, %c0_25, %c0_26], %84 {strides = array<i32>} : memref<8x8x128xbf16, #tpu.memory_space<vmem>>, vector<1x8x128xbf16>,
    %c2_i32_27 = arith.constant 2 : i32
    %c2_i32_28 = arith.constant 2 : i32
    %87 = arith.muli %c2_i32_28, %c2_i32_27 : i32
    %c7_i32_29 = arith.constant 7 : i32
    %88 = arith.subi %c7_i32_29, %87 : i32
    %89 = arith.muli %arg0, %88 : i32
    %90 = arith.addi %c2_i32_27, %89 : i32
    %c0_30 = arith.constant 0 : index
    %91 = arith.index_cast %90 : i32 to index
    %c0_31 = arith.constant 0 : index
    %c0_32 = arith.constant 0 : index
    %92 = vector.load %arg2[%c0_30, %91, %c0_31, %c0_32] : memref<1x8x8x512xf32, #tpu.memory_space<vmem>>, vector<1x1x8x512xf32>
    %93 = vector.shape_cast %92 : vector<1x1x8x512xf32> to vector<1x8x512xf32>
    %94 = vector.shape_cast %93 : vector<1x8x512xf32> to vector<8x512xf32>
    %95 = arith.truncf %82 : vector<8x128xf32> to vector<8x128xbf16>
    %cst_33 = arith.constant dense<0.000000e+00> : vector<8x512xf32>
    %96 = tpu.matmul %95, %4, %cst_33 {dimension_numbers = #tpu.dot_dimension_numbers<[1], [0], [0], [1], [0, 0, 1, 1], [], []>} : vector<8x128xbf16>, vector<128x512xbf16>, vector<8x512xf32> -> vector<8x512xf32>
    %97 = arith.addf %94, %96 : vector<8x512xf32>
    %98 = vector.extract_strided_slice %97 {offsets = [0, 0], sizes = [8, 128], strides = [1, 1]} : vector<8x512xf32> to vector<8x128xf32>
    %99 = arith.negf %98 : vector<8x128xf32>
    %100 = math.exp %99 : vector<8x128xf32>
    %cst_34 = arith.constant 1.000000e+00 : f32
    %101 = vector.broadcast %cst_34 : f32 to vector<8x128xf32>
    %102 = arith.addf %101, %100 : vector<8x128xf32>
    %103 = arith.divf %101, %102 : vector<8x128xf32>
    %104 = vector.extract_strided_slice %97 {offsets = [0, 128], sizes = [8, 128], strides = [1, 1]} : vector<8x512xf32> to vector<8x128xf32>
    %105 = arith.negf %104 : vector<8x128xf32>
    %106 = math.exp %105 : vector<8x128xf32>
    %cst_35 = arith.constant 1.000000e+00 : f32
    %107 = vector.broadcast %cst_35 : f32 to vector<8x128xf32>
    %108 = arith.addf %107, %106 : vector<8x128xf32>
    %109 = arith.divf %107, %108 : vector<8x128xf32>
    %110 = vector.extract_strided_slice %97 {offsets = [0, 256], sizes = [8, 128], strides = [1, 1]} : vector<8x512xf32> to vector<8x128xf32>
    %111 = math.tanh %110 : vector<8x128xf32>
    %112 = vector.extract_strided_slice %97 {offsets = [0, 384], sizes = [8, 128], strides = [1, 1]} : vector<8x512xf32> to vector<8x128xf32>
    %113 = arith.negf %112 : vector<8x128xf32>
    %114 = math.exp %113 : vector<8x128xf32>
    %cst_36 = arith.constant 1.000000e+00 : f32
    %115 = vector.broadcast %cst_36 : f32 to vector<8x128xf32>
    %116 = arith.addf %115, %114 : vector<8x128xf32>
    %117 = arith.divf %115, %116 : vector<8x128xf32>
    %118 = arith.mulf %109, %80 : vector<8x128xf32>
    %119 = arith.mulf %103, %111 : vector<8x128xf32>
    %120 = arith.addf %118, %119 : vector<8x128xf32>
    %121 = math.tanh %120 : vector<8x128xf32>
    %122 = arith.mulf %117, %121 : vector<8x128xf32>
    %123 = vector.shape_cast %122 : vector<8x128xf32> to vector<1x8x128xf32>
    %124 = arith.truncf %123 : vector<1x8x128xf32> to vector<1x8x128xbf16>
    %125 = arith.index_cast %90 : i32 to index
    %c0_37 = arith.constant 0 : index
    %c0_38 = arith.constant 0 : index
    %126 = vector.load %arg4[%125, %c0_37, %c0_38] : memref<8x8x128xbf16, #tpu.memory_space<vmem>>, vector<1x8x128xbf16>
    tpu.vector_store %arg4[%125, %c0_37, %c0_38], %124 {strides = array<i32>} : memref<8x8x128xbf16, #tpu.memory_space<vmem>>, vector<1x8x128xbf16>,
    %c3_i32 = arith.constant 3 : i32
    %c2_i32_39 = arith.constant 2 : i32
    %127 = arith.muli %c2_i32_39, %c3_i32 : i32
    %c7_i32_40 = arith.constant 7 : i32
    %128 = arith.subi %c7_i32_40, %127 : i32
    %129 = arith.muli %arg0, %128 : i32
    %130 = arith.addi %c3_i32, %129 : i32
    %c0_41 = arith.constant 0 : index
    %131 = arith.index_cast %130 : i32 to index
    %c0_42 = arith.constant 0 : index
    %c0_43 = arith.constant 0 : index
    %132 = vector.load %arg2[%c0_41, %131, %c0_42, %c0_43] : memref<1x8x8x512xf32, #tpu.memory_space<vmem>>, vector<1x1x8x512xf32>
    %133 = vector.shape_cast %132 : vector<1x1x8x512xf32> to vector<1x8x512xf32>
    %134 = vector.shape_cast %133 : vector<1x8x512xf32> to vector<8x512xf32>
    %135 = arith.truncf %122 : vector<8x128xf32> to vector<8x128xbf16>
    %cst_44 = arith.constant dense<0.000000e+00> : vector<8x512xf32>
    %136 = tpu.matmul %135, %4, %cst_44 {dimension_numbers = #tpu.dot_dimension_numbers<[1], [0], [0], [1], [0, 0, 1, 1], [], []>} : vector<8x128xbf16>, vector<128x512xbf16>, vector<8x512xf32> -> vector<8x512xf32>
    %137 = arith.addf %134, %136 : vector<8x512xf32>
    %138 = vector.extract_strided_slice %137 {offsets = [0, 0], sizes = [8, 128], strides = [1, 1]} : vector<8x512xf32> to vector<8x128xf32>
    %139 = arith.negf %138 : vector<8x128xf32>
    %140 = math.exp %139 : vector<8x128xf32>
    %cst_45 = arith.constant 1.000000e+00 : f32
    %141 = vector.broadcast %cst_45 : f32 to vector<8x128xf32>
    %142 = arith.addf %141, %140 : vector<8x128xf32>
    %143 = arith.divf %141, %142 : vector<8x128xf32>
    %144 = vector.extract_strided_slice %137 {offsets = [0, 128], sizes = [8, 128], strides = [1, 1]} : vector<8x512xf32> to vector<8x128xf32>
    %145 = arith.negf %144 : vector<8x128xf32>
    %146 = math.exp %145 : vector<8x128xf32>
    %cst_46 = arith.constant 1.000000e+00 : f32
    %147 = vector.broadcast %cst_46 : f32 to vector<8x128xf32>
    %148 = arith.addf %147, %146 : vector<8x128xf32>
    %149 = arith.divf %147, %148 : vector<8x128xf32>
    %150 = vector.extract_strided_slice %137 {offsets = [0, 256], sizes = [8, 128], strides = [1, 1]} : vector<8x512xf32> to vector<8x128xf32>
    %151 = math.tanh %150 : vector<8x128xf32>
    %152 = vector.extract_strided_slice %137 {offsets = [0, 384], sizes = [8, 128], strides = [1, 1]} : vector<8x512xf32> to vector<8x128xf32>
    %153 = arith.negf %152 : vector<8x128xf32>
    %154 = math.exp %153 : vector<8x128xf32>
    %cst_47 = arith.constant 1.000000e+00 : f32
    %155 = vector.broadcast %cst_47 : f32 to vector<8x128xf32>
    %156 = arith.addf %155, %154 : vector<8x128xf32>
    %157 = arith.divf %155, %156 : vector<8x128xf32>
    %158 = arith.mulf %149, %120 : vector<8x128xf32>
    %159 = arith.mulf %143, %151 : vector<8x128xf32>
    %160 = arith.addf %158, %159 : vector<8x128xf32>
    %161 = math.tanh %160 : vector<8x128xf32>
    %162 = arith.mulf %157, %161 : vector<8x128xf32>
    %163 = vector.shape_cast %162 : vector<8x128xf32> to vector<1x8x128xf32>
    %164 = arith.truncf %163 : vector<1x8x128xf32> to vector<1x8x128xbf16>
    %165 = arith.index_cast %130 : i32 to index
    %c0_48 = arith.constant 0 : index
    %c0_49 = arith.constant 0 : index
    %166 = vector.load %arg4[%165, %c0_48, %c0_49] : memref<8x8x128xbf16, #tpu.memory_space<vmem>>, vector<1x8x128xbf16>
    tpu.vector_store %arg4[%165, %c0_48, %c0_49], %164 {strides = array<i32>} : memref<8x8x128xbf16, #tpu.memory_space<vmem>>, vector<1x8x128xbf16>,
    %c4_i32 = arith.constant 4 : i32
    %c2_i32_50 = arith.constant 2 : i32
    %167 = arith.muli %c2_i32_50, %c4_i32 : i32
    %c7_i32_51 = arith.constant 7 : i32
    %168 = arith.subi %c7_i32_51, %167 : i32
    %169 = arith.muli %arg0, %168 : i32
    %170 = arith.addi %c4_i32, %169 : i32
    %c0_52 = arith.constant 0 : index
    %171 = arith.index_cast %170 : i32 to index
    %c0_53 = arith.constant 0 : index
    %c0_54 = arith.constant 0 : index
    %172 = vector.load %arg2[%c0_52, %171, %c0_53, %c0_54] : memref<1x8x8x512xf32, #tpu.memory_space<vmem>>, vector<1x1x8x512xf32>
    %173 = vector.shape_cast %172 : vector<1x1x8x512xf32> to vector<1x8x512xf32>
    %174 = vector.shape_cast %173 : vector<1x8x512xf32> to vector<8x512xf32>
    %175 = arith.truncf %162 : vector<8x128xf32> to vector<8x128xbf16>
    %cst_55 = arith.constant dense<0.000000e+00> : vector<8x512xf32>
    %176 = tpu.matmul %175, %4, %cst_55 {dimension_numbers = #tpu.dot_dimension_numbers<[1], [0], [0], [1], [0, 0, 1, 1], [], []>} : vector<8x128xbf16>, vector<128x512xbf16>, vector<8x512xf32> -> vector<8x512xf32>
    %177 = arith.addf %174, %176 : vector<8x512xf32>
    %178 = vector.extract_strided_slice %177 {offsets = [0, 0], sizes = [8, 128], strides = [1, 1]} : vector<8x512xf32> to vector<8x128xf32>
    %179 = arith.negf %178 : vector<8x128xf32>
    %180 = math.exp %179 : vector<8x128xf32>
    %cst_56 = arith.constant 1.000000e+00 : f32
    %181 = vector.broadcast %cst_56 : f32 to vector<8x128xf32>
    %182 = arith.addf %181, %180 : vector<8x128xf32>
    %183 = arith.divf %181, %182 : vector<8x128xf32>
    %184 = vector.extract_strided_slice %177 {offsets = [0, 128], sizes = [8, 128], strides = [1, 1]} : vector<8x512xf32> to vector<8x128xf32>
    %185 = arith.negf %184 : vector<8x128xf32>
    %186 = math.exp %185 : vector<8x128xf32>
    %cst_57 = arith.constant 1.000000e+00 : f32
    %187 = vector.broadcast %cst_57 : f32 to vector<8x128xf32>
    %188 = arith.addf %187, %186 : vector<8x128xf32>
    %189 = arith.divf %187, %188 : vector<8x128xf32>
    %190 = vector.extract_strided_slice %177 {offsets = [0, 256], sizes = [8, 128], strides = [1, 1]} : vector<8x512xf32> to vector<8x128xf32>
    %191 = math.tanh %190 : vector<8x128xf32>
    %192 = vector.extract_strided_slice %177 {offsets = [0, 384], sizes = [8, 128], strides = [1, 1]} : vector<8x512xf32> to vector<8x128xf32>
    %193 = arith.negf %192 : vector<8x128xf32>
    %194 = math.exp %193 : vector<8x128xf32>
    %cst_58 = arith.constant 1.000000e+00 : f32
    %195 = vector.broadcast %cst_58 : f32 to vector<8x128xf32>
    %196 = arith.addf %195, %194 : vector<8x128xf32>
    %197 = arith.divf %195, %196 : vector<8x128xf32>
    %198 = arith.mulf %189, %160 : vector<8x128xf32>
    %199 = arith.mulf %183, %191 : vector<8x128xf32>
    %200 = arith.addf %198, %199 : vector<8x128xf32>
    %201 = math.tanh %200 : vector<8x128xf32>
    %202 = arith.mulf %197, %201 : vector<8x128xf32>
    %203 = vector.shape_cast %202 : vector<8x128xf32> to vector<1x8x128xf32>
    %204 = arith.truncf %203 : vector<1x8x128xf32> to vector<1x8x128xbf16>
    %205 = arith.index_cast %170 : i32 to index
    %c0_59 = arith.constant 0 : index
    %c0_60 = arith.constant 0 : index
    %206 = vector.load %arg4[%205, %c0_59, %c0_60] : memref<8x8x128xbf16, #tpu.memory_space<vmem>>, vector<1x8x128xbf16>
    tpu.vector_store %arg4[%205, %c0_59, %c0_60], %204 {strides = array<i32>} : memref<8x8x128xbf16, #tpu.memory_space<vmem>>, vector<1x8x128xbf16>,
    %c5_i32 = arith.constant 5 : i32
    %c2_i32_61 = arith.constant 2 : i32
    %207 = arith.muli %c2_i32_61, %c5_i32 : i32
    %c7_i32_62 = arith.constant 7 : i32
    %208 = arith.subi %c7_i32_62, %207 : i32
    %209 = arith.muli %arg0, %208 : i32
    %210 = arith.addi %c5_i32, %209 : i32
    %c0_63 = arith.constant 0 : index
    %211 = arith.index_cast %210 : i32 to index
    %c0_64 = arith.constant 0 : index
    %c0_65 = arith.constant 0 : index
    %212 = vector.load %arg2[%c0_63, %211, %c0_64, %c0_65] : memref<1x8x8x512xf32, #tpu.memory_space<vmem>>, vector<1x1x8x512xf32>
    %213 = vector.shape_cast %212 : vector<1x1x8x512xf32> to vector<1x8x512xf32>
    %214 = vector.shape_cast %213 : vector<1x8x512xf32> to vector<8x512xf32>
    %215 = arith.truncf %202 : vector<8x128xf32> to vector<8x128xbf16>
    %cst_66 = arith.constant dense<0.000000e+00> : vector<8x512xf32>
    %216 = tpu.matmul %215, %4, %cst_66 {dimension_numbers = #tpu.dot_dimension_numbers<[1], [0], [0], [1], [0, 0, 1, 1], [], []>} : vector<8x128xbf16>, vector<128x512xbf16>, vector<8x512xf32> -> vector<8x512xf32>
    %217 = arith.addf %214, %216 : vector<8x512xf32>
    %218 = vector.extract_strided_slice %217 {offsets = [0, 0], sizes = [8, 128], strides = [1, 1]} : vector<8x512xf32> to vector<8x128xf32>
    %219 = arith.negf %218 : vector<8x128xf32>
    %220 = math.exp %219 : vector<8x128xf32>
    %cst_67 = arith.constant 1.000000e+00 : f32
    %221 = vector.broadcast %cst_67 : f32 to vector<8x128xf32>
    %222 = arith.addf %221, %220 : vector<8x128xf32>
    %223 = arith.divf %221, %222 : vector<8x128xf32>
    %224 = vector.extract_strided_slice %217 {offsets = [0, 128], sizes = [8, 128], strides = [1, 1]} : vector<8x512xf32> to vector<8x128xf32>
    %225 = arith.negf %224 : vector<8x128xf32>
    %226 = math.exp %225 : vector<8x128xf32>
    %cst_68 = arith.constant 1.000000e+00 : f32
    %227 = vector.broadcast %cst_68 : f32 to vector<8x128xf32>
    %228 = arith.addf %227, %226 : vector<8x128xf32>
    %229 = arith.divf %227, %228 : vector<8x128xf32>
    %230 = vector.extract_strided_slice %217 {offsets = [0, 256], sizes = [8, 128], strides = [1, 1]} : vector<8x512xf32> to vector<8x128xf32>
    %231 = math.tanh %230 : vector<8x128xf32>
    %232 = vector.extract_strided_slice %217 {offsets = [0, 384], sizes = [8, 128], strides = [1, 1]} : vector<8x512xf32> to vector<8x128xf32>
    %233 = arith.negf %232 : vector<8x128xf32>
    %234 = math.exp %233 : vector<8x128xf32>
    %cst_69 = arith.constant 1.000000e+00 : f32
    %235 = vector.broadcast %cst_69 : f32 to vector<8x128xf32>
    %236 = arith.addf %235, %234 : vector<8x128xf32>
    %237 = arith.divf %235, %236 : vector<8x128xf32>
    %238 = arith.mulf %229, %200 : vector<8x128xf32>
    %239 = arith.mulf %223, %231 : vector<8x128xf32>
    %240 = arith.addf %238, %239 : vector<8x128xf32>
    %241 = math.tanh %240 : vector<8x128xf32>
    %242 = arith.mulf %237, %241 : vector<8x128xf32>
    %243 = vector.shape_cast %242 : vector<8x128xf32> to vector<1x8x128xf32>
    %244 = arith.truncf %243 : vector<1x8x128xf32> to vector<1x8x128xbf16>
    %245 = arith.index_cast %210 : i32 to index
    %c0_70 = arith.constant 0 : index
    %c0_71 = arith.constant 0 : index
    %246 = vector.load %arg4[%245, %c0_70, %c0_71] : memref<8x8x128xbf16, #tpu.memory_space<vmem>>, vector<1x8x128xbf16>
    tpu.vector_store %arg4[%245, %c0_70, %c0_71], %244 {strides = array<i32>} : memref<8x8x128xbf16, #tpu.memory_space<vmem>>, vector<1x8x128xbf16>,
    %c6_i32 = arith.constant 6 : i32
    %c2_i32_72 = arith.constant 2 : i32
    %247 = arith.muli %c2_i32_72, %c6_i32 : i32
    %c7_i32_73 = arith.constant 7 : i32
    %248 = arith.subi %c7_i32_73, %247 : i32
    %249 = arith.muli %arg0, %248 : i32
    %250 = arith.addi %c6_i32, %249 : i32
    %c0_74 = arith.constant 0 : index
    %251 = arith.index_cast %250 : i32 to index
    %c0_75 = arith.constant 0 : index
    %c0_76 = arith.constant 0 : index
    %252 = vector.load %arg2[%c0_74, %251, %c0_75, %c0_76] : memref<1x8x8x512xf32, #tpu.memory_space<vmem>>, vector<1x1x8x512xf32>
    %253 = vector.shape_cast %252 : vector<1x1x8x512xf32> to vector<1x8x512xf32>
    %254 = vector.shape_cast %253 : vector<1x8x512xf32> to vector<8x512xf32>
    %255 = arith.truncf %242 : vector<8x128xf32> to vector<8x128xbf16>
    %cst_77 = arith.constant dense<0.000000e+00> : vector<8x512xf32>
    %256 = tpu.matmul %255, %4, %cst_77 {dimension_numbers = #tpu.dot_dimension_numbers<[1], [0], [0], [1], [0, 0, 1, 1], [], []>} : vector<8x128xbf16>, vector<128x512xbf16>, vector<8x512xf32> -> vector<8x512xf32>
    %257 = arith.addf %254, %256 : vector<8x512xf32>
    %258 = vector.extract_strided_slice %257 {offsets = [0, 0], sizes = [8, 128], strides = [1, 1]} : vector<8x512xf32> to vector<8x128xf32>
    %259 = arith.negf %258 : vector<8x128xf32>
    %260 = math.exp %259 : vector<8x128xf32>
    %cst_78 = arith.constant 1.000000e+00 : f32
    %261 = vector.broadcast %cst_78 : f32 to vector<8x128xf32>
    %262 = arith.addf %261, %260 : vector<8x128xf32>
    %263 = arith.divf %261, %262 : vector<8x128xf32>
    %264 = vector.extract_strided_slice %257 {offsets = [0, 128], sizes = [8, 128], strides = [1, 1]} : vector<8x512xf32> to vector<8x128xf32>
    %265 = arith.negf %264 : vector<8x128xf32>
    %266 = math.exp %265 : vector<8x128xf32>
    %cst_79 = arith.constant 1.000000e+00 : f32
    %267 = vector.broadcast %cst_79 : f32 to vector<8x128xf32>
    %268 = arith.addf %267, %266 : vector<8x128xf32>
    %269 = arith.divf %267, %268 : vector<8x128xf32>
    %270 = vector.extract_strided_slice %257 {offsets = [0, 256], sizes = [8, 128], strides = [1, 1]} : vector<8x512xf32> to vector<8x128xf32>
    %271 = math.tanh %270 : vector<8x128xf32>
    %272 = vector.extract_strided_slice %257 {offsets = [0, 384], sizes = [8, 128], strides = [1, 1]} : vector<8x512xf32> to vector<8x128xf32>
    %273 = arith.negf %272 : vector<8x128xf32>
    %274 = math.exp %273 : vector<8x128xf32>
    %cst_80 = arith.constant 1.000000e+00 : f32
    %275 = vector.broadcast %cst_80 : f32 to vector<8x128xf32>
    %276 = arith.addf %275, %274 : vector<8x128xf32>
    %277 = arith.divf %275, %276 : vector<8x128xf32>
    %278 = arith.mulf %269, %240 : vector<8x128xf32>
    %279 = arith.mulf %263, %271 : vector<8x128xf32>
    %280 = arith.addf %278, %279 : vector<8x128xf32>
    %281 = math.tanh %280 : vector<8x128xf32>
    %282 = arith.mulf %277, %281 : vector<8x128xf32>
    %283 = vector.shape_cast %282 : vector<8x128xf32> to vector<1x8x128xf32>
    %284 = arith.truncf %283 : vector<1x8x128xf32> to vector<1x8x128xbf16>
    %285 = arith.index_cast %250 : i32 to index
    %c0_81 = arith.constant 0 : index
    %c0_82 = arith.constant 0 : index
    %286 = vector.load %arg4[%285, %c0_81, %c0_82] : memref<8x8x128xbf16, #tpu.memory_space<vmem>>, vector<1x8x128xbf16>
    tpu.vector_store %arg4[%285, %c0_81, %c0_82], %284 {strides = array<i32>} : memref<8x8x128xbf16, #tpu.memory_space<vmem>>, vector<1x8x128xbf16>,
    %c7_i32_83 = arith.constant 7 : i32
    %c2_i32_84 = arith.constant 2 : i32
    %287 = arith.muli %c2_i32_84, %c7_i32_83 : i32
    %c7_i32_85 = arith.constant 7 : i32
    %288 = arith.subi %c7_i32_85, %287 : i32
    %289 = arith.muli %arg0, %288 : i32
    %290 = arith.addi %c7_i32_83, %289 : i32
    %c0_86 = arith.constant 0 : index
    %291 = arith.index_cast %290 : i32 to index
    %c0_87 = arith.constant 0 : index
    %c0_88 = arith.constant 0 : index
    %292 = vector.load %arg2[%c0_86, %291, %c0_87, %c0_88] : memref<1x8x8x512xf32, #tpu.memory_space<vmem>>, vector<1x1x8x512xf32>
    %293 = vector.shape_cast %292 : vector<1x1x8x512xf32> to vector<1x8x512xf32>
    %294 = vector.shape_cast %293 : vector<1x8x512xf32> to vector<8x512xf32>
    %295 = arith.truncf %282 : vector<8x128xf32> to vector<8x128xbf16>
    %cst_89 = arith.constant dense<0.000000e+00> : vector<8x512xf32>
    %296 = tpu.matmul %295, %4, %cst_89 {dimension_numbers = #tpu.dot_dimension_numbers<[1], [0], [0], [1], [0, 0, 1, 1], [], []>} : vector<8x128xbf16>, vector<128x512xbf16>, vector<8x512xf32> -> vector<8x512xf32>
    %297 = arith.addf %294, %296 : vector<8x512xf32>
    %298 = vector.extract_strided_slice %297 {offsets = [0, 0], sizes = [8, 128], strides = [1, 1]} : vector<8x512xf32> to vector<8x128xf32>
    %299 = arith.negf %298 : vector<8x128xf32>
    %300 = math.exp %299 : vector<8x128xf32>
    %cst_90 = arith.constant 1.000000e+00 : f32
    %301 = vector.broadcast %cst_90 : f32 to vector<8x128xf32>
    %302 = arith.addf %301, %300 : vector<8x128xf32>
    %303 = arith.divf %301, %302 : vector<8x128xf32>
    %304 = vector.extract_strided_slice %297 {offsets = [0, 128], sizes = [8, 128], strides = [1, 1]} : vector<8x512xf32> to vector<8x128xf32>
    %305 = arith.negf %304 : vector<8x128xf32>
    %306 = math.exp %305 : vector<8x128xf32>
    %cst_91 = arith.constant 1.000000e+00 : f32
    %307 = vector.broadcast %cst_91 : f32 to vector<8x128xf32>
    %308 = arith.addf %307, %306 : vector<8x128xf32>
    %309 = arith.divf %307, %308 : vector<8x128xf32>
    %310 = vector.extract_strided_slice %297 {offsets = [0, 256], sizes = [8, 128], strides = [1, 1]} : vector<8x512xf32> to vector<8x128xf32>
    %311 = math.tanh %310 : vector<8x128xf32>
    %312 = vector.extract_strided_slice %297 {offsets = [0, 384], sizes = [8, 128], strides = [1, 1]} : vector<8x512xf32> to vector<8x128xf32>
    %313 = arith.negf %312 : vector<8x128xf32>
    %314 = math.exp %313 : vector<8x128xf32>
    %cst_92 = arith.constant 1.000000e+00 : f32
    %315 = vector.broadcast %cst_92 : f32 to vector<8x128xf32>
    %316 = arith.addf %315, %314 : vector<8x128xf32>
    %317 = arith.divf %315, %316 : vector<8x128xf32>
    %318 = arith.mulf %309, %280 : vector<8x128xf32>
    %319 = arith.mulf %303, %311 : vector<8x128xf32>
    %320 = arith.addf %318, %319 : vector<8x128xf32>
    %321 = math.tanh %320 : vector<8x128xf32>
    %322 = arith.mulf %317, %321 : vector<8x128xf32>
    %323 = vector.shape_cast %322 : vector<8x128xf32> to vector<1x8x128xf32>
    %324 = arith.truncf %323 : vector<1x8x128xf32> to vector<1x8x128xbf16>
    %325 = arith.index_cast %290 : i32 to index
    %c0_93 = arith.constant 0 : index
    %c0_94 = arith.constant 0 : index
    %326 = vector.load %arg4[%325, %c0_93, %c0_94] : memref<8x8x128xbf16, #tpu.memory_space<vmem>>, vector<1x8x128xbf16>
    tpu.vector_store %arg4[%325, %c0_93, %c0_94], %324 {strides = array<i32>} : memref<8x8x128xbf16, #tpu.memory_space<vmem>>, vector<1x8x128xbf16>,
    %c8_i32 = arith.constant 8 : i32
    %c0_95 = arith.constant 0 : index
    %c0_96 = arith.constant 0 : index
    %327 = vector.load %arg7[%c0_95, %c0_96] : memref<8x128xf32, #tpu.memory_space<vmem>>, vector<8x128xf32>
    tpu.vector_store %arg7[%c0_95, %c0_96], %322 {strides = array<i32>} : memref<8x128xf32, #tpu.memory_space<vmem>>, vector<8x128xf32>,
    %c0_97 = arith.constant 0 : index
    %c0_98 = arith.constant 0 : index
    %328 = vector.load %arg8[%c0_97, %c0_98] : memref<8x128xf32, #tpu.memory_space<vmem>>, vector<8x128xf32>
    tpu.vector_store %arg8[%c0_97, %c0_98], %320 {strides = array<i32>} : memref<8x128xf32, #tpu.memory_space<vmem>>, vector<8x128xf32>,
    %c1_i32_99 = arith.constant 1 : i32
    %329 = arith.cmpi eq, %arg1, %c1_i32_99 : i32
    %330 = arith.extui %329 : i1 to i32
    %c0_i32_100 = arith.constant 0 : i32
    %331 = arith.cmpi ne, %330, %c0_i32_100 : i32
    scf.if %331 {
      %c0_101 = arith.constant 0 : index
      %c0_102 = arith.constant 0 : index
      %c0_103 = arith.constant 0 : index
      %332 = vector.load %arg5[%c0_101, %c0_102, %c0_103] : memref<1x8x128xf32, #tpu.memory_space<vmem>>, vector<1x8x128xf32>
      %333 = vector.shape_cast %332 : vector<1x8x128xf32> to vector<8x128xf32>
      %334 = vector.shape_cast %322 : vector<8x128xf32> to vector<1x8x128xf32>
      tpu.vector_store %arg5[%c0_101, %c0_102, %c0_103], %334 {strides = array<i32>} : memref<1x8x128xf32, #tpu.memory_space<vmem>>, vector<1x8x128xf32>,
      %c0_104 = arith.constant 0 : index
      %c0_105 = arith.constant 0 : index
      %c0_106 = arith.constant 0 : index
      %335 = vector.load %arg6[%c0_104, %c0_105, %c0_106] : memref<1x8x128xf32, #tpu.memory_space<vmem>>, vector<1x8x128xf32>
      %336 = vector.shape_cast %335 : vector<1x8x128xf32> to vector<8x128xf32>
      %337 = vector.shape_cast %320 : vector<8x128xf32> to vector<1x8x128xf32>
      tpu.vector_store %arg6[%c0_104, %c0_105, %c0_106], %337 {strides = array<i32>} : memref<1x8x128xf32, #tpu.memory_space<vmem>>, vector<1x8x128xf32>,
    } else {
    }
    return
  }
  func.func @transform_0(%arg0: i32, %arg1: i32) -> (i32, i32, i32, i32) {
    %c2_i32 = arith.constant 2 : i32
    %0 = arith.muli %c2_i32, %arg1 : i32
    %c1_i32 = arith.constant 1 : i32
    %1 = arith.subi %c1_i32, %0 : i32
    %2 = arith.muli %arg0, %1 : i32
    %3 = arith.addi %arg1, %2 : i32
    %c0_i32 = arith.constant 0 : i32
    %c0_i32_0 = arith.constant 0 : i32
    %c0_i32_1 = arith.constant 0 : i32
    return %arg0, %3, %c0_i32, %c0_i32_0 : i32, i32, i32, i32
  }
  func.func @transform_1(%arg0: i32, %arg1: i32) -> (i32, i32, i32) {
    %c0_i32 = arith.constant 0 : i32
    %c0_i32_0 = arith.constant 0 : i32
    %c0_i32_1 = arith.constant 0 : i32
    return %arg0, %c0_i32, %c0_i32_0 : i32, i32, i32
  }
  func.func @transform_2(%arg0: i32, %arg1: i32) -> (i32, i32, i32) {
    %c2_i32 = arith.constant 2 : i32
    %0 = arith.muli %c2_i32, %arg1 : i32
    %c1_i32 = arith.constant 1 : i32
    %1 = arith.subi %c1_i32, %0 : i32
    %2 = arith.muli %arg0, %1 : i32
    %3 = arith.addi %arg1, %2 : i32
    %c0_i32 = arith.constant 0 : i32
    %c0_i32_0 = arith.constant 0 : i32
    return %3, %c0_i32, %arg0 : i32, i32, i32
  }
  func.func @transform_3(%arg0: i32, %arg1: i32) -> (i32, i32, i32) {
    %c0_i32 = arith.constant 0 : i32
    %c0_i32_0 = arith.constant 0 : i32
    %c0_i32_1 = arith.constant 0 : i32
    return %arg0, %c0_i32, %c0_i32_0 : i32, i32, i32
  }
  func.func @transform_4(%arg0: i32, %arg1: i32) -> (i32, i32, i32) {
    %c0_i32 = arith.constant 0 : i32
    %c0_i32_0 = arith.constant 0 : i32
    %c0_i32_1 = arith.constant 0 : i32
    return %arg0, %c0_i32, %c0_i32_0 : i32, i32, i32
  }
}

module attributes {stable_mosaic.version = 11 : i64} {
  func.func @_matmul_bias_kernel(%arg0: i32, %arg1: i32, %arg2: memref<128x256xbf16, #tpu.memory_space<vmem>>, %arg3: memref<256x128xbf16, #tpu.memory_space<vmem>>, %arg4: memref<1x128xf32, #tpu.memory_space<vmem>>, %arg5: memref<128x128xf32, #tpu.memory_space<vmem>>) attributes {dimension_semantics = [#tpu.dimension_semantics<parallel>, #tpu.dimension_semantics<parallel>], iteration_bounds = array<i64: 1, 1>, scalar_prefetch = 0 : i64, scratch_operands = 0 : i64, tpu.core_type = #tpu.core_type<tc>, window_params = [{transform_indices = @transform_0, window_bounds = array<i64: 128, 256>}, {transform_indices = @transform_1, window_bounds = array<i64: 256, 128>}, {transform_indices = @transform_2, window_bounds = array<i64: 1, 128>}, {transform_indices = @transform_3, window_bounds = array<i64: 128, 128>}]} {
    %c0 = arith.constant 0 : index
    %c0_0 = arith.constant 0 : index
    %0 = vector.load %arg2[%c0, %c0_0] : memref<128x256xbf16, #tpu.memory_space<vmem>>, vector<128x256xbf16>
    %c0_1 = arith.constant 0 : index
    %c0_2 = arith.constant 0 : index
    %1 = vector.load %arg3[%c0_1, %c0_2] : memref<256x128xbf16, #tpu.memory_space<vmem>>, vector<256x128xbf16>
    %cst = arith.constant dense<0.000000e+00> : vector<128x128xf32>
    %2 = tpu.matmul %0, %1, %cst {dimension_numbers = #tpu.dot_dimension_numbers<[1], [0], [0], [1], [0, 0, 1, 1], [], []>} : vector<128x256xbf16>, vector<256x128xbf16>, vector<128x128xf32> -> vector<128x128xf32>
    %c0_3 = arith.constant 0 : index
    %c0_4 = arith.constant 0 : index
    %3 = vector.load %arg4[%c0_3, %c0_4] : memref<1x128xf32, #tpu.memory_space<vmem>>, vector<1x128xf32>
    %4 = vector.broadcast %3 : vector<1x128xf32> to vector<128x128xf32>
    %5 = arith.addf %2, %4 : vector<128x128xf32>
    %c0_5 = arith.constant 0 : index
    %c0_6 = arith.constant 0 : index
    %6 = vector.load %arg5[%c0_5, %c0_6] : memref<128x128xf32, #tpu.memory_space<vmem>>, vector<128x128xf32>
    tpu.vector_store %arg5[%c0_5, %c0_6], %5 {strides = array<i32>} : memref<128x128xf32, #tpu.memory_space<vmem>>, vector<128x128xf32>,
    return
  }
  func.func @transform_0(%arg0: i32, %arg1: i32) -> (i32, i32) {
    %c0_i32 = arith.constant 0 : i32
    %c0_i32_0 = arith.constant 0 : i32
    return %arg0, %c0_i32 : i32, i32
  }
  func.func @transform_1(%arg0: i32, %arg1: i32) -> (i32, i32) {
    %c0_i32 = arith.constant 0 : i32
    %c0_i32_0 = arith.constant 0 : i32
    return %c0_i32, %arg1 : i32, i32
  }
  func.func @transform_2(%arg0: i32, %arg1: i32) -> (i32, i32) {
    %c0_i32 = arith.constant 0 : i32
    %c0_i32_0 = arith.constant 0 : i32
    return %c0_i32, %arg1 : i32, i32
  }
  func.func @transform_3(%arg0: i32, %arg1: i32) -> (i32, i32) {
    %c0_i32 = arith.constant 0 : i32
    return %arg0, %arg1 : i32, i32
  }
}

</mosaic_0001>

<bundles_post_ra>
// kernel: bilstm_forward.9
= control target key start
LH: loop header
LB: loop body
LE: loop exit
PB: predicated region body
PF: predicated region fallthrough
CT: control target
= control target key end

     0   :  { %s772_s0 = inlined_call_operand.vmem [shape: bf16[128,256], index: 0, kind: input, shape index: {}]   ;;  %s773_s1 = inlined_call_operand.vmem [shape: bf16[256,128], index: 1, kind: input, shape index: {}]   ;;  %s774_s2 = inlined_call_operand.vmem [shape: f32[1,128], index: 2, kind: input, shape index: {}]   ;;  %s775_s3 = inlined_call_operand.hbm [shape: f32[128,128], index: 3, kind: output, shape index: {}]  }
   0x1   :  { %v526_v0 = vld [vmem:[%s773_s1 + $0x38] sm:$0xff]  ;;  %v525_v2 = vld [vmem:[%s773_s1 + $0x30] sm:$0xff]  ;;  %v524_v4 = vld [vmem:[%s773_s1 + $0x28] sm:$0xff] }
   0x2   :  { %v534_v1 = vld [vmem:[%s773_s1 + $0x78] sm:$0xff]  ;;  %243 = vmatpush.bf16.msra.mxu0 %v526_v0  ;;  %535 = vmatpush.bf16.msra.mxu2 %v526_v0  ;;  %v533_v3 = vld [vmem:[%s773_s1 + $0x70] sm:$0xff]  ;;  %v532_v5 = vld [vmem:[%s773_s1 + $0x68] sm:$0xff] }
   0x3   :  { %292 = vmatpush.bf16.msra.mxu1 %v534_v1  ;;  %543 = vmatpush.bf16.msra.mxu3 %v534_v1 }
   0x6   :  { %244 = vmatpush.bf16.msra.mxu0 %v525_v2  ;;  %536 = vmatpush.bf16.msra.mxu2 %v525_v2 }
   0x7   :  { %293 = vmatpush.bf16.msra.mxu1 %v533_v3  ;;  %544 = vmatpush.bf16.msra.mxu3 %v533_v3 }
   0x8   :  { %8 = vsyncpa [#allocation3], 0  ;;  %v523_v6 = vld [vmem:[%s773_s1 + $0x20] sm:$0xff]  ;;  %v522_v8 = vld [vmem:[%s773_s1 + $0x18] sm:$0xff]  ;;  %s363_s28 = sshll.u32 %s775_s3, 4  ;;  %s582_s29 = smov 128   ;;  %s364_s28 = int_to_ptr.hbm [resolvable:$true] %s363_s28 }
   0x9   :  { %v531_v7 = vld [vmem:[%s773_s1 + $0x60] sm:$0xff]  ;;  %v530_v9 = vld [vmem:[%s773_s1 + $0x58] sm:$0xff]  ;;  %v521_v10 = vld [vmem:[%s773_s1 + $0x10] sm:$0xff]  ;;  %s583_s30 = smov 8  }
   0xa   :  { %245 = vmatpush.bf16.msra.mxu0 %v524_v4  ;;  %537 = vmatpush.bf16.msra.mxu2 %v524_v4  ;;  %v529_v11 = vld [vmem:[%s773_s1 + $0x50] sm:$0xff]  ;;  %v520_v12 = vld [vmem:[%s773_s1 + $0x8] sm:$0xff]  ;;  %v519_v14 = vld [vmem:[%s773_s1] sm:$0xff] }
   0xb   :  { %294 = vmatpush.bf16.msra.mxu1 %v532_v5  ;;  %545 = vmatpush.bf16.msra.mxu3 %v532_v5  ;;  %v528_v13 = vld [vmem:[%s773_s1 + $0x48] sm:$0xff]  ;;  %v527_v15 = vld [vmem:[%s773_s1 + $0x40] sm:$0xff]  ;;  %v385_v28 = vld [vmem:[%s772_s0 + $0x10] sm:$0xf] }
   0xc   :  { %v377_v16 = vld [vmem:[%s772_s0] sm:$0xf]  ;;  %v504_v17 = vld [vmem:[%s772_s0 + $0x4] sm:$0xf0]  ;;  %v503_v20 = vld [vmem:[%s772_s0 + $0x4] sm:$0xf] }
   0xd   :  { %v409_v18 = vld [vmem:[%s772_s0 + $0x40] sm:$0xf]  ;;  %v512_v19 = vld [vmem:[%s772_s0 + $0x44] sm:$0xf0]  ;;  %v379_v21 = vld [vmem:[%s772_s0 + $0x8] sm:$0xf0]  ;;  %v378_v24 = vor.u32 %v504_v17, %v377_v16 }
   0xe   :  { %246 = vmatpush.bf16.msra.mxu0 %v523_v6  ;;  %538 = vmatpush.bf16.msra.mxu2 %v523_v6  ;;  %v511_v22 = vld [vmem:[%s772_s0 + $0x44] sm:$0xf]  ;;  %v411_v23 = vld [vmem:[%s772_s0 + $0x48] sm:$0xf0]  ;;  %v410_v25 = vor.u32 %v512_v19, %v409_v18  ;;  %v382_v26 = vor.u32 %v503_v20, %v379_v21  ;;  %v506_v29 = vld [vmem:[%s772_s0 + $0x14] sm:$0xf0] }
   0xf   :  { %295 = vmatpush.bf16.msra.mxu1 %v531_v7  ;;  %546 = vmatpush.bf16.msra.mxu3 %v531_v7  ;;  %v414_v27 = vor.u32 %v511_v22, %v411_v23  ;;  %v417_v30 = vld [vmem:[%s772_s0 + $0x50] sm:$0xf]  ;;  %v514_v31 = vld [vmem:[%s772_s0 + $0x54] sm:$0xf0]  ;;  %v505_v32 = vld [vmem:[%s772_s0 + $0x14] sm:$0xf]  ;;  %v386_v36 = vor.u32 %v506_v29, %v385_v28 }
  0x10   :  { %v387_v33 = vld [vmem:[%s772_s0 + $0x18] sm:$0xf0]  ;;  %v513_v34 = vld [vmem:[%s772_s0 + $0x54] sm:$0xf]  ;;  %v418_v37 = vor.u32 %v514_v31, %v417_v30  ;;  %v393_v40 = vld [vmem:[%s772_s0 + $0x20] sm:$0xf] }
  0x11   :  { %v419_v35 = vld [vmem:[%s772_s0 + $0x58] sm:$0xf0]  ;;  %v390_v38 = vor.u32 %v505_v32, %v387_v33  ;;  %v508_v41 = vld [vmem:[%s772_s0 + $0x24] sm:$0xf0]  ;;  %v425_v42 = vld [vmem:[%s772_s0 + $0x60] sm:$0xf] }
  0x12   :  { %247 = vmatpush.bf16.msra.mxu0 %v522_v8  ;;  %539 = vmatpush.bf16.msra.mxu2 %v522_v8  ;;  %v422_v39 = vor.u32 %v513_v34, %v419_v35  ;;  %v516_v43 = vld [vmem:[%s772_s0 + $0x64] sm:$0xf0]  ;;  %v507_v44 = vld [vmem:[%s772_s0 + $0x24] sm:$0xf]  ;;  %v395_v45 = vld [vmem:[%s772_s0 + $0x28] sm:$0xf0]  ;;  %v394_v48 = vor.u32 %v508_v41, %v393_v40 }
  0x13   :  { %296 = vmatpush.bf16.msra.mxu1 %v530_v9  ;;  %547 = vmatpush.bf16.msra.mxu3 %v530_v9  ;;  %v515_v46 = vld [vmem:[%s772_s0 + $0x64] sm:$0xf]  ;;  %v427_v47 = vld [vmem:[%s772_s0 + $0x68] sm:$0xf0]  ;;  %v426_v49 = vor.u32 %v516_v43, %v425_v42  ;;  %v398_v50 = vor.u32 %v507_v44, %v395_v45  ;;  %v401_v52 = vld [vmem:[%s772_s0 + $0x30] sm:$0xf] }
  0x14   :  { %v430_v51 = vor.u32 %v515_v46, %v427_v47  ;;  %v510_v53 = vld [vmem:[%s772_s0 + $0x34] sm:$0xf0]  ;;  %v433_v54 = vld [vmem:[%s772_s0 + $0x70] sm:$0xf]  ;;  %v509_v56 = vld [vmem:[%s772_s0 + $0x34] sm:$0xf] }
  0x15   :  { %v518_v55 = vld [vmem:[%s772_s0 + $0x74] sm:$0xf0]  ;;  %v403_v57 = vld [vmem:[%s772_s0 + $0x38] sm:$0xf0]  ;;  %v517_v58 = vld [vmem:[%s772_s0 + $0x74] sm:$0xf]  ;;  %v402_v60 = vor.u32 %v510_v53, %v401_v52 }
  0x16   :  { %248 = vmatpush.bf16.msra.mxu0 %v521_v10  ;;  %540 = vmatpush.bf16.msra.mxu2 %v521_v10  ;;  %v435_v59 = vld [vmem:[%s772_s0 + $0x78] sm:$0xf0]  ;;  %v434_v61 = vor.u32 %v518_v55, %v433_v54  ;;  %v406_v62 = vor.u32 %v509_v56, %v403_v57  ;;  %v751_v0 = vld [vmem:[%s774_s2] ss:$0 sm:$0xff]  ;;  %s581_s0 = smov [#allocation2]  }
  0x17   :  { %297 = vmatpush.bf16.msra.mxu1 %v529_v11  ;;  %548 = vmatpush.bf16.msra.mxu3 %v529_v11  ;;  %v438_v63 = vor.u32 %v517_v58, %v435_v59  ;;  %s361_s2 = sshll.u32 %s581_s0, 4  ;;  %s362_s2 = int_to_ptr.vmem [resolvable:$true] %s361_s2 }
  0x1a   :  { %249 = vmatpush.bf16.msra.mxu0 %v520_v12  ;;  %541 = vmatpush.bf16.msra.mxu2 %v520_v12 }
  0x1b   :  { %298 = vmatpush.bf16.msra.mxu1 %v528_v13  ;;  %549 = vmatpush.bf16.msra.mxu3 %v528_v13 }
  0x1e   :  { %250 = vmatpush.bf16.msra.mxu0 %v519_v14  ;;  %542 = vmatpush.bf16.msra.mxu2 %v519_v14 }
  0x1f   :  { %299 = vmatpush.bf16.msra.mxu1 %v527_v15  ;;  %550 = vmatpush.bf16.msra.mxu3 %v527_v15 }
  0x21   :  { %251 = vmatmul.bf16.vlgmr.msra.gmra.mxu0 %v378_v24  ;;  %271 = vmatmul.bf16.vlgmr.msra.gmra.mxu2 %v410_v25 }
  0x22   :  { %300 = vmatmul.bf16.vlgmr.msra.gmra.mxu1 %v382_v26  ;;  %320 = vmatmul.bf16.vlgmr.msra.gmra.mxu3 %v414_v27 }
  0x31   :  { %256 = vmatmul.bf16.gmra.mxu0 %v386_v36  ;;  %276 = vmatmul.bf16.gmra.mxu2 %v418_v37 }
  0x32   :  { %305 = vmatmul.bf16.gmra.mxu1 %v390_v38  ;;  %325 = vmatmul.bf16.gmra.mxu3 %v422_v39 }
  0x41   :  { %261 = vmatmul.bf16.gmra.mxu0 %v394_v48  ;;  %281 = vmatmul.bf16.gmra.mxu2 %v426_v49 }
  0x42   :  { %310 = vmatmul.bf16.gmra.mxu1 %v398_v50  ;;  %330 = vmatmul.bf16.gmra.mxu3 %v430_v51 }
  0x51   :  { %266 = vmatmul.bf16.gmra.mxu0 %v402_v60  ;;  %286 = vmatmul.bf16.gmra.mxu2 %v434_v61 }
  0x52   :  { %315 = vmatmul.bf16.gmra.mxu1 %v406_v62  ;;  %335 = vmatmul.bf16.gmra.mxu3 %v438_v63 }
  0x9e   :  { %v252_v1 = vpop.f32.mrf.mxu0 }
  0x9f   :  { %v253_v2 = vadd.f32 %v751_v0, %v252_v1  ;;  %v301_v3 = vpop.f32.mrf.mxu1 }
  0xa1   :  { %v302_v4 = vadd.f32 %v301_v3, %v253_v2 }
  0xa3   :  { %341 = vst [vmem:[#allocation2] sm:$0xff] %v302_v4 }
  0xa4   :  { %v272_v5 = vpop.f32.mrf.mxu2 }
  0xa5   :  { %v273_v6 = vadd.f32 %v751_v0, %v272_v5  ;;  %v321_v7 = vpop.f32.mrf.mxu3 }
  0xa6   :  { %v254_v8 = vpop.f32.mrf.mxu0 }
  0xa7   :  { %v322_v9 = vadd.f32 %v321_v7, %v273_v6  ;;  %v255_v10 = vadd.f32 %v751_v0, %v254_v8  ;;  %v303_v11 = vpop.f32.mrf.mxu1 }
  0xa9   :  { %349 = vst [vmem:[#allocation2 + $0x40] sm:$0xff] %v322_v9  ;;  %v304_v12 = vadd.f32 %v303_v11, %v255_v10 }
  0xab   :  { %342 = vst [vmem:[#allocation2 + $0x8] sm:$0xff] %v304_v12 }
  0xac   :  { %v274_v13 = vpop.f32.mrf.mxu2 }
  0xad   :  { %v275_v14 = vadd.f32 %v751_v0, %v274_v13  ;;  %v323_v15 = vpop.f32.mrf.mxu3 }
  0xae   :  { %v257_v16 = vpop.f32.mrf.mxu0 }
  0xaf   :  { %v324_v17 = vadd.f32 %v323_v15, %v275_v14  ;;  %v258_v18 = vadd.f32 %v751_v0, %v257_v16  ;;  %v306_v19 = vpop.f32.mrf.mxu1 }
  0xb1   :  { %350 = vst [vmem:[#allocation2 + $0x48] sm:$0xff] %v324_v17  ;;  %v307_v20 = vadd.f32 %v306_v19, %v258_v18 }
  0xb3   :  { %343 = vst [vmem:[#allocation2 + $0x10] sm:$0xff] %v307_v20 }
  0xb4   :  { %v277_v21 = vpop.f32.mrf.mxu2 }
  0xb5   :  { %v278_v22 = vadd.f32 %v751_v0, %v277_v21  ;;  %v326_v23 = vpop.f32.mrf.mxu3 }
  0xb6   :  { %v259_v24 = vpop.f32.mrf.mxu0 }
  0xb7   :  { %v327_v25 = vadd.f32 %v326_v23, %v278_v22  ;;  %v260_v26 = vadd.f32 %v751_v0, %v259_v24  ;;  %v308_v27 = vpop.f32.mrf.mxu1 }
  0xb9   :  { %351 = vst [vmem:[#allocation2 + $0x50] sm:$0xff] %v327_v25  ;;  %v309_v28 = vadd.f32 %v308_v27, %v260_v26 }
  0xbb   :  { %344 = vst [vmem:[#allocation2 + $0x18] sm:$0xff] %v309_v28 }
  0xbc   :  { %v279_v29 = vpop.f32.mrf.mxu2 }
  0xbd   :  { %v280_v30 = vadd.f32 %v751_v0, %v279_v29  ;;  %v328_v31 = vpop.f32.mrf.mxu3 }
  0xbe   :  { %v262_v32 = vpop.f32.mrf.mxu0 }
  0xbf   :  { %v329_v33 = vadd.f32 %v328_v31, %v280_v30  ;;  %v263_v34 = vadd.f32 %v751_v0, %v262_v32  ;;  %v311_v35 = vpop.f32.mrf.mxu1 }
  0xc1   :  { %352 = vst [vmem:[#allocation2 + $0x58] sm:$0xff] %v329_v33  ;;  %v312_v36 = vadd.f32 %v311_v35, %v263_v34 }
  0xc3   :  { %345 = vst [vmem:[#allocation2 + $0x20] sm:$0xff] %v312_v36 }
  0xc4   :  { %v282_v37 = vpop.f32.mrf.mxu2 }
  0xc5   :  { %v283_v38 = vadd.f32 %v751_v0, %v282_v37  ;;  %v331_v39 = vpop.f32.mrf.mxu3 }
  0xc6   :  { %v264_v40 = vpop.f32.mrf.mxu0 }
  0xc7   :  { %v332_v41 = vadd.f32 %v331_v39, %v283_v38  ;;  %v265_v42 = vadd.f32 %v751_v0, %v264_v40  ;;  %v313_v43 = vpop.f32.mrf.mxu1 }
  0xc9   :  { %353 = vst [vmem:[#allocation2 + $0x60] sm:$0xff] %v332_v41  ;;  %v314_v44 = vadd.f32 %v313_v43, %v265_v42 }
  0xcb   :  { %346 = vst [vmem:[#allocation2 + $0x28] sm:$0xff] %v314_v44 }
  0xcc   :  { %v284_v45 = vpop.f32.mrf.mxu2 }
  0xcd   :  { %v285_v46 = vadd.f32 %v751_v0, %v284_v45  ;;  %v333_v47 = vpop.f32.mrf.mxu3 }
  0xce   :  { %v267_v48 = vpop.f32.mrf.mxu0 }
  0xcf   :  { %v334_v49 = vadd.f32 %v333_v47, %v285_v46  ;;  %v268_v50 = vadd.f32 %v751_v0, %v267_v48  ;;  %v316_v51 = vpop.f32.mrf.mxu1 }
  0xd1   :  { %354 = vst [vmem:[#allocation2 + $0x68] sm:$0xff] %v334_v49  ;;  %v317_v52 = vadd.f32 %v316_v51, %v268_v50 }
  0xd3   :  { %347 = vst [vmem:[#allocation2 + $0x30] sm:$0xff] %v317_v52 }
  0xd4   :  { %v287_v53 = vpop.f32.mrf.mxu2 }
  0xd5   :  { %v288_v54 = vadd.f32 %v751_v0, %v287_v53  ;;  %v336_v55 = vpop.f32.mrf.mxu3 }
  0xd6   :  { %v269_v56 = vpop.f32.mrf.mxu0 }
  0xd7   :  { %v337_v57 = vadd.f32 %v336_v55, %v288_v54  ;;  %v270_v58 = vadd.f32 %v751_v0, %v269_v56  ;;  %v318_v59 = vpop.f32.mrf.mxu1 }
  0xd9   :  { %355 = vst [vmem:[#allocation2 + $0x70] sm:$0xff] %v337_v57  ;;  %v319_v60 = vadd.f32 %v318_v59, %v270_v58 }
  0xdb   :  { %348 = vst [vmem:[#allocation2 + $0x38] sm:$0xff] %v319_v60 }
  0xdc   :  { %v289_v61 = vpop.f32.mrf.mxu2 }
  0xdd   :  { %v290_v62 = vadd.f32 %v751_v0, %v289_v61  ;;  %v338_v63 = vpop.f32.mrf.mxu3 }
  0xdf   :  { %v339_v1 = vadd.f32 %v338_v63, %v290_v62 }
  0xe1   :  { %356 = vst [vmem:[#allocation2 + $0x78] sm:$0xff] %v339_v1 }
  0xe2   :  { %369 = dma.vmem_to_hbm [thread:$0]  %s362_s2, 2048, %s364_s28, [#allocation3], %s582_s29, %s582_s29, %s583_s30  }
  0xe3   :  { %579 = dma.done.wait [#allocation3], 2048  }
  0xe4   :  { %580 = vsyncadd [#allocation3], 4294965248 }
  0xe5   :  { %374 = vsyncpa [#allocation3], 1 }

// kernel: bilstm_forward.7
= control target key start
LH: loop header
LB: loop body
LE: loop exit
PB: predicated region body
PF: predicated region fallthrough
CT: control target
= control target key end

     0   :  { %8 = vsyncpa [#allocation3], 0  ;;  %s2527_s0 = inlined_call_operand.vmem [shape: bf16[128,256], index: 0, kind: input, shape index: {}]   ;;  %s2528_s1 = inlined_call_operand.hbm [shape: bf16[2,256,512], index: 1, kind: input, shape index: {}]   ;;  %s2529_s2 = inlined_call_operand.vmem [shape: f32[2,1,512], index: 2, kind: input, shape index: {}]   ;;  %s2530_s3 = inlined_call_operand.vmem [shape: f32[2,128,512], index: 3, kind: output, shape index: {}]  }
   0x1   :  { %10 = vsyncpa [#allocation3 + $0x1], 0  ;;  %s1970_s12 = smov 0   ;;  %s1972_s13 = smov 0  }
   0x2   :  { %s1974_s14 = smov 0   ;;  %s1976_s15 = smov 0  }
   0x3   :  { %s1978_s16 = smov 0   ;;  %s1980_s17 = smov 0  }
   0x4 LB: > { %s1392_s18 = sadd.s32 4294967295, %s1946_s17   ;;  %s35_s19 = sadd.s32 1, %s1942_s16  ;;  %s1946_s17 = sphi %s1980_s17, %s16_s17   ;;  %s1942_s16 = sphi %s1978_s16, %s2537_s16   ;;  %s1938_s15 = sphi %s1976_s15, %s2536_s15   ;;  %s1934_s14 = sphi %s1974_s14, %s2535_s14   ;;  %s1930_s13 = sphi %s1972_s13, %s2534_s13   ;;  %s1926_s12 = sphi %s1970_s12, %s2533_s12  }
   0x5   : > { %p37_p0 = scmp.ge.s32.totalorder %s35_s19, 2  ;;  %s70_s20 = sadd.s32 1, %s1934_s14 }
   0x6   : > { %p77_p1 = scmp.ne.s32.totalorder %s1934_s14, %s1930_s13  ;;  %p78_p2 = scmp.eq.s32.totalorder %s1946_s17, 0 }
   0x7   : > { %s2539_s19 = smov (%p37_p0, %s35_s19), 0  ;;  %p83_p4 = scmp.ne.s32.totalorder %s1930_s13, %s1926_s12 }
   0x8   : > { %p2006_p3 = por %p78_p2, %p77_p1  ;;  %s65_s22 = ssub.s32 %s1942_s16, %s2539_s19 }
   0x9   : > { %p84_p5 = scmp.eq.s32.totalorder %s1392_s18, 0  ;;  %p68_p6 = scmp.eq.s32.totalorder %s65_s22, 0 }
   0xa   : > { %p1815_p8 = scmp.lt.s32.totalorder %s1946_s17, 2  ;;  %s175_s25 = sand.u32 1, %s1934_s14  }
   0xb   : > { %p2013_p7 = por %p84_p5, %p83_p4  ;;  %s1727_s26 = sshll.u32 %s1942_s16, 9 }
   0xc   : > { %s2019_s24 = scalar_select %p68_p6, %s1934_s14, %s70_s20  }
   0xd   : > { %s1397_s27 = sshll.u32 %s175_s25, 9  ;;  %s186_s30 = scalar_lea.hbm %s2528_s1, %s1727_s26 }
   0xe   : > { %s187_s4 = sshll.u32 %s186_s30, 4  ;;  %s179_s5 = scalar_lea.vmem [#allocation2], %s1397_s27  ;;  %s188_s4 = int_to_ptr.hbm [resolvable:$true] %s187_s4 }
   0xf   : > { %s189_s6 = sshll.u32 %s179_s5, 4  ;;  %p1812_p9 = pnand %p1815_p8, %p2006_p3  ;;  %s190_s6 = int_to_ptr.vmem [resolvable:$true] %s189_s6 }
  0x10   : > { %p1400_p10 = scmp.ge.s32.totalorder %s1946_s17, 1  ;;  %p209_p11 = scmp.lt.s32.totalorder %s1946_s17, 3 }
  0x11   : > { %s176_s7 = scalar_lea.sflag [#allocation3], %s175_s25  ;;  %s1948_s8 = smov 256  }
  0x12   : > { %s1949_s9 = smov 16   ;;  %p210_p12 = pnand %p1400_p10, %p209_p11 }
  0x13   : > { %1814 = dma.hbm_to_vmem [thread:$0]  (!%p1812_p9), %s188_s4, 8192, %s190_s6, %s176_s7, %s1948_s8, %s1948_s8, %s1949_s9  }
  0x14   : > { %213 = sbr.rel (%p210_p12) target bundleno = 447 (0x1bf), region = 32  ;;  %s215_s10 = sand.u32 (!%p210_p12), 1, %s1930_s13  }
  0x15   : > { %s1401_s11 = sshll.u32 (!%p210_p12), %s215_s10, 9  ;;  %s216_s12 = scalar_lea.sflag (!%p210_p12), [#allocation3], %s215_s10 }
  0x16   : > { %s2031_s18 = scalar_lea.vmem (!%p210_p12), [#allocation2], %s1401_s11 }
  0x19   : > { %1921 = dma.done.wait (%p2013_p7), %s216_s12, 8192  }
  0x1a   : > { %1923 = vsyncadd (%p2013_p7), %s216_s12, 4294959104  ;;  %v1583_v0 = vld [vmem:[%s2031_s18 + $0xe0] sm:$0xf]  ;;  %v1775_v1 = vld [vmem:[%s2031_s18 + $0xec] sm:$0xf0]  ;;  %p275_p13 = scmp.lt.s32.totalorder %s1938_s15, 1 }
  0x1b   : > { %v1711_v2 = vld [vmem:[%s2031_s18 + $0x1e0] sm:$0xf]  ;;  %v1584_v3 = vor.u32 %v1775_v1, %v1583_v0  ;;  %v1807_v4 = vld [vmem:[%s2031_s18 + $0x1ec] sm:$0xf0]  ;;  %v1773_v5 = vld [vmem:[%s2031_s18 + $0xe4] sm:$0xf] }
  0x1c   : > { %v1585_v6 = vld [vmem:[%s2031_s18 + $0xf0] sm:$0xf0]  ;;  %v1712_v7 = vor.u32 %v1807_v4, %v1711_v2  ;;  %v1805_v9 = vld [vmem:[%s2031_s18 + $0x1e4] sm:$0xf]  ;;  %v1567_v11 = vld [vmem:[%s2031_s18 + $0xc0] sm:$0xf] }
  0x1d   : > { %v1588_v8 = vor.u32 %v1773_v5, %v1585_v6  ;;  %v1713_v10 = vld [vmem:[%s2031_s18 + $0x1f0] sm:$0xf0]  ;;  %789 = vmatpush.bf16.msra.mxu0 %v1584_v3  ;;  %v1771_v13 = vld [vmem:[%s2031_s18 + $0xcc] sm:$0xf0]  ;;  %v1695_v14 = vld [vmem:[%s2031_s18 + $0x1c0] sm:$0xf] }
  0x1e   : > { %v1716_v12 = vor.u32 %v1805_v9, %v1713_v10  ;;  %v1803_v15 = vld [vmem:[%s2031_s18 + $0x1cc] sm:$0xf0]  ;;  %838 = vmatpush.bf16.msra.mxu1 %v1712_v7  ;;  %v1568_v16 = vor.u32 %v1771_v13, %v1567_v11  ;;  %v1769_v18 = vld [vmem:[%s2031_s18 + $0xc4] sm:$0xf]  ;;  %v1569_v19 = vld [vmem:[%s2031_s18 + $0xd0] sm:$0xf0] }
  0x1f   : > { %887 = vmatpush.bf16.msra.mxu2 %v1588_v8  ;;  %v1696_v17 = vor.u32 %v1803_v15, %v1695_v14  ;;  %v1801_v20 = vld [vmem:[%s2031_s18 + $0x1c4] sm:$0xf]  ;;  %v1572_v21 = vor.u32 %v1769_v18, %v1569_v19  ;;  %v1697_v22 = vld [vmem:[%s2031_s18 + $0x1d0] sm:$0xf0]  ;;  %v1551_v23 = vld [vmem:[%s2031_s18 + $0xa0] sm:$0xf] }
  0x20   : > { %936 = vmatpush.bf16.msra.mxu3 %v1716_v12  ;;  %v1767_v24 = vld [vmem:[%s2031_s18 + $0xac] sm:$0xf0]  ;;  %v1700_v25 = vor.u32 %v1801_v20, %v1697_v22  ;;  %v1679_v26 = vld [vmem:[%s2031_s18 + $0x1a0] sm:$0xf]  ;;  %v1765_v28 = vld [vmem:[%s2031_s18 + $0xa4] sm:$0xf] }
  0x21   : > { %v1799_v27 = vld [vmem:[%s2031_s18 + $0x1ac] sm:$0xf0]  ;;  %790 = vmatpush.bf16.msra.mxu0 %v1568_v16  ;;  %v1552_v29 = vor.u32 %v1767_v24, %v1551_v23  ;;  %v1553_v30 = vld [vmem:[%s2031_s18 + $0xb0] sm:$0xf0]  ;;  %v1797_v31 = vld [vmem:[%s2031_s18 + $0x1a4] sm:$0xf] }
  0x22   : > { %v1681_v32 = vld [vmem:[%s2031_s18 + $0x1b0] sm:$0xf0]  ;;  %839 = vmatpush.bf16.msra.mxu1 %v1696_v17  ;;  %v1680_v33 = vor.u32 %v1799_v27, %v1679_v26  ;;  %v1556_v34 = vor.u32 %v1765_v28, %v1553_v30  ;;  %v1535_v35 = vld [vmem:[%s2031_s18 + $0x80] sm:$0xf]  ;;  %v1763_v36 = vld [vmem:[%s2031_s18 + $0x8c] sm:$0xf0] }
  0x23   : > { %888 = vmatpush.bf16.msra.mxu2 %v1572_v21  ;;  %v1663_v37 = vld [vmem:[%s2031_s18 + $0x180] sm:$0xf]  ;;  %v1684_v38 = vor.u32 %v1797_v31, %v1681_v32  ;;  %v1795_v39 = vld [vmem:[%s2031_s18 + $0x18c] sm:$0xf0]  ;;  %v1761_v40 = vld [vmem:[%s2031_s18 + $0x84] sm:$0xf]  ;;  %v1536_v44 = vor.u32 %v1763_v36, %v1535_v35 }
  0x24   : > { %937 = vmatpush.bf16.msra.mxu3 %v1700_v25  ;;  %v1537_v41 = vld [vmem:[%s2031_s18 + $0x90] sm:$0xf0]  ;;  %v1793_v42 = vld [vmem:[%s2031_s18 + $0x184] sm:$0xf]  ;;  %v1664_v45 = vor.u32 %v1795_v39, %v1663_v37  ;;  %v1519_v47 = vld [vmem:[%s2031_s18 + $0x60] sm:$0xf] }
  0x25   : > { %v1665_v43 = vld [vmem:[%s2031_s18 + $0x190] sm:$0xf0]  ;;  %791 = vmatpush.bf16.msra.mxu0 %v1552_v29  ;;  %v1540_v46 = vor.u32 %v1761_v40, %v1537_v41  ;;  %v1759_v48 = vld [vmem:[%s2031_s18 + $0x6c] sm:$0xf0]  ;;  %v1647_v49 = vld [vmem:[%s2031_s18 + $0x160] sm:$0xf] }
  0x26   : > { %840 = vmatpush.bf16.msra.mxu1 %v1680_v33  ;;  %v1668_v50 = vor.u32 %v1793_v42, %v1665_v43  ;;  %v1791_v51 = vld [vmem:[%s2031_s18 + $0x16c] sm:$0xf0]  ;;  %v1757_v52 = vld [vmem:[%s2031_s18 + $0x64] sm:$0xf]  ;;  %v1521_v53 = vld [vmem:[%s2031_s18 + $0x70] sm:$0xf0]  ;;  %v1520_v56 = vor.u32 %v1759_v48, %v1519_v47 }
  0x27   : > { %889 = vmatpush.bf16.msra.mxu2 %v1556_v34  ;;  %v1789_v54 = vld [vmem:[%s2031_s18 + $0x164] sm:$0xf]  ;;  %v1649_v55 = vld [vmem:[%s2031_s18 + $0x170] sm:$0xf0]  ;;  %v1648_v57 = vor.u32 %v1791_v51, %v1647_v49  ;;  %v1524_v58 = vor.u32 %v1757_v52, %v1521_v53  ;;  %v1503_v59 = vld [vmem:[%s2031_s18 + $0x40] sm:$0xf] }
  0x28   : > { %938 = vmatpush.bf16.msra.mxu3 %v1684_v38  ;;  %v1755_v60 = vld [vmem:[%s2031_s18 + $0x4c] sm:$0xf0]  ;;  %v1631_v61 = vld [vmem:[%s2031_s18 + $0x140] sm:$0xf]  ;;  %v1652_v62 = vor.u32 %v1789_v54, %v1649_v55  ;;  %v1753_v0 = vld [vmem:[%s2031_s18 + $0x44] sm:$0xf] }
  0x29   : > { %792 = vmatpush.bf16.msra.mxu0 %v1536_v44  ;;  %v1787_v63 = vld [vmem:[%s2031_s18 + $0x14c] sm:$0xf0]  ;;  %v1505_v1 = vld [vmem:[%s2031_s18 + $0x50] sm:$0xf0]  ;;  %v1785_v2 = vld [vmem:[%s2031_s18 + $0x144] sm:$0xf]  ;;  %v1504_v4 = vor.u32 %v1755_v60, %v1503_v59 }
  0x2a   : > { %841 = vmatpush.bf16.msra.mxu1 %v1664_v45  ;;  %v1633_v3 = vld [vmem:[%s2031_s18 + $0x150] sm:$0xf0]  ;;  %v1632_v5 = vor.u32 %v1787_v63, %v1631_v61  ;;  %v1508_v6 = vor.u32 %v1753_v0, %v1505_v1  ;;  %v1487_v7 = vld [vmem:[%s2031_s18 + $0x20] sm:$0xf]  ;;  %v1751_v8 = vld [vmem:[%s2031_s18 + $0x2c] sm:$0xf0] }
  0x2b   : > { %890 = vmatpush.bf16.msra.mxu2 %v1540_v46  ;;  %v1615_v9 = vld [vmem:[%s2031_s18 + $0x120] sm:$0xf]  ;;  %v1636_v10 = vor.u32 %v1785_v2, %v1633_v3  ;;  %v1783_v11 = vld [vmem:[%s2031_s18 + $0x12c] sm:$0xf0]  ;;  %v1749_v12 = vld [vmem:[%s2031_s18 + $0x24] sm:$0xf]  ;;  %v1488_v16 = vor.u32 %v1751_v8, %v1487_v7 }
  0x2c   : > { %939 = vmatpush.bf16.msra.mxu3 %v1668_v50  ;;  %v1489_v13 = vld [vmem:[%s2031_s18 + $0x30] sm:$0xf0]  ;;  %v1781_v14 = vld [vmem:[%s2031_s18 + $0x124] sm:$0xf]  ;;  %v1471_v17 = vld [vmem:[%s2031_s18] sm:$0xf]  ;;  %v1616_v19 = vor.u32 %v1783_v11, %v1615_v9 }
  0x2d   : > { %793 = vmatpush.bf16.msra.mxu0 %v1520_v56  ;;  %v1617_v15 = vld [vmem:[%s2031_s18 + $0x130] sm:$0xf0]  ;;  %v1747_v18 = vld [vmem:[%s2031_s18 + $0xc] sm:$0xf0]  ;;  %v1492_v20 = vor.u32 %v1749_v12, %v1489_v13  ;;  %v1599_v21 = vld [vmem:[%s2031_s18 + $0x100] sm:$0xf] }
  0x2e   : > { %842 = vmatpush.bf16.msra.mxu1 %v1648_v57  ;;  %v1779_v22 = vld [vmem:[%s2031_s18 + $0x10c] sm:$0xf0]  ;;  %v1745_v23 = vld [vmem:[%s2031_s18 + $0x4] sm:$0xf]  ;;  %v1620_v24 = vor.u32 %v1781_v14, %v1617_v15  ;;  %v1473_v25 = vld [vmem:[%s2031_s18 + $0x10] sm:$0xf0]  ;;  %v1472_v31 = vor.u32 %v1747_v18, %v1471_v17 }
  0x2f   : > { %891 = vmatpush.bf16.msra.mxu2 %v1524_v58  ;;  %v1777_v26 = vld [vmem:[%s2031_s18 + $0x104] sm:$0xf]  ;;  %v1601_v27 = vld [vmem:[%s2031_s18 + $0x110] sm:$0xf0]  ;;  %v1407_v28 = vld [vmem:[%s2527_s0] sm:$0xf]  ;;  %v1600_v35 = vor.u32 %v1779_v22, %v1599_v21  ;;  %v1476_v36 = vor.u32 %v1745_v23, %v1473_v25 }
  0x30   : > { %940 = vmatpush.bf16.msra.mxu3 %v1652_v62  ;;  %v1774_v29 = vld [vmem:[%s2031_s18 + $0xec] sm:$0xf]  ;;  %v1593_v30 = vld [vmem:[%s2031_s18 + $0xf8] sm:$0xf0]  ;;  %v1730_v32 = vld [vmem:[%s2527_s0 + $0x4] sm:$0xf0]  ;;  %v1604_v39 = vor.u32 %v1777_v26, %v1601_v27 }
  0x31   : > { %794 = vmatpush.bf16.msra.mxu0 %v1504_v4  ;;  %v1806_v33 = vld [vmem:[%s2031_s18 + $0x1ec] sm:$0xf]  ;;  %v1721_v34 = vld [vmem:[%s2031_s18 + $0x1f8] sm:$0xf0]  ;;  %v1729_v37 = vld [vmem:[%s2527_s0 + $0x4] sm:$0xf]  ;;  %v1596_v40 = vor.u32 %v1774_v29, %v1593_v30  ;;  %v2120_v44 = vor.u32 %v1730_v32, %v1407_v28 }
  0x32   : > { %843 = vmatpush.bf16.msra.mxu1 %v1632_v5  ;;  %v1409_v38 = vld [vmem:[%s2527_s0 + $0x8] sm:$0xf0]  ;;  %v1591_v41 = vld [vmem:[%s2031_s18 + $0xe8] sm:$0xf]  ;;  %v1776_v42 = vld [vmem:[%s2031_s18 + $0xf4] sm:$0xf0]  ;;  %v1724_v45 = vor.u32 %v1806_v33, %v1721_v34 }
  0x33   : > { %892 = vmatpush.bf16.msra.mxu2 %v1508_v6  ;;  %v1719_v43 = vld [vmem:[%s2031_s18 + $0x1e8] sm:$0xf]  ;;  %v1808_v46 = vld [vmem:[%s2031_s18 + $0x1f4] sm:$0xf0]  ;;  %v1770_v47 = vld [vmem:[%s2031_s18 + $0xcc] sm:$0xf]  ;;  %v2125_v49 = vor.u32 %v1729_v37, %v1409_v38  ;;  %v1592_v52 = vor.u32 %v1776_v42, %v1591_v41 }
  0x34   : > { %941 = vmatpush.bf16.msra.mxu3 %v1636_v10  ;;  %v1577_v48 = vld [vmem:[%s2031_s18 + $0xd8] sm:$0xf0]  ;;  %v1802_v50 = vld [vmem:[%s2031_s18 + $0x1cc] sm:$0xf]  ;;  %v1720_v53 = vor.u32 %v1808_v46, %v1719_v43  ;;  %v1575_v55 = vld [vmem:[%s2031_s18 + $0xc8] sm:$0xf] }
  0x35   : > { %795 = vmatpush.bf16.msra.mxu0 %v1488_v16  ;;  %v1705_v51 = vld [vmem:[%s2031_s18 + $0x1d8] sm:$0xf0]  ;;  %v1580_v54 = vor.u32 %v1770_v47, %v1577_v48  ;;  %v1772_v56 = vld [vmem:[%s2031_s18 + $0xd4] sm:$0xf0]  ;;  %v1703_v58 = vld [vmem:[%s2031_s18 + $0x1c8] sm:$0xf] }
  0x36   : > { %844 = vmatpush.bf16.msra.mxu1 %v1616_v19  ;;  %v1708_v57 = vor.u32 %v1802_v50, %v1705_v51  ;;  %v1804_v59 = vld [vmem:[%s2031_s18 + $0x1d4] sm:$0xf0]  ;;  %v1576_v60 = vor.u32 %v1772_v56, %v1575_v55  ;;  %v1766_v61 = vld [vmem:[%s2031_s18 + $0xac] sm:$0xf]  ;;  %v1561_v62 = vld [vmem:[%s2031_s18 + $0xb8] sm:$0xf0] }
  0x37   : > { %893 = vmatpush.bf16.msra.mxu2 %v1492_v20  ;;  %v1798_v63 = vld [vmem:[%s2031_s18 + $0x1ac] sm:$0xf]  ;;  %v1704_v0 = vor.u32 %v1804_v59, %v1703_v58  ;;  %v1564_v1 = vor.u32 %v1766_v61, %v1561_v62  ;;  %v1689_v2 = vld [vmem:[%s2031_s18 + $0x1b8] sm:$0xf0]  ;;  %v1559_v3 = vld [vmem:[%s2031_s18 + $0xa8] sm:$0xf] }
  0x38   : > { %942 = vmatpush.bf16.msra.mxu3 %v1620_v24  ;;  %v1768_v4 = vld [vmem:[%s2031_s18 + $0xb4] sm:$0xf0]  ;;  %v1692_v5 = vor.u32 %v1798_v63, %v1689_v2  ;;  %v1687_v6 = vld [vmem:[%s2031_s18 + $0x1a8] sm:$0xf]  ;;  %v1415_v10 = vld [vmem:[%s2527_s0 + $0x10] sm:$0xf] }
  0x39   : > { %796 = vmatpush.bf16.msra.mxu0 %v1472_v31  ;;  %v1800_v7 = vld [vmem:[%s2031_s18 + $0x1b4] sm:$0xf0]  ;;  %v1560_v8 = vor.u32 %v1768_v4, %v1559_v3  ;;  %v1731_v12 = vld [vmem:[%s2527_s0 + $0x14] sm:$0xf]  ;;  %v1417_v13 = vld [vmem:[%s2527_s0 + $0x18] sm:$0xf0] }
  0x3a   : > { %845 = vmatpush.bf16.msra.mxu1 %v1600_v35  ;;  %v1688_v9 = vor.u32 %v1800_v7, %v1687_v6  ;;  %v1732_v11 = vld [vmem:[%s2527_s0 + $0x14] sm:$0xf0]  ;;  %v2159_v15 = vor.u32 %v1731_v12, %v1417_v13  ;;  %v1762_v16 = vld [vmem:[%s2031_s18 + $0x8c] sm:$0xf]  ;;  %v1545_v17 = vld [vmem:[%s2031_s18 + $0x98] sm:$0xf0] }
  0x3b   : > { %894 = vmatpush.bf16.msra.mxu2 %v1476_v36  ;;  %v2157_v14 = vor.u32 %v1732_v11, %v1415_v10  ;;  %v1794_v18 = vld [vmem:[%s2031_s18 + $0x18c] sm:$0xf]  ;;  %v1548_v19 = vor.u32 %v1762_v16, %v1545_v17  ;;  %v1673_v20 = vld [vmem:[%s2031_s18 + $0x198] sm:$0xf0]  ;;  %v1543_v21 = vld [vmem:[%s2031_s18 + $0x88] sm:$0xf] }
  0x3c   : > { %943 = vmatpush.bf16.msra.mxu3 %v1604_v39  ;;  %797 = vmatmul.bf16.vlgmr.msra.gmra.mxu0 %v2120_v44  ;;  %v1764_v22 = vld [vmem:[%s2031_s18 + $0x94] sm:$0xf0]  ;;  %v1676_v23 = vor.u32 %v1794_v18, %v1673_v20  ;;  %v1671_v25 = vld [vmem:[%s2031_s18 + $0x188] sm:$0xf]  ;;  %v1423_v28 = vld [vmem:[%s2527_s0 + $0x20] sm:$0xf] }
  0x3d   : > { %846 = vmatmul.bf16.vlgmr.msra.gmra.mxu1 %v2125_v49  ;;  %985 = vmatpush.bf16.msrb.mxu0 %v1592_v52  ;;  %v1544_v24 = vor.u32 %v1764_v22, %v1543_v21  ;;  %v1796_v26 = vld [vmem:[%s2031_s18 + $0x194] sm:$0xf0]  ;;  %v1734_v29 = vld [vmem:[%s2527_s0 + $0x24] sm:$0xf0]  ;;  %v1733_v30 = vld [vmem:[%s2527_s0 + $0x24] sm:$0xf] }
  0x3e   : > { %895 = vmatmul.bf16.vlgmr.msra.gmra.mxu2 %v2120_v44  ;;  %1034 = vmatpush.bf16.msrb.mxu1 %v1720_v53  ;;  %v1672_v27 = vor.u32 %v1796_v26, %v1671_v25  ;;  %v1425_v31 = vld [vmem:[%s2527_s0 + $0x28] sm:$0xf0]  ;;  %v2185_v32 = vor.u32 %v1734_v29, %v1423_v28  ;;  %v1529_v35 = vld [vmem:[%s2031_s18 + $0x78] sm:$0xf0]  ;;  %v1527_v39 = vld [vmem:[%s2031_s18 + $0x68] sm:$0xf] }
  0x3f   : > { %1083 = vmatpush.bf16.msrb.mxu2 %v1596_v40  ;;  %944 = vmatmul.bf16.vlgmr.msra.gmra.mxu3 %v2125_v49  ;;  %v2187_v33 = vor.u32 %v1733_v30, %v1425_v31  ;;  %v1758_v34 = vld [vmem:[%s2031_s18 + $0x6c] sm:$0xf]  ;;  %v1657_v38 = vld [vmem:[%s2031_s18 + $0x178] sm:$0xf0]  ;;  %v1760_v40 = vld [vmem:[%s2031_s18 + $0x74] sm:$0xf0] }
  0x40   : > { %1132 = vmatpush.bf16.msrb.mxu3 %v1724_v45  ;;  %v1790_v36 = vld [vmem:[%s2031_s18 + $0x16c] sm:$0xf]  ;;  %v1532_v37 = vor.u32 %v1758_v34, %v1529_v35  ;;  %v1528_v42 = vor.u32 %v1760_v40, %v1527_v39  ;;  %v1655_v43 = vld [vmem:[%s2031_s18 + $0x168] sm:$0xf]  ;;  %v1792_v45 = vld [vmem:[%s2031_s18 + $0x174] sm:$0xf0] }
  0x41   : > { %986 = vmatpush.bf16.msrb.mxu0 %v1576_v60  ;;  %v1660_v41 = vor.u32 %v1790_v36, %v1657_v38  ;;  %v1656_v46 = vor.u32 %v1792_v45, %v1655_v43  ;;  %v1431_v47 = vld [vmem:[%s2527_s0 + $0x30] sm:$0xf]  ;;  %v1736_v48 = vld [vmem:[%s2527_s0 + $0x34] sm:$0xf0]  ;;  %v1735_v50 = vld [vmem:[%s2527_s0 + $0x34] sm:$0xf] }
  0x42   : > { %1035 = vmatpush.bf16.msrb.mxu1 %v1704_v0  ;;  %v1433_v51 = vld [vmem:[%s2527_s0 + $0x38] sm:$0xf0]  ;;  %v2213_v52 = vor.u32 %v1736_v48, %v1431_v47  ;;  %v1786_v56 = vld [vmem:[%s2031_s18 + $0x14c] sm:$0xf]  ;;  %v1511_v59 = vld [vmem:[%s2031_s18 + $0x48] sm:$0xf] }
  0x43   : > { %1084 = vmatpush.bf16.msrb.mxu2 %v1580_v54  ;;  %v2215_v53 = vor.u32 %v1735_v50, %v1433_v51  ;;  %v1754_v54 = vld [vmem:[%s2031_s18 + $0x4c] sm:$0xf]  ;;  %v1513_v55 = vld [vmem:[%s2031_s18 + $0x58] sm:$0xf0]  ;;  %v1756_v60 = vld [vmem:[%s2031_s18 + $0x54] sm:$0xf0] }
  0x44   : > { %1133 = vmatpush.bf16.msrb.mxu3 %v1708_v57  ;;  %v1516_v57 = vor.u32 %v1754_v54, %v1513_v55  ;;  %v1641_v58 = vld [vmem:[%s2031_s18 + $0x158] sm:$0xf0]  ;;  %v1512_v62 = vor.u32 %v1756_v60, %v1511_v59  ;;  %v1639_v63 = vld [vmem:[%s2031_s18 + $0x148] sm:$0xf]  ;;  %v1788_v0 = vld [vmem:[%s2031_s18 + $0x154] sm:$0xf0] }
  0x45   : > { %987 = vmatpush.bf16.msrb.mxu0 %v1560_v8  ;;  %v1644_v61 = vor.u32 %v1786_v56, %v1641_v58  ;;  %v1439_v2 = vld [vmem:[%s2527_s0 + $0x40] sm:$0xf]  ;;  %v1738_v3 = vld [vmem:[%s2527_s0 + $0x44] sm:$0xf0]  ;;  %v1737_v4 = vld [vmem:[%s2527_s0 + $0x44] sm:$0xf] }
  0x46   : > { %1036 = vmatpush.bf16.msrb.mxu1 %v1688_v9  ;;  %v2241_v6 = vor.u32 %v1738_v3, %v1439_v2  ;;  %v1750_v8 = vld [vmem:[%s2031_s18 + $0x2c] sm:$0xf]  ;;  %v1497_v9 = vld [vmem:[%s2031_s18 + $0x38] sm:$0xf0]  ;;  %v1495_v13 = vld [vmem:[%s2031_s18 + $0x28] sm:$0xf] }
  0x47   : > { %1085 = vmatpush.bf16.msrb.mxu2 %v1564_v1  ;;  %v1640_v1 = vor.u32 %v1788_v0, %v1639_v63  ;;  %v1782_v10 = vld [vmem:[%s2031_s18 + $0x12c] sm:$0xf]  ;;  %v1500_v11 = vor.u32 %v1750_v8, %v1497_v9  ;;  %v1625_v12 = vld [vmem:[%s2031_s18 + $0x138] sm:$0xf0]  ;;  %v1752_v16 = vld [vmem:[%s2031_s18 + $0x34] sm:$0xf0] }
  0x48   : > { %1134 = vmatpush.bf16.msrb.mxu3 %v1692_v5  ;;  %v1441_v5 = vld [vmem:[%s2527_s0 + $0x48] sm:$0xf0]  ;;  %v1628_v17 = vor.u32 %v1782_v10, %v1625_v12  ;;  %v1496_v18 = vor.u32 %v1752_v16, %v1495_v13  ;;  %v1784_v20 = vld [vmem:[%s2031_s18 + $0x134] sm:$0xf0]  ;;  %v1447_v22 = vld [vmem:[%s2527_s0 + $0x50] sm:$0xf] }
  0x49   : > { %988 = vmatpush.bf16.msrb.mxu0 %v1544_v24  ;;  %v2243_v7 = vor.u32 %v1737_v4, %v1441_v5  ;;  %v1739_v24 = vld [vmem:[%s2527_s0 + $0x54] sm:$0xf]  ;;  %v1449_v25 = vld [vmem:[%s2527_s0 + $0x58] sm:$0xf0]  ;;  %v1746_v28 = vld [vmem:[%s2031_s18 + $0xc] sm:$0xf] }
  0x4a   : > { %1037 = vmatpush.bf16.msrb.mxu1 %v1672_v27  ;;  %v2271_v27 = vor.u32 %v1739_v24, %v1449_v25  ;;  %v1481_v29 = vld [vmem:[%s2031_s18 + $0x18] sm:$0xf0]  ;;  %v1778_v30 = vld [vmem:[%s2031_s18 + $0x10c] sm:$0xf]  ;;  %v1479_v35 = vld [vmem:[%s2031_s18 + $0x8] sm:$0xf] }
  0x4b   : > { %1086 = vmatpush.bf16.msrb.mxu2 %v1548_v19  ;;  %v1623_v19 = vld [vmem:[%s2031_s18 + $0x128] sm:$0xf]  ;;  %v1484_v31 = vor.u32 %v1746_v28, %v1481_v29  ;;  %v1609_v34 = vld [vmem:[%s2031_s18 + $0x118] sm:$0xf0]  ;;  %v1748_v36 = vld [vmem:[%s2031_s18 + $0x14] sm:$0xf0] }
  0x4c   : > { %802 = vmatmul.bf16.gmra.mxu0 %v2157_v14  ;;  %1135 = vmatpush.bf16.msrb.mxu3 %v1676_v23  ;;  %v1624_v21 = vor.u32 %v1784_v20, %v1623_v19  ;;  %v1740_v23 = vld [vmem:[%s2527_s0 + $0x54] sm:$0xf0]  ;;  %v1480_v38 = vor.u32 %v1748_v36, %v1479_v35  ;;  %v1607_v39 = vld [vmem:[%s2031_s18 + $0x108] sm:$0xf]  ;;  %v1741_v45 = vld [vmem:[%s2527_s0 + $0x64] sm:$0xf] }
  0x4d   : > { %851 = vmatmul.bf16.gmra.mxu1 %v2159_v15  ;;  %989 = vmatpush.bf16.msrb.mxu0 %v1528_v42  ;;  %v2269_v26 = vor.u32 %v1740_v23, %v1447_v22  ;;  %v1780_v40 = vld [vmem:[%s2031_s18 + $0x114] sm:$0xf0]  ;;  %v1455_v42 = vld [vmem:[%s2527_s0 + $0x60] sm:$0xf]  ;;  %v1742_v43 = vld [vmem:[%s2527_s0 + $0x64] sm:$0xf0] }
  0x4e   : > { %900 = vmatmul.bf16.gmra.mxu2 %v2157_v14  ;;  %1038 = vmatpush.bf16.msrb.mxu1 %v1656_v46  ;;  %v1457_v46 = vld [vmem:[%s2527_s0 + $0x68] sm:$0xf0]  ;;  %v2297_v47 = vor.u32 %v1742_v43, %v1455_v42  ;;  %v1463_v50 = vld [vmem:[%s2527_s0 + $0x70] sm:$0xf]  ;;  %v1744_v51 = vld [vmem:[%s2527_s0 + $0x74] sm:$0xf0] }
  0x4f   : > { %949 = vmatmul.bf16.gmra.mxu3 %v2159_v15  ;;  %1087 = vmatpush.bf16.msrb.mxu2 %v1532_v37  ;;  %v1612_v37 = vor.u32 %v1778_v30, %v1609_v34  ;;  %v2299_v48 = vor.u32 %v1741_v45, %v1457_v46  ;;  %v1743_v54 = vld [vmem:[%s2527_s0 + $0x74] sm:$0xf]  ;;  %v1465_v55 = vld [vmem:[%s2527_s0 + $0x78] sm:$0xf0]  ;;  %v2318_v56 = vor.u32 %v1744_v51, %v1463_v50  ;;  %s2541_s15 = smov (!%p275_p13, %s1938_s15), 1 }
  0x50   : > { %1136 = vmatpush.bf16.msrb.mxu3 %v1660_v41  ;;  %v1608_v41 = vor.u32 %v1780_v40, %v1607_v39  ;;  %s1402_s27 = sshll.u32 %s2541_s15, 2  ;;  %s1728_s4 = sshll.u32 %s2541_s15, 9 }
  0x51   : > { %990 = vmatpush.bf16.msrb.mxu0 %v1512_v62  ;;  %s281_s30 = scalar_lea.vmem %s2529_s2, %s1402_s27  ;;  %s2339_s7 = scalar_lea.vmem %s2530_s3, %s1728_s4 }
  0x52   : > { %1039 = vmatpush.bf16.msrb.mxu1 %v1640_v1  ;;  %v2330_v58 = vld [vmem:[%s281_s30] sm:$0xf] }
  0x53   : > { %1088 = vmatpush.bf16.msrb.mxu2 %v1516_v57  ;;  %v2320_v57 = vor.u32 %v1743_v54, %v1465_v55  ;;  %v2333_v59 = vperm.slane %v2330_v58, 0  ;;  %v2345_v0 = vperm.slane %v2330_v58, 1 }
  0x54   : > { %1137 = vmatpush.bf16.msrb.mxu3 %v1644_v61 }
  0x55   : > { %991 = vmatpush.bf16.msrb.mxu0 %v1496_v18 }
  0x56   : > { %1040 = vmatpush.bf16.msrb.mxu1 %v1624_v21 }
  0x57   : > { %1089 = vmatpush.bf16.msrb.mxu2 %v1500_v11 }
  0x58   : > { %1138 = vmatpush.bf16.msrb.mxu3 %v1628_v17 }
  0x59   : > { %992 = vmatpush.bf16.msrb.mxu0 %v1480_v38 }
  0x5a   : > { %1041 = vmatpush.bf16.msrb.mxu1 %v1608_v41 }
  0x5b   : > { %1090 = vmatpush.bf16.msrb.mxu2 %v1484_v31 }
  0x5c   : > { %807 = vmatmul.bf16.gmra.mxu0 %v2185_v32  ;;  %1139 = vmatpush.bf16.msrb.mxu3 %v1612_v37 }
  0x5d   : > { %856 = vmatmul.bf16.gmra.mxu1 %v2187_v33 }
  0x5e   : > { %905 = vmatmul.bf16.gmra.mxu2 %v2185_v32 }
  0x5f   : > { %954 = vmatmul.bf16.gmra.mxu3 %v2187_v33 }
  0x6c   : > { %812 = vmatmul.bf16.gmra.mxu0 %v2213_v52 }
  0x6d   : > { %861 = vmatmul.bf16.gmra.mxu1 %v2215_v53 }
  0x6e   : > { %910 = vmatmul.bf16.gmra.mxu2 %v2213_v52 }
  0x6f   : > { %959 = vmatmul.bf16.gmra.mxu3 %v2215_v53 }
  0x7c   : > { %817 = vmatmul.bf16.gmra.mxu0 %v2241_v6 }
  0x7d   : > { %866 = vmatmul.bf16.gmra.mxu1 %v2243_v7 }
  0x7e   : > { %915 = vmatmul.bf16.gmra.mxu2 %v2241_v6 }
  0x7f   : > { %964 = vmatmul.bf16.gmra.mxu3 %v2243_v7 }
  0x8c   : > { %822 = vmatmul.bf16.gmra.mxu0 %v2269_v26 }
  0x8d   : > { %871 = vmatmul.bf16.gmra.mxu1 %v2271_v27 }
  0x8e   : > { %920 = vmatmul.bf16.gmra.mxu2 %v2269_v26 }
  0x8f   : > { %969 = vmatmul.bf16.gmra.mxu3 %v2271_v27 }
  0x9c   : > { %827 = vmatmul.bf16.gmra.mxu0 %v2297_v47 }
  0x9d   : > { %876 = vmatmul.bf16.gmra.mxu1 %v2299_v48 }
  0x9e   : > { %925 = vmatmul.bf16.gmra.mxu2 %v2297_v47 }
  0x9f   : > { %974 = vmatmul.bf16.gmra.mxu3 %v2299_v48 }
  0xac   : > { %832 = vmatmul.bf16.gmra.mxu0 %v2318_v56 }
  0xad   : > { %881 = vmatmul.bf16.gmra.mxu1 %v2320_v57 }
  0xae   : > { %930 = vmatmul.bf16.gmra.mxu2 %v2318_v56 }
  0xaf   : > { %979 = vmatmul.bf16.gmra.mxu3 %v2320_v57 }
  0xb9   : > { %v798_v60 = vpop.f32.mrf.mxu0 }
  0xba   : > { %v799_v61 = vadd.f32 %v798_v60, %v2333_v59  ;;  %v847_v62 = vpop.f32.mrf.mxu1 }
  0xbc   : > { %v848_v63 = vadd.f32 %v847_v62, %v799_v61  ;;  %993 = vmatmul.bf16.vlgmr.msrb.gmra.mxu0 %v2120_v44 }
  0xbd   : > { %1042 = vmatmul.bf16.vlgmr.msrb.gmra.mxu1 %v2125_v49 }
  0xbe   : > { %1091 = vmatmul.bf16.vlgmr.msrb.gmra.mxu2 %v2120_v44  ;;  %1181 = vst [vmem:[%s2339_s7] sm:$0xff] %v848_v63 }
  0xbf   : > { %1140 = vmatmul.bf16.vlgmr.msrb.gmra.mxu3 %v2125_v49 }
  0xc1   : > { %v896_v1 = vpop.f32.mrf.mxu2  ;;  %v800_v4 = vpop.f32.mrf.mxu0 }
  0xc2   : > { %v897_v2 = vadd.f32 %v896_v1, %v2345_v0  ;;  %v945_v3 = vpop.f32.mrf.mxu3  ;;  %v801_v5 = vadd.f32 %v800_v4, %v2333_v59  ;;  %v849_v8 = vpop.f32.mrf.mxu1 }
  0xc4   : > { %v946_v9 = vadd.f32 %v945_v3, %v897_v2  ;;  %v850_v10 = vadd.f32 %v849_v8, %v801_v5 }
  0xc6   : > { %1182 = vst [vmem:[%s2339_s7 + $0x8] sm:$0xff] %v946_v9 }
  0xc7   : > { %1185 = vst [vmem:[%s2339_s7 + $0x20] sm:$0xff] %v850_v10 }
  0xc9   : > { %v898_v44 = vpop.f32.mrf.mxu2  ;;  %v803_v13 = vpop.f32.mrf.mxu0 }
  0xca   : > { %v899_v11 = vadd.f32 %v898_v44, %v2345_v0  ;;  %v947_v12 = vpop.f32.mrf.mxu3  ;;  %v804_v49 = vadd.f32 %v803_v13, %v2333_v59  ;;  %v852_v16 = vpop.f32.mrf.mxu1 }
  0xcc   : > { %v948_v17 = vadd.f32 %v947_v12, %v899_v11  ;;  %v853_v18 = vadd.f32 %v852_v16, %v804_v49  ;;  %998 = vmatmul.bf16.gmra.mxu0 %v2157_v14 }
  0xcd   : > { %1047 = vmatmul.bf16.gmra.mxu1 %v2159_v15 }
  0xce   : > { %1186 = vst [vmem:[%s2339_s7 + $0x28] sm:$0xff] %v948_v17  ;;  %1096 = vmatmul.bf16.gmra.mxu2 %v2157_v14 }
  0xcf   : > { %1189 = vst [vmem:[%s2339_s7 + $0x40] sm:$0xff] %v853_v18  ;;  %1145 = vmatmul.bf16.gmra.mxu3 %v2159_v15 }
  0xd1   : > { %v901_v19 = vpop.f32.mrf.mxu2  ;;  %v805_v22 = vpop.f32.mrf.mxu0 }
  0xd2   : > { %v902_v20 = vadd.f32 %v901_v19, %v2345_v0  ;;  %v950_v21 = vpop.f32.mrf.mxu3  ;;  %v806_v23 = vadd.f32 %v805_v22, %v2333_v59  ;;  %v854_v24 = vpop.f32.mrf.mxu1 }
  0xd4   : > { %v951_v25 = vadd.f32 %v950_v21, %v902_v20  ;;  %v855_v28 = vadd.f32 %v854_v24, %v806_v23 }
  0xd6   : > { %1190 = vst [vmem:[%s2339_s7 + $0x48] sm:$0xff] %v951_v25 }
  0xd7   : > { %1193 = vst [vmem:[%s2339_s7 + $0x60] sm:$0xff] %v855_v28 }
  0xd9   : > { %v903_v29 = vpop.f32.mrf.mxu2  ;;  %v808_v31 = vpop.f32.mrf.mxu0 }
  0xda   : > { %v904_v14 = vadd.f32 %v903_v29, %v2345_v0  ;;  %v952_v30 = vpop.f32.mrf.mxu3  ;;  %v809_v15 = vadd.f32 %v808_v31, %v2333_v59  ;;  %v857_v34 = vpop.f32.mrf.mxu1 }
  0xdc   : > { %v953_v35 = vadd.f32 %v952_v30, %v904_v14  ;;  %v858_v36 = vadd.f32 %v857_v34, %v809_v15  ;;  %1003 = vmatmul.bf16.gmra.mxu0 %v2185_v32 }
  0xdd   : > { %1052 = vmatmul.bf16.gmra.mxu1 %v2187_v33 }
  0xde   : > { %1194 = vst [vmem:[%s2339_s7 + $0x68] sm:$0xff] %v953_v35  ;;  %1101 = vmatmul.bf16.gmra.mxu2 %v2185_v32 }
  0xdf   : > { %1197 = vst [vmem:[%s2339_s7 + $0x80] sm:$0xff] %v858_v36  ;;  %1150 = vmatmul.bf16.gmra.mxu3 %v2187_v33 }
  0xe1   : > { %v906_v37 = vpop.f32.mrf.mxu2  ;;  %v810_v40 = vpop.f32.mrf.mxu0 }
  0xe2   : > { %v907_v38 = vadd.f32 %v906_v37, %v2345_v0  ;;  %v955_v39 = vpop.f32.mrf.mxu3  ;;  %v811_v41 = vadd.f32 %v810_v40, %v2333_v59  ;;  %v859_v42 = vpop.f32.mrf.mxu1 }
  0xe4   : > { %v956_v43 = vadd.f32 %v955_v39, %v907_v38  ;;  %v860_v45 = vadd.f32 %v859_v42, %v811_v41 }
  0xe6   : > { %1198 = vst [vmem:[%s2339_s7 + $0x88] sm:$0xff] %v956_v43 }
  0xe7   : > { %1201 = vst [vmem:[%s2339_s7 + $0xa0] sm:$0xff] %v860_v45 }
  0xe9   : > { %v908_v46 = vpop.f32.mrf.mxu2  ;;  %v813_v51 = vpop.f32.mrf.mxu0 }
  0xea   : > { %v909_v32 = vadd.f32 %v908_v46, %v2345_v0  ;;  %v957_v50 = vpop.f32.mrf.mxu3  ;;  %v814_v33 = vadd.f32 %v813_v51, %v2333_v59  ;;  %v862_v54 = vpop.f32.mrf.mxu1 }
  0xec   : > { %v958_v55 = vadd.f32 %v957_v50, %v909_v32  ;;  %v863_v60 = vadd.f32 %v862_v54, %v814_v33  ;;  %1008 = vmatmul.bf16.gmra.mxu0 %v2213_v52 }
  0xed   : > { %1057 = vmatmul.bf16.gmra.mxu1 %v2215_v53 }
  0xee   : > { %1202 = vst [vmem:[%s2339_s7 + $0xa8] sm:$0xff] %v958_v55  ;;  %1106 = vmatmul.bf16.gmra.mxu2 %v2213_v52 }
  0xef   : > { %1205 = vst [vmem:[%s2339_s7 + $0xc0] sm:$0xff] %v863_v60  ;;  %1155 = vmatmul.bf16.gmra.mxu3 %v2215_v53 }
  0xf1   : > { %v911_v61 = vpop.f32.mrf.mxu2  ;;  %v815_v1 = vpop.f32.mrf.mxu0 }
  0xf2   : > { %v912_v62 = vadd.f32 %v911_v61, %v2345_v0  ;;  %v960_v63 = vpop.f32.mrf.mxu3  ;;  %v816_v2 = vadd.f32 %v815_v1, %v2333_v59  ;;  %v864_v3 = vpop.f32.mrf.mxu1 }
  0xf4   : > { %v961_v4 = vadd.f32 %v960_v63, %v912_v62  ;;  %v865_v5 = vadd.f32 %v864_v3, %v816_v2 }
  0xf6   : > { %1206 = vst [vmem:[%s2339_s7 + $0xc8] sm:$0xff] %v961_v4 }
  0xf7   : > { %1209 = vst [vmem:[%s2339_s7 + $0xe0] sm:$0xff] %v865_v5 }
  0xf9   : > { %v913_v8 = vpop.f32.mrf.mxu2  ;;  %v818_v10 = vpop.f32.mrf.mxu0 }
  0xfa   : > { %v914_v52 = vadd.f32 %v913_v8, %v2345_v0  ;;  %v962_v9 = vpop.f32.mrf.mxu3  ;;  %v819_v53 = vadd.f32 %v818_v10, %v2333_v59  ;;  %v867_v44 = vpop.f32.mrf.mxu1 }
  0xfc   : > { %v963_v11 = vadd.f32 %v962_v9, %v914_v52  ;;  %v868_v12 = vadd.f32 %v867_v44, %v819_v53  ;;  %1013 = vmatmul.bf16.gmra.mxu0 %v2241_v6  ;;  %v2438_v44 = vperm.slane %v2330_v58, 2 }
  0xfd   : > { %1062 = vmatmul.bf16.gmra.mxu1 %v2243_v7 }
  0xfe   : > { %1210 = vst [vmem:[%s2339_s7 + $0xe8] sm:$0xff] %v963_v11  ;;  %1111 = vmatmul.bf16.gmra.mxu2 %v2241_v6 }
  0xff   : > { %1213 = vst [vmem:[%s2339_s7 + $0x100] sm:$0xff] %v868_v12  ;;  %1160 = vmatmul.bf16.gmra.mxu3 %v2243_v7 }
 0x101   : > { %v916_v13 = vpop.f32.mrf.mxu2  ;;  %v820_v17 = vpop.f32.mrf.mxu0 }
 0x102   : > { %v917_v49 = vadd.f32 %v916_v13, %v2345_v0  ;;  %v965_v16 = vpop.f32.mrf.mxu3  ;;  %v821_v18 = vadd.f32 %v820_v17, %v2333_v59  ;;  %v869_v19 = vpop.f32.mrf.mxu1  ;;  %v2444_v17 = vperm.slane %v2330_v58, 3 }
 0x104   : > { %v966_v20 = vadd.f32 %v965_v16, %v917_v49  ;;  %v870_v21 = vadd.f32 %v869_v19, %v821_v18 }
 0x106   : > { %1214 = vst [vmem:[%s2339_s7 + $0x108] sm:$0xff] %v966_v20 }
 0x107   : > { %1217 = vst [vmem:[%s2339_s7 + $0x120] sm:$0xff] %v870_v21 }
 0x109   : > { %v918_v22 = vpop.f32.mrf.mxu2  ;;  %v823_v24 = vpop.f32.mrf.mxu0 }
 0x10a   : > { %v919_v6 = vadd.f32 %v918_v22, %v2345_v0  ;;  %v967_v23 = vpop.f32.mrf.mxu3  ;;  %v824_v7 = vadd.f32 %v823_v24, %v2333_v59  ;;  %v872_v25 = vpop.f32.mrf.mxu1 }
 0x10c   : > { %v968_v28 = vadd.f32 %v967_v23, %v919_v6  ;;  %v873_v29 = vadd.f32 %v872_v25, %v824_v7  ;;  %1018 = vmatmul.bf16.gmra.mxu0 %v2269_v26 }
 0x10d   : > { %1067 = vmatmul.bf16.gmra.mxu1 %v2271_v27 }
 0x10e   : > { %1218 = vst [vmem:[%s2339_s7 + $0x128] sm:$0xff] %v968_v28  ;;  %1116 = vmatmul.bf16.gmra.mxu2 %v2269_v26 }
 0x10f   : > { %1221 = vst [vmem:[%s2339_s7 + $0x140] sm:$0xff] %v873_v29  ;;  %1165 = vmatmul.bf16.gmra.mxu3 %v2271_v27 }
 0x111   : > { %v921_v14 = vpop.f32.mrf.mxu2  ;;  %v825_v15 = vpop.f32.mrf.mxu0 }
 0x112   : > { %v922_v30 = vadd.f32 %v921_v14, %v2345_v0  ;;  %v970_v31 = vpop.f32.mrf.mxu3  ;;  %v826_v34 = vadd.f32 %v825_v15, %v2333_v59  ;;  %v874_v35 = vpop.f32.mrf.mxu1 }
 0x114   : > { %v971_v36 = vadd.f32 %v970_v31, %v922_v30  ;;  %v875_v37 = vadd.f32 %v874_v35, %v826_v34 }
 0x116   : > { %1222 = vst [vmem:[%s2339_s7 + $0x148] sm:$0xff] %v971_v36 }
 0x117   : > { %1225 = vst [vmem:[%s2339_s7 + $0x160] sm:$0xff] %v875_v37 }
 0x119   : > { %v923_v38 = vpop.f32.mrf.mxu2  ;;  %v828_v40 = vpop.f32.mrf.mxu0 }
 0x11a   : > { %v924_v26 = vadd.f32 %v923_v38, %v2345_v0  ;;  %v972_v39 = vpop.f32.mrf.mxu3  ;;  %v829_v27 = vadd.f32 %v828_v40, %v2333_v59  ;;  %v877_v41 = vpop.f32.mrf.mxu1 }
 0x11c   : > { %v973_v42 = vadd.f32 %v972_v39, %v924_v26  ;;  %v878_v43 = vadd.f32 %v877_v41, %v829_v27  ;;  %1023 = vmatmul.bf16.gmra.mxu0 %v2297_v47 }
 0x11d   : > { %1072 = vmatmul.bf16.gmra.mxu1 %v2299_v48 }
 0x11e   : > { %1226 = vst [vmem:[%s2339_s7 + $0x168] sm:$0xff] %v973_v42  ;;  %1121 = vmatmul.bf16.gmra.mxu2 %v2297_v47 }
 0x11f   : > { %1229 = vst [vmem:[%s2339_s7 + $0x180] sm:$0xff] %v878_v43  ;;  %1170 = vmatmul.bf16.gmra.mxu3 %v2299_v48 }
 0x121   : > { %v926_v45 = vpop.f32.mrf.mxu2  ;;  %v830_v50 = vpop.f32.mrf.mxu0 }
 0x122   : > { %v927_v46 = vadd.f32 %v926_v45, %v2345_v0  ;;  %v975_v32 = vpop.f32.mrf.mxu3  ;;  %v831_v51 = vadd.f32 %v830_v50, %v2333_v59  ;;  %v879_v33 = vpop.f32.mrf.mxu1 }
 0x124   : > { %v976_v54 = vadd.f32 %v975_v32, %v927_v46  ;;  %v880_v55 = vadd.f32 %v879_v33, %v831_v51 }
 0x126   : > { %1230 = vst [vmem:[%s2339_s7 + $0x188] sm:$0xff] %v976_v54 }
 0x127   : > { %1233 = vst [vmem:[%s2339_s7 + $0x1a0] sm:$0xff] %v880_v55 }
 0x129   : > { %v928_v60 = vpop.f32.mrf.mxu2  ;;  %v833_v62 = vpop.f32.mrf.mxu0 }
 0x12a   : > { %v929_v47 = vadd.f32 %v928_v60, %v2345_v0  ;;  %v977_v61 = vpop.f32.mrf.mxu3  ;;  %v834_v48 = vadd.f32 %v833_v62, %v2333_v59  ;;  %v882_v63 = vpop.f32.mrf.mxu1 }
 0x12c   : > { %v978_v1 = vadd.f32 %v977_v61, %v929_v47  ;;  %v883_v2 = vadd.f32 %v882_v63, %v834_v48  ;;  %1028 = vmatmul.bf16.gmra.mxu0 %v2318_v56 }
 0x12d   : > { %1077 = vmatmul.bf16.gmra.mxu1 %v2320_v57 }
 0x12e   : > { %1234 = vst [vmem:[%s2339_s7 + $0x1a8] sm:$0xff] %v978_v1  ;;  %1126 = vmatmul.bf16.gmra.mxu2 %v2318_v56 }
 0x12f   : > { %1237 = vst [vmem:[%s2339_s7 + $0x1c0] sm:$0xff] %v883_v2  ;;  %1175 = vmatmul.bf16.gmra.mxu3 %v2320_v57 }
 0x131   : > { %v931_v3 = vpop.f32.mrf.mxu2  ;;  %v835_v8 = vpop.f32.mrf.mxu0 }
 0x132   : > { %v932_v4 = vadd.f32 %v931_v3, %v2345_v0  ;;  %v980_v5 = vpop.f32.mrf.mxu3  ;;  %v836_v52 = vadd.f32 %v835_v8, %v2333_v59  ;;  %v884_v9 = vpop.f32.mrf.mxu1 }
 0x134   : > { %v981_v10 = vadd.f32 %v980_v5, %v932_v4  ;;  %v885_v53 = vadd.f32 %v884_v9, %v836_v52 }
 0x136   : > { %1238 = vst [vmem:[%s2339_s7 + $0x1c8] sm:$0xff] %v981_v10 }
 0x137   : > { %1241 = vst [vmem:[%s2339_s7 + $0x1e0] sm:$0xff] %v885_v53 }
 0x139   : > { %v933_v56 = vpop.f32.mrf.mxu2  ;;  %v994_v12 = vpop.f32.mrf.mxu0 }
 0x13a   : > { %v934_v57 = vadd.f32 %v933_v56, %v2345_v0  ;;  %v982_v11 = vpop.f32.mrf.mxu3  ;;  %v995_v13 = vadd.f32 %v994_v12, %v2438_v44  ;;  %v1043_v49 = vpop.f32.mrf.mxu1 }
 0x13c   : > { %v983_v59 = vadd.f32 %v982_v11, %v934_v57  ;;  %v1044_v16 = vadd.f32 %v1043_v49, %v995_v13 }
 0x13e   : > { %1242 = vst [vmem:[%s2339_s7 + $0x1e8] sm:$0xff] %v983_v59 }
 0x13f   : > { %1183 = vst [vmem:[%s2339_s7 + $0x10] sm:$0xff] %v1044_v16 }
 0x141   : > { %v1092_v18 = vpop.f32.mrf.mxu2  ;;  %v996_v0 = vpop.f32.mrf.mxu0 }
 0x142   : > { %v1093_v19 = vadd.f32 %v1092_v18, %v2444_v17  ;;  %v1141_v20 = vpop.f32.mrf.mxu3  ;;  %v997_v21 = vadd.f32 %v996_v0, %v2438_v44  ;;  %v1045_v22 = vpop.f32.mrf.mxu1 }
 0x144   : > { %v1142_v6 = vadd.f32 %v1141_v20, %v1093_v19  ;;  %v1046_v23 = vadd.f32 %v1045_v22, %v997_v21 }
 0x146   : > { %1184 = vst [vmem:[%s2339_s7 + $0x18] sm:$0xff] %v1142_v6 }
 0x147   : > { %1187 = vst [vmem:[%s2339_s7 + $0x30] sm:$0xff] %v1046_v23 }
 0x149   : > { %v1094_v24 = vpop.f32.mrf.mxu2  ;;  %v999_v25 = vpop.f32.mrf.mxu0 }
 0x14a   : > { %v1095_v7 = vadd.f32 %v1094_v24, %v2444_v17  ;;  %v1143_v58 = vpop.f32.mrf.mxu3  ;;  %v1000_v28 = vadd.f32 %v999_v25, %v2438_v44  ;;  %v1048_v29 = vpop.f32.mrf.mxu1 }
 0x14c   : > { %v1144_v14 = vadd.f32 %v1143_v58, %v1095_v7  ;;  %v1049_v30 = vadd.f32 %v1048_v29, %v1000_v28 }
 0x14e   : > { %1188 = vst [vmem:[%s2339_s7 + $0x38] sm:$0xff] %v1144_v14 }
 0x14f   : > { %1191 = vst [vmem:[%s2339_s7 + $0x50] sm:$0xff] %v1049_v30 }
 0x151   : > { %v1097_v31 = vpop.f32.mrf.mxu2  ;;  %v1001_v35 = vpop.f32.mrf.mxu0 }
 0x152   : > { %v1098_v15 = vadd.f32 %v1097_v31, %v2444_v17  ;;  %v1146_v34 = vpop.f32.mrf.mxu3  ;;  %v1002_v36 = vadd.f32 %v1001_v35, %v2438_v44  ;;  %v1050_v37 = vpop.f32.mrf.mxu1 }
 0x154   : > { %v1147_v38 = vadd.f32 %v1146_v34, %v1098_v15  ;;  %v1051_v26 = vadd.f32 %v1050_v37, %v1002_v36 }
 0x156   : > { %1192 = vst [vmem:[%s2339_s7 + $0x58] sm:$0xff] %v1147_v38 }
 0x157   : > { %1195 = vst [vmem:[%s2339_s7 + $0x70] sm:$0xff] %v1051_v26 }
 0x159   : > { %v1099_v39 = vpop.f32.mrf.mxu2  ;;  %v1004_v41 = vpop.f32.mrf.mxu0 }
 0x15a   : > { %v1100_v40 = vadd.f32 %v1099_v39, %v2444_v17  ;;  %v1148_v27 = vpop.f32.mrf.mxu3  ;;  %v1005_v42 = vadd.f32 %v1004_v41, %v2438_v44  ;;  %v1053_v43 = vpop.f32.mrf.mxu1 }
 0x15c   : > { %v1149_v45 = vadd.f32 %v1148_v27, %v1100_v40  ;;  %v1054_v46 = vadd.f32 %v1053_v43, %v1005_v42 }
 0x15e   : > { %1196 = vst [vmem:[%s2339_s7 + $0x78] sm:$0xff] %v1149_v45 }
 0x15f   : > { %1199 = vst [vmem:[%s2339_s7 + $0x90] sm:$0xff] %v1054_v46 }
 0x161   : > { %v1102_v32 = vpop.f32.mrf.mxu2  ;;  %v1006_v33 = vpop.f32.mrf.mxu0 }
 0x162   : > { %v1103_v50 = vadd.f32 %v1102_v32, %v2444_v17  ;;  %v1151_v51 = vpop.f32.mrf.mxu3  ;;  %v1007_v54 = vadd.f32 %v1006_v33, %v2438_v44  ;;  %v1055_v55 = vpop.f32.mrf.mxu1 }
 0x164   : > { %v1152_v60 = vadd.f32 %v1151_v51, %v1103_v50  ;;  %v1056_v47 = vadd.f32 %v1055_v55, %v1007_v54 }
 0x166   : > { %1200 = vst [vmem:[%s2339_s7 + $0x98] sm:$0xff] %v1152_v60 }
 0x167   : > { %1203 = vst [vmem:[%s2339_s7 + $0xb0] sm:$0xff] %v1056_v47 }
 0x169   : > { %v1104_v61 = vpop.f32.mrf.mxu2  ;;  %v1009_v63 = vpop.f32.mrf.mxu0 }
 0x16a   : > { %v1105_v62 = vadd.f32 %v1104_v61, %v2444_v17  ;;  %v1153_v48 = vpop.f32.mrf.mxu3  ;;  %v1010_v1 = vadd.f32 %v1009_v63, %v2438_v44  ;;  %v1058_v2 = vpop.f32.mrf.mxu1 }
 0x16c   : > { %v1154_v3 = vadd.f32 %v1153_v48, %v1105_v62  ;;  %v1059_v4 = vadd.f32 %v1058_v2, %v1010_v1 }
 0x16e   : > { %1204 = vst [vmem:[%s2339_s7 + $0xb8] sm:$0xff] %v1154_v3 }
 0x16f   : > { %1207 = vst [vmem:[%s2339_s7 + $0xd0] sm:$0xff] %v1059_v4 }
 0x171   : > { %v1107_v5 = vpop.f32.mrf.mxu2  ;;  %v1011_v9 = vpop.f32.mrf.mxu0 }
 0x172   : > { %v1108_v8 = vadd.f32 %v1107_v5, %v2444_v17  ;;  %v1156_v52 = vpop.f32.mrf.mxu3  ;;  %v1012_v10 = vadd.f32 %v1011_v9, %v2438_v44  ;;  %v1060_v53 = vpop.f32.mrf.mxu1 }
 0x174   : > { %v1157_v56 = vadd.f32 %v1156_v52, %v1108_v8  ;;  %v1061_v57 = vadd.f32 %v1060_v53, %v1012_v10 }
 0x176   : > { %1208 = vst [vmem:[%s2339_s7 + $0xd8] sm:$0xff] %v1157_v56 }
 0x177   : > { %1211 = vst [vmem:[%s2339_s7 + $0xf0] sm:$0xff] %v1061_v57 }
 0x179   : > { %v1109_v11 = vpop.f32.mrf.mxu2  ;;  %v1014_v49 = vpop.f32.mrf.mxu0 }
 0x17a   : > { %v1110_v12 = vadd.f32 %v1109_v11, %v2444_v17  ;;  %v1158_v13 = vpop.f32.mrf.mxu3  ;;  %v1015_v59 = vadd.f32 %v1014_v49, %v2438_v44  ;;  %v1063_v16 = vpop.f32.mrf.mxu1 }
 0x17c   : > { %v1159_v18 = vadd.f32 %v1158_v13, %v1110_v12  ;;  %v1064_v19 = vadd.f32 %v1063_v16, %v1015_v59 }
 0x17e   : > { %1212 = vst [vmem:[%s2339_s7 + $0xf8] sm:$0xff] %v1159_v18 }
 0x17f   : > { %1215 = vst [vmem:[%s2339_s7 + $0x110] sm:$0xff] %v1064_v19 }
 0x181   : > { %v1112_v20 = vpop.f32.mrf.mxu2  ;;  %v1016_v22 = vpop.f32.mrf.mxu0 }
 0x182   : > { %v1113_v0 = vadd.f32 %v1112_v20, %v2444_v17  ;;  %v1161_v21 = vpop.f32.mrf.mxu3  ;;  %v1017_v6 = vadd.f32 %v1016_v22, %v2438_v44  ;;  %v1065_v23 = vpop.f32.mrf.mxu1 }
 0x184   : > { %v1162_v24 = vadd.f32 %v1161_v21, %v1113_v0  ;;  %v1066_v7 = vadd.f32 %v1065_v23, %v1017_v6 }
 0x186   : > { %1216 = vst [vmem:[%s2339_s7 + $0x118] sm:$0xff] %v1162_v24 }
 0x187   : > { %1219 = vst [vmem:[%s2339_s7 + $0x130] sm:$0xff] %v1066_v7 }
 0x189   : > { %v1114_v58 = vpop.f32.mrf.mxu2  ;;  %v1019_v29 = vpop.f32.mrf.mxu0 }
 0x18a   : > { %v1115_v25 = vadd.f32 %v1114_v58, %v2444_v17  ;;  %v1163_v28 = vpop.f32.mrf.mxu3  ;;  %v1020_v14 = vadd.f32 %v1019_v29, %v2438_v44  ;;  %v1068_v30 = vpop.f32.mrf.mxu1 }
 0x18c   : > { %v1164_v31 = vadd.f32 %v1163_v28, %v1115_v25  ;;  %v1069_v15 = vadd.f32 %v1068_v30, %v1020_v14 }
 0x18e   : > { %1220 = vst [vmem:[%s2339_s7 + $0x138] sm:$0xff] %v1164_v31 }
 0x18f   : > { %1223 = vst [vmem:[%s2339_s7 + $0x150] sm:$0xff] %v1069_v15 }
 0x191   : > { %v1117_v34 = vpop.f32.mrf.mxu2  ;;  %v1021_v37 = vpop.f32.mrf.mxu0 }
 0x192   : > { %v1118_v35 = vadd.f32 %v1117_v34, %v2444_v17  ;;  %v1166_v36 = vpop.f32.mrf.mxu3  ;;  %v1022_v38 = vadd.f32 %v1021_v37, %v2438_v44  ;;  %v1070_v26 = vpop.f32.mrf.mxu1 }
 0x194   : > { %v1167_v39 = vadd.f32 %v1166_v36, %v1118_v35  ;;  %v1071_v40 = vadd.f32 %v1070_v26, %v1022_v38 }
 0x196   : > { %1224 = vst [vmem:[%s2339_s7 + $0x158] sm:$0xff] %v1167_v39 }
 0x197   : > { %1227 = vst [vmem:[%s2339_s7 + $0x170] sm:$0xff] %v1071_v40 }
 0x199   : > { %v1119_v27 = vpop.f32.mrf.mxu2  ;;  %v1024_v43 = vpop.f32.mrf.mxu0 }
 0x19a   : > { %v1120_v41 = vadd.f32 %v1119_v27, %v2444_v17  ;;  %v1168_v42 = vpop.f32.mrf.mxu3  ;;  %v1025_v45 = vadd.f32 %v1024_v43, %v2438_v44  ;;  %v1073_v46 = vpop.f32.mrf.mxu1 }
 0x19c   : > { %v1169_v32 = vadd.f32 %v1168_v42, %v1120_v41  ;;  %v1074_v50 = vadd.f32 %v1073_v46, %v1025_v45 }
 0x19e   : > { %1228 = vst [vmem:[%s2339_s7 + $0x178] sm:$0xff] %v1169_v32 }
 0x19f   : > { %1231 = vst [vmem:[%s2339_s7 + $0x190] sm:$0xff] %v1074_v50 }
 0x1a1   : > { %v1122_v51 = vpop.f32.mrf.mxu2  ;;  %v1026_v55 = vpop.f32.mrf.mxu0 }
 0x1a2   : > { %v1123_v33 = vadd.f32 %v1122_v51, %v2444_v17  ;;  %v1171_v54 = vpop.f32.mrf.mxu3  ;;  %v1027_v60 = vadd.f32 %v1026_v55, %v2438_v44  ;;  %v1075_v47 = vpop.f32.mrf.mxu1 }
 0x1a4   : > { %v1172_v61 = vadd.f32 %v1171_v54, %v1123_v33  ;;  %v1076_v62 = vadd.f32 %v1075_v47, %v1027_v60 }
 0x1a6   : > { %1232 = vst [vmem:[%s2339_s7 + $0x198] sm:$0xff] %v1172_v61 }
 0x1a7   : > { %1235 = vst [vmem:[%s2339_s7 + $0x1b0] sm:$0xff] %v1076_v62 }
 0x1a9   : > { %v1124_v48 = vpop.f32.mrf.mxu2  ;;  %v1029_v2 = vpop.f32.mrf.mxu0 }
 0x1aa   : > { %v1125_v63 = vadd.f32 %v1124_v48, %v2444_v17  ;;  %v1173_v1 = vpop.f32.mrf.mxu3  ;;  %v1030_v3 = vadd.f32 %v1029_v2, %v2438_v44  ;;  %v1078_v4 = vpop.f32.mrf.mxu1 }
 0x1ac   : > { %v1174_v5 = vadd.f32 %v1173_v1, %v1125_v63  ;;  %v1079_v8 = vadd.f32 %v1078_v4, %v1030_v3 }
 0x1ae   : > { %1236 = vst [vmem:[%s2339_s7 + $0x1b8] sm:$0xff] %v1174_v5 }
 0x1af   : > { %1239 = vst [vmem:[%s2339_s7 + $0x1d0] sm:$0xff] %v1079_v8 }
 0x1b1   : > { %v1127_v52 = vpop.f32.mrf.mxu2  ;;  %v1031_v53 = vpop.f32.mrf.mxu0 }
 0x1b2   : > { %v1128_v9 = vadd.f32 %v1127_v52, %v2444_v17  ;;  %v1176_v10 = vpop.f32.mrf.mxu3  ;;  %v1032_v56 = vadd.f32 %v1031_v53, %v2438_v44  ;;  %v1080_v11 = vpop.f32.mrf.mxu1 }
 0x1b4   : > { %v1177_v57 = vadd.f32 %v1176_v10, %v1128_v9  ;;  %v1081_v12 = vadd.f32 %v1080_v11, %v1032_v56 }
 0x1b6   : > { %1240 = vst [vmem:[%s2339_s7 + $0x1d8] sm:$0xff] %v1177_v57 }
 0x1b7   : > { %1243 = vst [vmem:[%s2339_s7 + $0x1f0] sm:$0xff] %v1081_v12 }
 0x1b9   : > { %v1129_v13 = vpop.f32.mrf.mxu2 }
 0x1ba   : > { %v1130_v49 = vadd.f32 %v1129_v13, %v2444_v17  ;;  %v1178_v59 = vpop.f32.mrf.mxu3 }
 0x1bc   : > { %v1179_v16 = vadd.f32 %v1178_v59, %v1130_v49 }
 0x1be   : > { %1244 = vst [vmem:[%s2339_s7 + $0x1f8] sm:$0xff] %v1179_v16 }
 0x1bf PF: > { %s16_s17 = sadd.s32 1, %s1946_s17   ;;  %s2533_s12 = smov %s1930_s13 }
 0x1c0   : > { %p13_p0 = scmp.ge.s32.totalorder %s16_s17, 4   ;;  %s2534_s13 = smov %s1934_s14 }
 0x1c1   : > { %s2535_s14 = smov %s2019_s24  ;;  %s2536_s15 = smov %s1942_s16 }
 0x1c2   : > { %s2537_s16 = smov %s2539_s19  ;;  %15 = sbr.rel (!%p13_p0) target bundleno = 4 (0x4), region = 78 }
 0x1c7   :  { %1286 = vsyncpa [#allocation3], 1 }
 0x1c8   :  { %1288 = vsyncpa [#allocation3 + $0x1], 1 }

// kernel: bilstm_forward.5
= control target key start
LH: loop header
LB: loop body
LE: loop exit
PB: predicated region body
PF: predicated region fallthrough
CT: control target
= control target key end

     0   :  { %s1233_s12 = smov 0   ;;  %s1235_s13 = smov 0   ;;  %s1502_s0 = inlined_call_operand.vmem [shape: bf16[128,128], index: 0, kind: input, shape index: {}]   ;;  %s1503_s1 = inlined_call_operand.vmem [shape: bf16[2,128,512], index: 1, kind: input, shape index: {}]   ;;  %s1504_s2 = inlined_call_operand.vmem [shape: f32[2,1,512], index: 2, kind: input, shape index: {}]   ;;  %s1505_s3 = inlined_call_operand.vmem [shape: f32[2,128,512], index: 3, kind: output, shape index: {}]  }
   0x1   :  { %s1237_s14 = smov 0  }
   0x2 LB: > { %s32_s15 = sadd.s32 1, %s1207_s13  ;;  %p955_p0 = scmp.ge.s32.totalorder %s1211_s14, 1  ;;  %s1211_s14 = sphi %s1237_s14, %s13_s14   ;;  %s1207_s13 = sphi %s1235_s13, %s1507_s13   ;;  %s1203_s12 = sphi %s1233_s12, %s1506_s12  }
   0x3   : > { %p34_p1 = scmp.ge.s32.totalorder %s32_s15, 2  ;;  %p194_p2 = scmp.lt.s32.totalorder %s1211_s14, 3 }
   0x5   : > { %s1509_s15 = smov (%p34_p1, %s32_s15), 0  ;;  %p195_p3 = pnand %p955_p0, %p194_p2 }
   0x6   : > { %p251_p4 = scmp.lt.s32.totalorder (!%p195_p3), %s1203_s12, 1 }
   0x7   : > { %198 = sbr.rel (%p195_p3) target bundleno = 306 (0x132), region = 32 }
   0xc   : > { %s1511_s12 = smov (!%p251_p4, %s1203_s12), 1 }
   0xd   : > { %s1123_s16 = sshll.u32 %s1511_s12, 8  ;;  %s958_s9 = sshll.u32 %s1511_s12, 2 }
   0xe   : > { %s1257_s19 = scalar_lea.vmem %s1503_s1, %s1123_s16  ;;  %s267_s16 = scalar_lea.vmem %s1504_s2, %s958_s9 }
   0xf   : > { %v1107_v0 = vld [vmem:[%s1257_s19 + $0xe0] sm:$0xf]  ;;  %v1163_v1 = vld [vmem:[%s1257_s19 + $0xec] sm:$0xf0]  ;;  %v1161_v2 = vld [vmem:[%s1257_s19 + $0xe4] sm:$0xf] }
  0x10   : > { %v1108_v3 = vor.u32 %v1163_v1, %v1107_v0  ;;  %v1109_v4 = vld [vmem:[%s1257_s19 + $0xf0] sm:$0xf0]  ;;  %v1115_v5 = vld [vmem:[%s1257_s19 + $0xe8] sm:$0xf]  ;;  %v1164_v6 = vld [vmem:[%s1257_s19 + $0xf4] sm:$0xf0] }
  0x11   : > { %v1112_v7 = vor.u32 %v1161_v2, %v1109_v4  ;;  %v1116_v8 = vor.u32 %v1164_v6, %v1115_v5  ;;  %v1162_v9 = vld [vmem:[%s1257_s19 + $0xec] sm:$0xf]  ;;  %v1117_v10 = vld [vmem:[%s1257_s19 + $0xf8] sm:$0xf0]  ;;  %v1091_v11 = vld [vmem:[%s1257_s19 + $0xc0] sm:$0xf] }
  0x12   : > { %551 = vmatpush.bf16.msra.mxu0 %v1108_v3  ;;  %v1120_v12 = vor.u32 %v1162_v9, %v1117_v10  ;;  %v1159_v13 = vld [vmem:[%s1257_s19 + $0xcc] sm:$0xf0]  ;;  %v1157_v14 = vld [vmem:[%s1257_s19 + $0xc4] sm:$0xf]  ;;  %v1093_v15 = vld [vmem:[%s1257_s19 + $0xd0] sm:$0xf0] }
  0x13   : > { %600 = vmatpush.bf16.msra.mxu1 %v1112_v7  ;;  %649 = vmatpush.bf16.msra.mxu2 %v1116_v8  ;;  %v1092_v16 = vor.u32 %v1159_v13, %v1091_v11  ;;  %v1096_v17 = vor.u32 %v1157_v14, %v1093_v15  ;;  %v1099_v18 = vld [vmem:[%s1257_s19 + $0xc8] sm:$0xf]  ;;  %v1160_v19 = vld [vmem:[%s1257_s19 + $0xd4] sm:$0xf0]  ;;  %v1158_v20 = vld [vmem:[%s1257_s19 + $0xcc] sm:$0xf] }
  0x14   : > { %698 = vmatpush.bf16.msra.mxu3 %v1120_v12  ;;  %v1100_v21 = vor.u32 %v1160_v19, %v1099_v18  ;;  %v1101_v22 = vld [vmem:[%s1257_s19 + $0xd8] sm:$0xf0]  ;;  %v1075_v23 = vld [vmem:[%s1257_s19 + $0xa0] sm:$0xf]  ;;  %v1155_v24 = vld [vmem:[%s1257_s19 + $0xac] sm:$0xf0] }
  0x15   : > { %v1104_v25 = vor.u32 %v1158_v20, %v1101_v22  ;;  %v1153_v26 = vld [vmem:[%s1257_s19 + $0xa4] sm:$0xf]  ;;  %v1077_v27 = vld [vmem:[%s1257_s19 + $0xb0] sm:$0xf0]  ;;  %v1083_v28 = vld [vmem:[%s1257_s19 + $0xa8] sm:$0xf]  ;;  %v1076_v29 = vor.u32 %v1155_v24, %v1075_v23 }
  0x16   : > { %552 = vmatpush.bf16.msra.mxu0 %v1092_v16  ;;  %v1156_v30 = vld [vmem:[%s1257_s19 + $0xb4] sm:$0xf0]  ;;  %v1154_v31 = vld [vmem:[%s1257_s19 + $0xac] sm:$0xf]  ;;  %v1085_v32 = vld [vmem:[%s1257_s19 + $0xb8] sm:$0xf0]  ;;  %v1080_v33 = vor.u32 %v1153_v26, %v1077_v27 }
  0x17   : > { %601 = vmatpush.bf16.msra.mxu1 %v1096_v17  ;;  %650 = vmatpush.bf16.msra.mxu2 %v1100_v21  ;;  %v1084_v34 = vor.u32 %v1156_v30, %v1083_v28  ;;  %v1059_v35 = vld [vmem:[%s1257_s19 + $0x80] sm:$0xf]  ;;  %v1151_v36 = vld [vmem:[%s1257_s19 + $0x8c] sm:$0xf0]  ;;  %v1149_v37 = vld [vmem:[%s1257_s19 + $0x84] sm:$0xf]  ;;  %v1088_v38 = vor.u32 %v1154_v31, %v1085_v32 }
  0x18   : > { %699 = vmatpush.bf16.msra.mxu3 %v1104_v25  ;;  %v1061_v39 = vld [vmem:[%s1257_s19 + $0x90] sm:$0xf0]  ;;  %v1067_v40 = vld [vmem:[%s1257_s19 + $0x88] sm:$0xf]  ;;  %v1152_v41 = vld [vmem:[%s1257_s19 + $0x94] sm:$0xf0]  ;;  %v1060_v44 = vor.u32 %v1151_v36, %v1059_v35 }
  0x19   : > { %v1150_v42 = vld [vmem:[%s1257_s19 + $0x8c] sm:$0xf]  ;;  %v1069_v43 = vld [vmem:[%s1257_s19 + $0x98] sm:$0xf0]  ;;  %v1064_v45 = vor.u32 %v1149_v37, %v1061_v39  ;;  %v1068_v46 = vor.u32 %v1152_v41, %v1067_v40  ;;  %v1043_v47 = vld [vmem:[%s1257_s19 + $0x60] sm:$0xf] }
  0x1a   : > { %553 = vmatpush.bf16.msra.mxu0 %v1076_v29  ;;  %v1147_v48 = vld [vmem:[%s1257_s19 + $0x6c] sm:$0xf0]  ;;  %v1145_v49 = vld [vmem:[%s1257_s19 + $0x64] sm:$0xf]  ;;  %v1072_v50 = vor.u32 %v1150_v42, %v1069_v43  ;;  %v1045_v51 = vld [vmem:[%s1257_s19 + $0x70] sm:$0xf0] }
  0x1b   : > { %602 = vmatpush.bf16.msra.mxu1 %v1080_v33  ;;  %651 = vmatpush.bf16.msra.mxu2 %v1084_v34  ;;  %v1051_v52 = vld [vmem:[%s1257_s19 + $0x68] sm:$0xf]  ;;  %v1148_v53 = vld [vmem:[%s1257_s19 + $0x74] sm:$0xf0]  ;;  %v1146_v54 = vld [vmem:[%s1257_s19 + $0x6c] sm:$0xf]  ;;  %v1044_v56 = vor.u32 %v1147_v48, %v1043_v47  ;;  %v1048_v57 = vor.u32 %v1145_v49, %v1045_v51 }
  0x1c   : > { %700 = vmatpush.bf16.msra.mxu3 %v1088_v38  ;;  %v1053_v55 = vld [vmem:[%s1257_s19 + $0x78] sm:$0xf0]  ;;  %v1052_v58 = vor.u32 %v1148_v53, %v1051_v52  ;;  %v1027_v59 = vld [vmem:[%s1257_s19 + $0x40] sm:$0xf]  ;;  %v1143_v60 = vld [vmem:[%s1257_s19 + $0x4c] sm:$0xf0] }
  0x1d   : > { %v1141_v61 = vld [vmem:[%s1257_s19 + $0x44] sm:$0xf]  ;;  %v1056_v62 = vor.u32 %v1146_v54, %v1053_v55  ;;  %v1029_v63 = vld [vmem:[%s1257_s19 + $0x50] sm:$0xf0]  ;;  %v1035_v0 = vld [vmem:[%s1257_s19 + $0x48] sm:$0xf]  ;;  %v1028_v4 = vor.u32 %v1143_v60, %v1027_v59 }
  0x1e   : > { %554 = vmatpush.bf16.msra.mxu0 %v1060_v44  ;;  %v1144_v1 = vld [vmem:[%s1257_s19 + $0x54] sm:$0xf0]  ;;  %v1142_v2 = vld [vmem:[%s1257_s19 + $0x4c] sm:$0xf]  ;;  %v1037_v3 = vld [vmem:[%s1257_s19 + $0x58] sm:$0xf0]  ;;  %v1032_v5 = vor.u32 %v1141_v61, %v1029_v63 }
  0x1f   : > { %603 = vmatpush.bf16.msra.mxu1 %v1064_v45  ;;  %652 = vmatpush.bf16.msra.mxu2 %v1068_v46  ;;  %v1036_v6 = vor.u32 %v1144_v1, %v1035_v0  ;;  %v1011_v7 = vld [vmem:[%s1257_s19 + $0x20] sm:$0xf]  ;;  %v1139_v8 = vld [vmem:[%s1257_s19 + $0x2c] sm:$0xf0]  ;;  %v1137_v9 = vld [vmem:[%s1257_s19 + $0x24] sm:$0xf]  ;;  %v1040_v10 = vor.u32 %v1142_v2, %v1037_v3 }
  0x20   : > { %701 = vmatpush.bf16.msra.mxu3 %v1072_v50  ;;  %v1013_v11 = vld [vmem:[%s1257_s19 + $0x30] sm:$0xf0]  ;;  %v1019_v12 = vld [vmem:[%s1257_s19 + $0x28] sm:$0xf]  ;;  %v1140_v13 = vld [vmem:[%s1257_s19 + $0x34] sm:$0xf0]  ;;  %v1012_v16 = vor.u32 %v1139_v8, %v1011_v7 }
  0x21   : > { %v1138_v14 = vld [vmem:[%s1257_s19 + $0x2c] sm:$0xf]  ;;  %v1021_v15 = vld [vmem:[%s1257_s19 + $0x38] sm:$0xf0]  ;;  %v1016_v17 = vor.u32 %v1137_v9, %v1013_v11  ;;  %v1020_v18 = vor.u32 %v1140_v13, %v1019_v12  ;;  %v995_v19 = vld [vmem:[%s1257_s19] sm:$0xf] }
  0x22   : > { %555 = vmatpush.bf16.msra.mxu0 %v1044_v56  ;;  %v1135_v20 = vld [vmem:[%s1257_s19 + $0xc] sm:$0xf0]  ;;  %v1133_v21 = vld [vmem:[%s1257_s19 + $0x4] sm:$0xf]  ;;  %v1024_v22 = vor.u32 %v1138_v14, %v1021_v15  ;;  %v997_v23 = vld [vmem:[%s1257_s19 + $0x10] sm:$0xf0] }
  0x23   : > { %604 = vmatpush.bf16.msra.mxu1 %v1048_v57  ;;  %653 = vmatpush.bf16.msra.mxu2 %v1052_v58  ;;  %v1003_v24 = vld [vmem:[%s1257_s19 + $0x8] sm:$0xf]  ;;  %v1136_v25 = vld [vmem:[%s1257_s19 + $0x14] sm:$0xf0]  ;;  %v1134_v26 = vld [vmem:[%s1257_s19 + $0xc] sm:$0xf]  ;;  %v996_v28 = vor.u32 %v1135_v20, %v995_v19  ;;  %v1000_v29 = vor.u32 %v1133_v21, %v997_v23 }
  0x24   : > { %702 = vmatpush.bf16.msra.mxu3 %v1056_v62  ;;  %v1005_v27 = vld [vmem:[%s1257_s19 + $0x18] sm:$0xf0]  ;;  %v1004_v30 = vor.u32 %v1136_v25, %v1003_v24  ;;  %v1125_v32 = vld [vmem:[%s1502_s0] sm:$0xff]  ;;  %v1126_v33 = vld [vmem:[%s1502_s0 + $0x8] sm:$0xff]  ;;  %s1124_s17 = sshll.u32 %s1511_s12, 9 }
  0x25   : > { %v1008_v31 = vor.u32 %v1134_v26, %v1005_v27  ;;  %v1127_v34 = vld [vmem:[%s1502_s0 + $0x10] sm:$0xff]  ;;  %v1128_v35 = vld [vmem:[%s1502_s0 + $0x18] sm:$0xff]  ;;  %v1129_v36 = vld [vmem:[%s1502_s0 + $0x20] sm:$0xff]  ;;  %s1359_s20 = scalar_lea.vmem %s1505_s3, %s1124_s17 }
  0x26   : > { %556 = vmatpush.bf16.msra.mxu0 %v1028_v4  ;;  %v1130_v37 = vld [vmem:[%s1502_s0 + $0x28] sm:$0xff]  ;;  %v1131_v38 = vld [vmem:[%s1502_s0 + $0x30] sm:$0xff]  ;;  %v1132_v39 = vld [vmem:[%s1502_s0 + $0x38] sm:$0xff] }
  0x27   : > { %605 = vmatpush.bf16.msra.mxu1 %v1032_v5  ;;  %654 = vmatpush.bf16.msra.mxu2 %v1036_v6  ;;  %v333_v40 = vld [vmem:[%s267_s16] sm:$0xf] }
  0x28   : > { %703 = vmatpush.bf16.msra.mxu3 %v1040_v10  ;;  %v1352_v41 = vperm.slane %v333_v40, 0  ;;  %v1354_v42 = vperm.slane %v333_v40, 1  ;;  %v1365_v47 = vperm.slane %v333_v40, 2  ;;  %v1367_v48 = vperm.slane %v333_v40, 3 }
  0x2a   : > { %557 = vmatpush.bf16.msra.mxu0 %v1012_v16 }
  0x2b   : > { %606 = vmatpush.bf16.msra.mxu1 %v1016_v17  ;;  %655 = vmatpush.bf16.msra.mxu2 %v1020_v18 }
  0x2c   : > { %704 = vmatpush.bf16.msra.mxu3 %v1024_v22 }
  0x2e   : > { %558 = vmatpush.bf16.msra.mxu0 %v996_v28 }
  0x2f   : > { %607 = vmatpush.bf16.msra.mxu1 %v1000_v29  ;;  %656 = vmatpush.bf16.msra.mxu2 %v1004_v30 }
  0x30   : > { %705 = vmatpush.bf16.msra.mxu3 %v1008_v31 }
  0x31   : > { %559 = vmatmul.bf16.vlgmr.msra.gmra.mxu0 %v1125_v32 }
  0x32   : > { %608 = vmatmul.bf16.vlgmr.msra.gmra.mxu1 %v1125_v32  ;;  %657 = vmatmul.bf16.vlgmr.msra.gmra.mxu2 %v1125_v32 }
  0x33   : > { %706 = vmatmul.bf16.vlgmr.msra.gmra.mxu3 %v1125_v32 }
  0x41   : > { %564 = vmatmul.bf16.gmra.mxu0 %v1126_v33 }
  0x42   : > { %613 = vmatmul.bf16.gmra.mxu1 %v1126_v33  ;;  %662 = vmatmul.bf16.gmra.mxu2 %v1126_v33 }
  0x43   : > { %711 = vmatmul.bf16.gmra.mxu3 %v1126_v33 }
  0x51   : > { %569 = vmatmul.bf16.gmra.mxu0 %v1127_v34 }
  0x52   : > { %618 = vmatmul.bf16.gmra.mxu1 %v1127_v34  ;;  %667 = vmatmul.bf16.gmra.mxu2 %v1127_v34 }
  0x53   : > { %716 = vmatmul.bf16.gmra.mxu3 %v1127_v34 }
  0x61   : > { %574 = vmatmul.bf16.gmra.mxu0 %v1128_v35 }
  0x62   : > { %623 = vmatmul.bf16.gmra.mxu1 %v1128_v35  ;;  %672 = vmatmul.bf16.gmra.mxu2 %v1128_v35 }
  0x63   : > { %721 = vmatmul.bf16.gmra.mxu3 %v1128_v35 }
  0x71   : > { %579 = vmatmul.bf16.gmra.mxu0 %v1129_v36 }
  0x72   : > { %628 = vmatmul.bf16.gmra.mxu1 %v1129_v36  ;;  %677 = vmatmul.bf16.gmra.mxu2 %v1129_v36 }
  0x73   : > { %726 = vmatmul.bf16.gmra.mxu3 %v1129_v36 }
  0x81   : > { %584 = vmatmul.bf16.gmra.mxu0 %v1130_v37 }
  0x82   : > { %633 = vmatmul.bf16.gmra.mxu1 %v1130_v37  ;;  %682 = vmatmul.bf16.gmra.mxu2 %v1130_v37 }
  0x83   : > { %731 = vmatmul.bf16.gmra.mxu3 %v1130_v37 }
  0x91   : > { %589 = vmatmul.bf16.gmra.mxu0 %v1131_v38 }
  0x92   : > { %638 = vmatmul.bf16.gmra.mxu1 %v1131_v38  ;;  %687 = vmatmul.bf16.gmra.mxu2 %v1131_v38 }
  0x93   : > { %736 = vmatmul.bf16.gmra.mxu3 %v1131_v38 }
  0xa1   : > { %594 = vmatmul.bf16.gmra.mxu0 %v1132_v39 }
  0xa2   : > { %643 = vmatmul.bf16.gmra.mxu1 %v1132_v39  ;;  %692 = vmatmul.bf16.gmra.mxu2 %v1132_v39 }
  0xa3   : > { %741 = vmatmul.bf16.gmra.mxu3 %v1132_v39 }
  0xae   : > { %v560_v43 = vpop.f32.mrf.mxu0 }
  0xaf   : > { %v561_v44 = vadd.f32 %v560_v43, %v1352_v41  ;;  %v609_v45 = vpop.f32.mrf.mxu1 }
  0xb0   : > { %v610_v46 = vadd.f32 %v609_v45, %v1354_v42 }
  0xb1   : > { %747 = vst [vmem:[%s1359_s20] sm:$0xff] %v561_v44 }
  0xb2   : > { %748 = vst [vmem:[%s1359_s20 + $0x8] sm:$0xff] %v610_v46 }
  0xb5   : > { %v658_v49 = vpop.f32.mrf.mxu2 }
  0xb6   : > { %v659_v50 = vadd.f32 %v658_v49, %v1365_v47  ;;  %v707_v51 = vpop.f32.mrf.mxu3  ;;  %v562_v52 = vpop.f32.mrf.mxu0 }
  0xb7   : > { %v708_v53 = vadd.f32 %v707_v51, %v1367_v48  ;;  %v563_v54 = vadd.f32 %v562_v52, %v1352_v41  ;;  %v611_v55 = vpop.f32.mrf.mxu1 }
  0xb8   : > { %749 = vst [vmem:[%s1359_s20 + $0x10] sm:$0xff] %v659_v50  ;;  %v612_v56 = vadd.f32 %v611_v55, %v1354_v42 }
  0xb9   : > { %750 = vst [vmem:[%s1359_s20 + $0x18] sm:$0xff] %v708_v53 }
  0xba   : > { %751 = vst [vmem:[%s1359_s20 + $0x20] sm:$0xff] %v563_v54 }
  0xbb   : > { %752 = vst [vmem:[%s1359_s20 + $0x28] sm:$0xff] %v612_v56 }
  0xbd   : > { %v660_v57 = vpop.f32.mrf.mxu2 }
  0xbe   : > { %v661_v58 = vadd.f32 %v660_v57, %v1365_v47  ;;  %v709_v59 = vpop.f32.mrf.mxu3  ;;  %v565_v60 = vpop.f32.mrf.mxu0 }
  0xbf   : > { %v710_v61 = vadd.f32 %v709_v59, %v1367_v48  ;;  %v566_v62 = vadd.f32 %v565_v60, %v1352_v41  ;;  %v614_v63 = vpop.f32.mrf.mxu1 }
  0xc0   : > { %753 = vst [vmem:[%s1359_s20 + $0x30] sm:$0xff] %v661_v58  ;;  %v615_v0 = vadd.f32 %v614_v63, %v1354_v42 }
  0xc1   : > { %754 = vst [vmem:[%s1359_s20 + $0x38] sm:$0xff] %v710_v61 }
  0xc2   : > { %755 = vst [vmem:[%s1359_s20 + $0x40] sm:$0xff] %v566_v62 }
  0xc3   : > { %756 = vst [vmem:[%s1359_s20 + $0x48] sm:$0xff] %v615_v0 }
  0xc5   : > { %v663_v1 = vpop.f32.mrf.mxu2 }
  0xc6   : > { %v664_v2 = vadd.f32 %v663_v1, %v1365_v47  ;;  %v712_v3 = vpop.f32.mrf.mxu3  ;;  %v567_v4 = vpop.f32.mrf.mxu0 }
  0xc7   : > { %v713_v5 = vadd.f32 %v712_v3, %v1367_v48  ;;  %v568_v6 = vadd.f32 %v567_v4, %v1352_v41  ;;  %v616_v7 = vpop.f32.mrf.mxu1 }
  0xc8   : > { %757 = vst [vmem:[%s1359_s20 + $0x50] sm:$0xff] %v664_v2  ;;  %v617_v8 = vadd.f32 %v616_v7, %v1354_v42 }
  0xc9   : > { %758 = vst [vmem:[%s1359_s20 + $0x58] sm:$0xff] %v713_v5 }
  0xca   : > { %759 = vst [vmem:[%s1359_s20 + $0x60] sm:$0xff] %v568_v6 }
  0xcb   : > { %760 = vst [vmem:[%s1359_s20 + $0x68] sm:$0xff] %v617_v8 }
  0xcd   : > { %v665_v9 = vpop.f32.mrf.mxu2 }
  0xce   : > { %v666_v10 = vadd.f32 %v665_v9, %v1365_v47  ;;  %v714_v11 = vpop.f32.mrf.mxu3  ;;  %v570_v12 = vpop.f32.mrf.mxu0 }
  0xcf   : > { %v715_v13 = vadd.f32 %v714_v11, %v1367_v48  ;;  %v571_v14 = vadd.f32 %v570_v12, %v1352_v41  ;;  %v619_v15 = vpop.f32.mrf.mxu1 }
  0xd0   : > { %761 = vst [vmem:[%s1359_s20 + $0x70] sm:$0xff] %v666_v10  ;;  %v620_v16 = vadd.f32 %v619_v15, %v1354_v42 }
  0xd1   : > { %762 = vst [vmem:[%s1359_s20 + $0x78] sm:$0xff] %v715_v13 }
  0xd2   : > { %763 = vst [vmem:[%s1359_s20 + $0x80] sm:$0xff] %v571_v14 }
  0xd3   : > { %764 = vst [vmem:[%s1359_s20 + $0x88] sm:$0xff] %v620_v16 }
  0xd5   : > { %v668_v17 = vpop.f32.mrf.mxu2 }
  0xd6   : > { %v669_v18 = vadd.f32 %v668_v17, %v1365_v47  ;;  %v717_v19 = vpop.f32.mrf.mxu3  ;;  %v572_v20 = vpop.f32.mrf.mxu0 }
  0xd7   : > { %v718_v21 = vadd.f32 %v717_v19, %v1367_v48  ;;  %v573_v22 = vadd.f32 %v572_v20, %v1352_v41  ;;  %v621_v23 = vpop.f32.mrf.mxu1 }
  0xd8   : > { %765 = vst [vmem:[%s1359_s20 + $0x90] sm:$0xff] %v669_v18  ;;  %v622_v24 = vadd.f32 %v621_v23, %v1354_v42 }
  0xd9   : > { %766 = vst [vmem:[%s1359_s20 + $0x98] sm:$0xff] %v718_v21 }
  0xda   : > { %767 = vst [vmem:[%s1359_s20 + $0xa0] sm:$0xff] %v573_v22 }
  0xdb   : > { %768 = vst [vmem:[%s1359_s20 + $0xa8] sm:$0xff] %v622_v24 }
  0xdd   : > { %v670_v25 = vpop.f32.mrf.mxu2 }
  0xde   : > { %v671_v26 = vadd.f32 %v670_v25, %v1365_v47  ;;  %v719_v27 = vpop.f32.mrf.mxu3  ;;  %v575_v28 = vpop.f32.mrf.mxu0 }
  0xdf   : > { %v720_v29 = vadd.f32 %v719_v27, %v1367_v48  ;;  %v576_v30 = vadd.f32 %v575_v28, %v1352_v41  ;;  %v624_v31 = vpop.f32.mrf.mxu1 }
  0xe0   : > { %769 = vst [vmem:[%s1359_s20 + $0xb0] sm:$0xff] %v671_v26  ;;  %v625_v32 = vadd.f32 %v624_v31, %v1354_v42 }
  0xe1   : > { %770 = vst [vmem:[%s1359_s20 + $0xb8] sm:$0xff] %v720_v29 }
  0xe2   : > { %771 = vst [vmem:[%s1359_s20 + $0xc0] sm:$0xff] %v576_v30 }
  0xe3   : > { %772 = vst [vmem:[%s1359_s20 + $0xc8] sm:$0xff] %v625_v32 }
  0xe5   : > { %v673_v33 = vpop.f32.mrf.mxu2 }
  0xe6   : > { %v674_v34 = vadd.f32 %v673_v33, %v1365_v47  ;;  %v722_v35 = vpop.f32.mrf.mxu3  ;;  %v577_v36 = vpop.f32.mrf.mxu0 }
  0xe7   : > { %v723_v37 = vadd.f32 %v722_v35, %v1367_v48  ;;  %v578_v38 = vadd.f32 %v577_v36, %v1352_v41  ;;  %v626_v39 = vpop.f32.mrf.mxu1 }
  0xe8   : > { %773 = vst [vmem:[%s1359_s20 + $0xd0] sm:$0xff] %v674_v34  ;;  %v627_v40 = vadd.f32 %v626_v39, %v1354_v42 }
  0xe9   : > { %774 = vst [vmem:[%s1359_s20 + $0xd8] sm:$0xff] %v723_v37 }
  0xea   : > { %775 = vst [vmem:[%s1359_s20 + $0xe0] sm:$0xff] %v578_v38 }
  0xeb   : > { %776 = vst [vmem:[%s1359_s20 + $0xe8] sm:$0xff] %v627_v40 }
  0xed   : > { %v675_v43 = vpop.f32.mrf.mxu2 }
  0xee   : > { %v676_v44 = vadd.f32 %v675_v43, %v1365_v47  ;;  %v724_v45 = vpop.f32.mrf.mxu3  ;;  %v580_v46 = vpop.f32.mrf.mxu0 }
  0xef   : > { %v725_v49 = vadd.f32 %v724_v45, %v1367_v48  ;;  %v581_v50 = vadd.f32 %v580_v46, %v1352_v41  ;;  %v629_v51 = vpop.f32.mrf.mxu1 }
  0xf0   : > { %777 = vst [vmem:[%s1359_s20 + $0xf0] sm:$0xff] %v676_v44  ;;  %v630_v52 = vadd.f32 %v629_v51, %v1354_v42 }
  0xf1   : > { %778 = vst [vmem:[%s1359_s20 + $0xf8] sm:$0xff] %v725_v49 }
  0xf2   : > { %779 = vst [vmem:[%s1359_s20 + $0x100] sm:$0xff] %v581_v50 }
  0xf3   : > { %780 = vst [vmem:[%s1359_s20 + $0x108] sm:$0xff] %v630_v52 }
  0xf5   : > { %v678_v53 = vpop.f32.mrf.mxu2 }
  0xf6   : > { %v679_v54 = vadd.f32 %v678_v53, %v1365_v47  ;;  %v727_v55 = vpop.f32.mrf.mxu3  ;;  %v582_v56 = vpop.f32.mrf.mxu0 }
  0xf7   : > { %v728_v57 = vadd.f32 %v727_v55, %v1367_v48  ;;  %v583_v58 = vadd.f32 %v582_v56, %v1352_v41  ;;  %v631_v59 = vpop.f32.mrf.mxu1 }
  0xf8   : > { %781 = vst [vmem:[%s1359_s20 + $0x110] sm:$0xff] %v679_v54  ;;  %v632_v60 = vadd.f32 %v631_v59, %v1354_v42 }
  0xf9   : > { %782 = vst [vmem:[%s1359_s20 + $0x118] sm:$0xff] %v728_v57 }
  0xfa   : > { %783 = vst [vmem:[%s1359_s20 + $0x120] sm:$0xff] %v583_v58 }
  0xfb   : > { %784 = vst [vmem:[%s1359_s20 + $0x128] sm:$0xff] %v632_v60 }
  0xfd   : > { %v680_v61 = vpop.f32.mrf.mxu2 }
  0xfe   : > { %v681_v62 = vadd.f32 %v680_v61, %v1365_v47  ;;  %v729_v63 = vpop.f32.mrf.mxu3  ;;  %v585_v0 = vpop.f32.mrf.mxu0 }
  0xff   : > { %v730_v1 = vadd.f32 %v729_v63, %v1367_v48  ;;  %v586_v2 = vadd.f32 %v585_v0, %v1352_v41  ;;  %v634_v3 = vpop.f32.mrf.mxu1 }
 0x100   : > { %785 = vst [vmem:[%s1359_s20 + $0x130] sm:$0xff] %v681_v62  ;;  %v635_v4 = vadd.f32 %v634_v3, %v1354_v42 }
 0x101   : > { %786 = vst [vmem:[%s1359_s20 + $0x138] sm:$0xff] %v730_v1 }
 0x102   : > { %787 = vst [vmem:[%s1359_s20 + $0x140] sm:$0xff] %v586_v2 }
 0x103   : > { %788 = vst [vmem:[%s1359_s20 + $0x148] sm:$0xff] %v635_v4 }
 0x105   : > { %v683_v5 = vpop.f32.mrf.mxu2 }
 0x106   : > { %v684_v6 = vadd.f32 %v683_v5, %v1365_v47  ;;  %v732_v7 = vpop.f32.mrf.mxu3  ;;  %v587_v8 = vpop.f32.mrf.mxu0 }
 0x107   : > { %v733_v9 = vadd.f32 %v732_v7, %v1367_v48  ;;  %v588_v10 = vadd.f32 %v587_v8, %v1352_v41  ;;  %v636_v11 = vpop.f32.mrf.mxu1 }
 0x108   : > { %789 = vst [vmem:[%s1359_s20 + $0x150] sm:$0xff] %v684_v6  ;;  %v637_v12 = vadd.f32 %v636_v11, %v1354_v42 }
 0x109   : > { %790 = vst [vmem:[%s1359_s20 + $0x158] sm:$0xff] %v733_v9 }
 0x10a   : > { %791 = vst [vmem:[%s1359_s20 + $0x160] sm:$0xff] %v588_v10 }
 0x10b   : > { %792 = vst [vmem:[%s1359_s20 + $0x168] sm:$0xff] %v637_v12 }
 0x10d   : > { %v685_v13 = vpop.f32.mrf.mxu2 }
 0x10e   : > { %v686_v14 = vadd.f32 %v685_v13, %v1365_v47  ;;  %v734_v15 = vpop.f32.mrf.mxu3  ;;  %v590_v16 = vpop.f32.mrf.mxu0 }
 0x10f   : > { %v735_v17 = vadd.f32 %v734_v15, %v1367_v48  ;;  %v591_v18 = vadd.f32 %v590_v16, %v1352_v41  ;;  %v639_v19 = vpop.f32.mrf.mxu1 }
 0x110   : > { %793 = vst [vmem:[%s1359_s20 + $0x170] sm:$0xff] %v686_v14  ;;  %v640_v20 = vadd.f32 %v639_v19, %v1354_v42 }
 0x111   : > { %794 = vst [vmem:[%s1359_s20 + $0x178] sm:$0xff] %v735_v17 }
 0x112   : > { %795 = vst [vmem:[%s1359_s20 + $0x180] sm:$0xff] %v591_v18 }
 0x113   : > { %796 = vst [vmem:[%s1359_s20 + $0x188] sm:$0xff] %v640_v20 }
 0x115   : > { %v688_v21 = vpop.f32.mrf.mxu2 }
 0x116   : > { %v689_v22 = vadd.f32 %v688_v21, %v1365_v47  ;;  %v737_v23 = vpop.f32.mrf.mxu3  ;;  %v592_v24 = vpop.f32.mrf.mxu0 }
 0x117   : > { %v738_v25 = vadd.f32 %v737_v23, %v1367_v48  ;;  %v593_v26 = vadd.f32 %v592_v24, %v1352_v41  ;;  %v641_v27 = vpop.f32.mrf.mxu1 }
 0x118   : > { %797 = vst [vmem:[%s1359_s20 + $0x190] sm:$0xff] %v689_v22  ;;  %v642_v28 = vadd.f32 %v641_v27, %v1354_v42 }
 0x119   : > { %798 = vst [vmem:[%s1359_s20 + $0x198] sm:$0xff] %v738_v25 }
 0x11a   : > { %799 = vst [vmem:[%s1359_s20 + $0x1a0] sm:$0xff] %v593_v26 }
 0x11b   : > { %800 = vst [vmem:[%s1359_s20 + $0x1a8] sm:$0xff] %v642_v28 }
 0x11d   : > { %v690_v29 = vpop.f32.mrf.mxu2 }
 0x11e   : > { %v691_v30 = vadd.f32 %v690_v29, %v1365_v47  ;;  %v739_v31 = vpop.f32.mrf.mxu3  ;;  %v595_v32 = vpop.f32.mrf.mxu0 }
 0x11f   : > { %v740_v33 = vadd.f32 %v739_v31, %v1367_v48  ;;  %v596_v34 = vadd.f32 %v595_v32, %v1352_v41  ;;  %v644_v35 = vpop.f32.mrf.mxu1 }
 0x120   : > { %801 = vst [vmem:[%s1359_s20 + $0x1b0] sm:$0xff] %v691_v30  ;;  %v645_v36 = vadd.f32 %v644_v35, %v1354_v42 }
 0x121   : > { %802 = vst [vmem:[%s1359_s20 + $0x1b8] sm:$0xff] %v740_v33 }
 0x122   : > { %803 = vst [vmem:[%s1359_s20 + $0x1c0] sm:$0xff] %v596_v34 }
 0x123   : > { %804 = vst [vmem:[%s1359_s20 + $0x1c8] sm:$0xff] %v645_v36 }
 0x125   : > { %v693_v37 = vpop.f32.mrf.mxu2 }
 0x126   : > { %v694_v38 = vadd.f32 %v693_v37, %v1365_v47  ;;  %v742_v39 = vpop.f32.mrf.mxu3  ;;  %v597_v40 = vpop.f32.mrf.mxu0 }
 0x127   : > { %v743_v43 = vadd.f32 %v742_v39, %v1367_v48  ;;  %v598_v44 = vadd.f32 %v597_v40, %v1352_v41  ;;  %v646_v45 = vpop.f32.mrf.mxu1 }
 0x128   : > { %805 = vst [vmem:[%s1359_s20 + $0x1d0] sm:$0xff] %v694_v38  ;;  %v647_v46 = vadd.f32 %v646_v45, %v1354_v42 }
 0x129   : > { %806 = vst [vmem:[%s1359_s20 + $0x1d8] sm:$0xff] %v743_v43 }
 0x12a   : > { %807 = vst [vmem:[%s1359_s20 + $0x1e0] sm:$0xff] %v598_v44 }
 0x12b   : > { %808 = vst [vmem:[%s1359_s20 + $0x1e8] sm:$0xff] %v647_v46 }
 0x12d   : > { %v695_v49 = vpop.f32.mrf.mxu2 }
 0x12e   : > { %v696_v50 = vadd.f32 %v695_v49, %v1365_v47  ;;  %v744_v51 = vpop.f32.mrf.mxu3 }
 0x12f   : > { %v745_v52 = vadd.f32 %v744_v51, %v1367_v48 }
 0x130   : > { %809 = vst [vmem:[%s1359_s20 + $0x1f0] sm:$0xff] %v696_v50 }
 0x131   : > { %810 = vst [vmem:[%s1359_s20 + $0x1f8] sm:$0xff] %v745_v52 }
 0x132 PF: > { %s13_s14 = sadd.s32 1, %s1211_s14   ;;  %s1506_s12 = smov %s1207_s13 }
 0x133   : > { %p10_p5 = scmp.ge.s32.totalorder %s13_s14, 4   ;;  %s1507_s13 = smov %s1509_s15 }
 0x135   :  { %12 = sbr.rel (!%p10_p5) target bundleno = 2 (0x2), region = 68 }

// kernel: bilstm_forward.6
= control target key start
LH: loop header
LB: loop body
LE: loop exit
PB: predicated region body
PF: predicated region fallthrough
CT: control target
= control target key end

     0   :  { %s3149_s0 = inlined_call_operand.vmem [shape: f32[2,16,8,512], index: 0, kind: input, shape index: {}]   ;;  %s3150_s1 = inlined_call_operand.hbm [shape: bf16[2,128,512], index: 1, kind: input, shape index: {}]   ;;  %s3151_s2 = inlined_call_operand.vmem [shape: bf16[16,8,256], index: 2, kind: output, shape index: {0}]   ;;  %s3152_s3 = inlined_call_operand.vmem [shape: f32[2,8,128], index: 3, kind: output, shape index: {1}]   ;;  %s3153_s4 = inlined_call_operand.vmem [shape: f32[2,8,128], index: 4, kind: output, shape index: {2}]  }
   0x1   :  { %3158 = sst [smem:[#allocation12_spill]] %s3150_s1 }
   0x2   :  { %3159 = sst [smem:[#allocation13_spill]] %s3151_s2 }
   0x3   :  { %10 = vsyncpa [#allocation5], 0 }
   0x4   :  { %12 = vsyncpa [#allocation5 + $0x1], 0  ;;  %s2518_s15 = smov 0   ;;  %s2520_s16 = smov 0  }
   0x5   :  { %s2522_s17 = smov 0   ;;  %s2524_s18 = smov 0  }
   0x6   :  { %s2526_s19 = smov 0   ;;  %s2528_s20 = smov 0  }
   0x7   :  { %s2530_s21 = smov 0   ;;  %s2532_s22 = smov 0  }
   0x8   :  { %s2534_s23 = smov 0   ;;  %s2536_s24 = smov 0  }
   0x9 LB: > { %3160 = sst [smem:[#allocation8_spill]] %s2480_s22  ;;  %s1891_s25 = sadd.s32 4294967295, %s2488_s24   ;;  %s2488_s24 = sphi %s2536_s24, %s18_s24   ;;  %s2484_s23 = sphi %s2534_s23, %s3172_s23   ;;  %s2480_s22 = sphi %s2532_s22, %s3171_s22   ;;  %s2476_s21 = sphi %s2530_s21, %s3170_s21   ;;  %s2472_s20 = sphi %s2528_s20, %s3169_s20   ;;  %s2468_s19 = sphi %s2526_s19, %s3177_s19   ;;  %s2464_s18 = sphi %s2524_s18, %s3176_s18   ;;  %s2460_s17 = sphi %s2522_s17, %s3175_s17   ;;  %s2456_s16 = sphi %s2520_s16, %s3174_s16   ;;  %s2452_s15 = sphi %s2518_s15, %s3173_s15  }
   0xa   : > { %3161 = sst [smem:[#allocation9_spill]] %s2484_s23  ;;  %s27_s26 = sadd.s32 1, %s2480_s22 }
   0xb   : > { %p28_p0 = scmp.ge.s32.totalorder %s27_s26, 2  ;;  %s30_s27 = sadd.s32 1, %s2484_s23 }
   0xc   : > { %s73_s28 = sadd.s32 1, %s2468_s19  ;;  %p80_p1 = scmp.ne.s32.totalorder %s2468_s19, %s2464_s18 }
   0xd   : > { %s3179_s26 = smov (%p28_p0, %s27_s26), 0  ;;  %s3181_s27 = smov (!%p28_p0, %s30_s27), %s2484_s23 }
   0xe   : > { %3162 = sst [smem:[#allocation10_spill]] %s3179_s26  ;;  %p81_p2 = scmp.eq.s32.totalorder %s2488_s24, 0 }
   0xf   : > { %p86_p3 = scmp.ne.s32.totalorder %s2464_s18, %s2460_s17  ;;  %p32_p4 = scmp.ge.s32.totalorder %s3181_s27, 2 }
  0x10   : > { %p87_p5 = scmp.eq.s32.totalorder %s1891_s25, 0  ;;  %p2577_p6 = por %p81_p2, %p80_p1 }
  0x11   : > { %s1895_s30 = sshll.u32 %s2480_s22, 1  ;;  %s3183_s27 = smov (%p32_p4, %s3181_s27), 0 }
  0x12   : > { %3164 = sst [smem:[#allocation11_spill]] %s3183_s27  ;;  %p2584_p7 = por %p87_p5, %p86_p3 }
  0x13   : > { %s97_s6 = ssub.s32 1, %s1895_s30  ;;  %s70_s7 = ssub.s32 %s2484_s23, %s3183_s27 }
  0x14   : > { %s98_s8 = smul.u32 %s2484_s23, %s97_s6  ;;  %p71_p8 = scmp.eq.s32.totalorder %s70_s7, 0 }
  0x15   : > { %s1896_s9 = sshll.u32 %s3179_s26, 1  ;;  %s109_s14 = sadd.s32 1, %s2456_s16 }
  0x16   : > { %s99_s10 = sadd.s32 %s2480_s22, %s98_s8  ;;  %s101_s11 = ssub.s32 1, %s1896_s9 }
  0x17   : > { %s2594_s12 = scalar_select %p71_p8, %s2468_s19, %s73_s28  }
  0x18   : > { %s102_s13 = smul.u32 %s101_s11, %s3183_s27  ;;  %p119_p9 = scmp.ne.s32.totalorder %s2456_s16, %s2452_s15 }
  0x19   : > { %p120_p10 = scmp.eq.s32.totalorder %s1891_s25, 3  ;;  %p2164_p12 = scmp.lt.s32.totalorder %s2488_s24, 4 }
  0x1a   : > { %s103_s17 = sadd.s32 %s102_s13, %s3179_s26  ;;  %s220_s8 = sand.u32 1, %s2468_s19  }
  0x1b   : > { %s104_s2 = ssub.s32 %s99_s10, %s103_s17  ;;  %p2601_p11 = por %p120_p10, %p119_p9 }
  0x1c   : > { %s106_s6 = sor.u32 %s104_s2, %s70_s7  ;;  %s1899_s9 = sshll.u32 %s220_s8, 8 }
  0x1d   : > { %p107_p13 = scmp.eq.s32.totalorder %s106_s6, 0  ;;  %s2121_s11 = sshll.u32 %s2484_s23, 8 }
  0x1e   : > { %s3167_s1 = sld [smem:[#allocation12_spill]]  ;;  %s224_s13 = scalar_lea.vmem [#allocation4], %s1899_s9 }
  0x1f   : > { %s2608_s28 = scalar_select %p107_p13, %s2456_s16, %s109_s14  }
  0x20   : > { %s232_s10 = sshll.u32 %s224_s13, 4  ;;  %p2161_p0 = pnand %p2164_p12, %p2577_p6  ;;  %s233_s10 = int_to_ptr.vmem [resolvable:$true] %s232_s10 }
  0x21   : > { %p1902_p1 = scmp.ge.s32.totalorder %s2488_s24, 1  ;;  %s221_s2 = scalar_lea.sflag [#allocation5], %s220_s8 }
  0x22   : > { %s2490_s7 = smov 256   ;;  %s2491_s6 = smov 16  }
  0x23   : > { %p240_p2 = scmp.lt.s32.totalorder %s2488_s24, 5 }
  0x24   : > { %s229_s25 = scalar_lea.hbm %s3167_s1, %s2121_s11 }
  0x25   : > { %s230_s17 = sshll.u32 %s229_s25, 4  ;;  %p241_p3 = pnand %p1902_p1, %p240_p2  ;;  %s231_s17 = int_to_ptr.hbm [resolvable:$true] %s230_s17 }
  0x26   : > { %2163 = dma.hbm_to_vmem [thread:$0]  (!%p2161_p0), %s231_s17, 4096, %s233_s10, %s221_s2, %s2490_s7, %s2490_s7, %s2491_s6  }
  0x27   : > { %244 = sbr.rel (%p241_p3) target bundleno = 1497 (0x5d9), region = 28  ;;  %s246_s14 = sand.u32 (!%p241_p3), 1, %s2464_s18  }
  0x28   : > { %s1903_s22 = sshll.u32 (!%p241_p3), %s246_s14, 8  ;;  %s247_s27 = scalar_lea.sflag (!%p241_p3), [#allocation5], %s246_s14 }
  0x29   : > { %s2619_s9 = scalar_lea.vmem (!%p241_p3), [#allocation4], %s1903_s22 }
  0x2c   : > { %2447 = dma.done.wait (%p2584_p7), %s247_s27, 4096  }
  0x2d   : > { %2449 = vsyncadd (%p2584_p7), %s247_s27, 4294963200  ;;  %s282_s29 = sand.u32 1, %s2452_s15   ;;  %s1905_s8 = sshll.u32 %s2472_s20, 1 }
  0x2e   : > { %s1904_s11 = sshll.u32 %s282_s29, 5  ;;  %s298_s25 = ssub.s32 1, %s1905_s8 }
  0x2f   : > { %s299_s13 = smul.u32 %s2476_s21, %s298_s25  ;;  %p302_p4 = scmp.lt.s32.totalorder %s2476_s21, 1 }
  0x30   : > { %p1912_p6 = scmp.ne.s32.totalorder %s2472_s20, 0 }
  0x31   : > { %s2630_s10 = sadd.s32 %s2472_s20, %s299_s13 }
  0x32   : > { %s1906_s17 = sshll.u32 %s2630_s10, 3 }
  0x33   : > { %s303_s2 = scalar_select %p302_p4, %s2476_s21, 1 }
  0x34   : > { %p304_p5 = scmp.lt.s32.totalorder %s1906_s17, 15 }
  0x35   : > { %s1908_s5 = sshll.u32 %s303_s2, 6  ;;  %s1910_s7 = sshll.u32 %s303_s2, 3 }
  0x36   : > { %s3185_s17 = smov (!%p304_p5, %s1906_s17), 15  ;;  %s2637_s22 = scalar_lea.vmem %s3152_s3, %s1910_s7 }
  0x37   : > { %s2642_s29 = scalar_lea.vmem %s3153_s4, %s1910_s7  ;;  %s1907_s8 = sshll.u32 %s3185_s17, 2 }
  0x38   : > { %s308_s25 = sadd.s32 %s1908_s5, %s1907_s8  ;;  %s2649_s2 = scalar_lea.vmem [#allocation6], %s1904_s11 }
  0x39   : > { %s1909_s13 = sshll.u32 %s308_s25, 3  ;;  %332 = sbr.rel (%p1912_p6) target bundleno = 67 (0x43), region = 36 }
  0x3a   : > { %s2647_s23 = scalar_lea.vmem %s3149_s0, %s1909_s13 }
  0x3e   : > { %v2492_v0 = vmov 0.0  }
  0x3f   : > { %333 = vst [vmem:[#allocation2] sm:$0xff] %v2492_v0 }
  0x40   : > { %334 = vst [vmem:[#allocation3] sm:$0xff] %v2492_v0 }
  0x41   : > { %335 = vst [vmem:[%s2637_s22] sm:$0xff] %v2492_v0 }
  0x42   : > { %336 = vst [vmem:[%s2642_s29] sm:$0xff] %v2492_v0 }
  0x43 PF: > { %v2029_v1 = vld [vmem:[%s2619_s9 + $0xe0] sm:$0xf]  ;;  %v2152_v2 = vld [vmem:[%s2619_s9 + $0xec] sm:$0xf0]  ;;  %v2150_v3 = vld [vmem:[%s2619_s9 + $0xe4] sm:$0xf] }
  0x44   : > { %v2657_v4 = vor.u32 %v2152_v2, %v2029_v1  ;;  %v2031_v5 = vld [vmem:[%s2619_s9 + $0xf0] sm:$0xf0]  ;;  %v2151_v6 = vld [vmem:[%s2619_s9 + $0xec] sm:$0xf]  ;;  %v2039_v7 = vld [vmem:[%s2619_s9 + $0xf8] sm:$0xf0] }
  0x45   : > { %v2662_v8 = vor.u32 %v2150_v3, %v2031_v5  ;;  %v2664_v9 = vor.u32 %v2151_v6, %v2039_v7  ;;  %v2013_v10 = vld [vmem:[%s2619_s9 + $0xc0] sm:$0xf]  ;;  %v2148_v11 = vld [vmem:[%s2619_s9 + $0xcc] sm:$0xf0]  ;;  %v2146_v12 = vld [vmem:[%s2619_s9 + $0xc4] sm:$0xf] }
  0x46   : > { %540 = vmatpush.bf16.msra.mxu0 %v2657_v4  ;;  %v2670_v13 = vor.u32 %v2148_v11, %v2013_v10  ;;  %v2015_v14 = vld [vmem:[%s2619_s9 + $0xd0] sm:$0xf0]  ;;  %v2147_v15 = vld [vmem:[%s2619_s9 + $0xcc] sm:$0xf]  ;;  %v2023_v16 = vld [vmem:[%s2619_s9 + $0xd8] sm:$0xf0] }
  0x47   : > { %553 = vmatpush.bf16.msra.mxu1 %v2662_v8  ;;  %579 = vmatpush.bf16.msra.mxu3 %v2664_v9  ;;  %v2677_v17 = vor.u32 %v2146_v12, %v2015_v14  ;;  %v2679_v18 = vor.u32 %v2147_v15, %v2023_v16  ;;  %v2037_v19 = vld [vmem:[%s2619_s9 + $0xe8] sm:$0xf]  ;;  %v2153_v20 = vld [vmem:[%s2619_s9 + $0xf4] sm:$0xf0]  ;;  %v1997_v21 = vld [vmem:[%s2619_s9 + $0xa0] sm:$0xf] }
  0x48   : > { %v2684_v22 = vor.u32 %v2153_v20, %v2037_v19  ;;  %v2144_v23 = vld [vmem:[%s2619_s9 + $0xac] sm:$0xf0]  ;;  %v2142_v24 = vld [vmem:[%s2619_s9 + $0xa4] sm:$0xf]  ;;  %v1999_v25 = vld [vmem:[%s2619_s9 + $0xb0] sm:$0xf0] }
  0x49   : > { %v2143_v26 = vld [vmem:[%s2619_s9 + $0xac] sm:$0xf]  ;;  %v2007_v27 = vld [vmem:[%s2619_s9 + $0xb8] sm:$0xf0]  ;;  %v2021_v28 = vld [vmem:[%s2619_s9 + $0xc8] sm:$0xf]  ;;  %v2694_v29 = vor.u32 %v2144_v23, %v1997_v21  ;;  %v2701_v33 = vor.u32 %v2142_v24, %v1999_v25 }
  0x4a   : > { %541 = vmatpush.bf16.msra.mxu0 %v2670_v13  ;;  %566 = vmatpush.bf16.msra.mxu2 %v2684_v22  ;;  %v2149_v30 = vld [vmem:[%s2619_s9 + $0xd4] sm:$0xf0]  ;;  %v1981_v31 = vld [vmem:[%s2619_s9 + $0x80] sm:$0xf]  ;;  %v2140_v32 = vld [vmem:[%s2619_s9 + $0x8c] sm:$0xf0]  ;;  %v2703_v34 = vor.u32 %v2143_v26, %v2007_v27 }
  0x4b   : > { %554 = vmatpush.bf16.msra.mxu1 %v2677_v17  ;;  %580 = vmatpush.bf16.msra.mxu3 %v2679_v18  ;;  %v2705_v35 = vor.u32 %v2149_v30, %v2021_v28  ;;  %v2138_v36 = vld [vmem:[%s2619_s9 + $0x84] sm:$0xf]  ;;  %v1983_v37 = vld [vmem:[%s2619_s9 + $0x90] sm:$0xf0]  ;;  %v2139_v38 = vld [vmem:[%s2619_s9 + $0x8c] sm:$0xf]  ;;  %v2715_v42 = vor.u32 %v2140_v32, %v1981_v31 }
  0x4c   : > { %v1991_v39 = vld [vmem:[%s2619_s9 + $0x98] sm:$0xf0]  ;;  %v2005_v40 = vld [vmem:[%s2619_s9 + $0xa8] sm:$0xf]  ;;  %v2145_v41 = vld [vmem:[%s2619_s9 + $0xb4] sm:$0xf0]  ;;  %v2723_v46 = vor.u32 %v2138_v36, %v1983_v37 }
  0x4d   : > { %v2717_v43 = vor.u32 %v2145_v41, %v2005_v40  ;;  %v1965_v44 = vld [vmem:[%s2619_s9 + $0x60] sm:$0xf]  ;;  %v2136_v45 = vld [vmem:[%s2619_s9 + $0x6c] sm:$0xf0]  ;;  %v2725_v47 = vor.u32 %v2139_v38, %v1991_v39  ;;  %v2134_v48 = vld [vmem:[%s2619_s9 + $0x64] sm:$0xf] }
  0x4e   : > { %542 = vmatpush.bf16.msra.mxu0 %v2694_v29  ;;  %567 = vmatpush.bf16.msra.mxu2 %v2705_v35  ;;  %v1989_v49 = vld [vmem:[%s2619_s9 + $0x88] sm:$0xf]  ;;  %v2141_v50 = vld [vmem:[%s2619_s9 + $0x94] sm:$0xf0]  ;;  %v1967_v51 = vld [vmem:[%s2619_s9 + $0x70] sm:$0xf0]  ;;  %v2735_v54 = vor.u32 %v2136_v45, %v1965_v44 }
  0x4f   : > { %555 = vmatpush.bf16.msra.mxu1 %v2701_v33  ;;  %581 = vmatpush.bf16.msra.mxu3 %v2703_v34  ;;  %v2135_v52 = vld [vmem:[%s2619_s9 + $0x6c] sm:$0xf]  ;;  %v1975_v53 = vld [vmem:[%s2619_s9 + $0x78] sm:$0xf0]  ;;  %v2737_v55 = vor.u32 %v2141_v50, %v1989_v49  ;;  %v1949_v56 = vld [vmem:[%s2619_s9 + $0x40] sm:$0xf]  ;;  %v2743_v58 = vor.u32 %v2134_v48, %v1967_v51 }
  0x50   : > { %v2132_v57 = vld [vmem:[%s2619_s9 + $0x4c] sm:$0xf0]  ;;  %v2745_v59 = vor.u32 %v2135_v52, %v1975_v53  ;;  %v2130_v60 = vld [vmem:[%s2619_s9 + $0x44] sm:$0xf]  ;;  %v1973_v61 = vld [vmem:[%s2619_s9 + $0x68] sm:$0xf] }
  0x51   : > { %v2137_v62 = vld [vmem:[%s2619_s9 + $0x74] sm:$0xf0]  ;;  %v1951_v63 = vld [vmem:[%s2619_s9 + $0x50] sm:$0xf0]  ;;  %v2131_v0 = vld [vmem:[%s2619_s9 + $0x4c] sm:$0xf]  ;;  %v2755_v2 = vor.u32 %v2132_v57, %v1949_v56 }
  0x52   : > { %543 = vmatpush.bf16.msra.mxu0 %v2715_v42  ;;  %568 = vmatpush.bf16.msra.mxu2 %v2717_v43  ;;  %v1959_v1 = vld [vmem:[%s2619_s9 + $0x58] sm:$0xf0]  ;;  %v2757_v3 = vor.u32 %v2137_v62, %v1973_v61  ;;  %v1933_v5 = vld [vmem:[%s2619_s9 + $0x20] sm:$0xf]  ;;  %v2128_v6 = vld [vmem:[%s2619_s9 + $0x2c] sm:$0xf0]  ;;  %v2763_v7 = vor.u32 %v2130_v60, %v1951_v63 }
  0x53   : > { %556 = vmatpush.bf16.msra.mxu1 %v2723_v46  ;;  %582 = vmatpush.bf16.msra.mxu3 %v2725_v47  ;;  %v2765_v10 = vor.u32 %v2131_v0, %v1959_v1  ;;  %v2126_v11 = vld [vmem:[%s2619_s9 + $0x24] sm:$0xf]  ;;  %v1957_v12 = vld [vmem:[%s2619_s9 + $0x48] sm:$0xf]  ;;  %v2133_v14 = vld [vmem:[%s2619_s9 + $0x54] sm:$0xf0]  ;;  %v2775_v20 = vor.u32 %v2128_v6, %v1933_v5 }
  0x54   : > { %v1935_v15 = vld [vmem:[%s2619_s9 + $0x30] sm:$0xf0]  ;;  %v2127_v16 = vld [vmem:[%s2619_s9 + $0x2c] sm:$0xf]  ;;  %v1943_v19 = vld [vmem:[%s2619_s9 + $0x38] sm:$0xf0]  ;;  %v2777_v21 = vor.u32 %v2133_v14, %v1957_v12 }
  0x55   : > { %v1917_v23 = vld [vmem:[%s2619_s9] sm:$0xf]  ;;  %v2124_v24 = vld [vmem:[%s2619_s9 + $0xc] sm:$0xf0]  ;;  %v2783_v25 = vor.u32 %v2126_v11, %v1935_v15  ;;  %v2785_v26 = vor.u32 %v2127_v16, %v1943_v19  ;;  %v2122_v27 = vld [vmem:[%s2619_s9 + $0x4] sm:$0xf] }
  0x56   : > { %544 = vmatpush.bf16.msra.mxu0 %v2735_v54  ;;  %569 = vmatpush.bf16.msra.mxu2 %v2737_v55  ;;  %v1941_v28 = vld [vmem:[%s2619_s9 + $0x28] sm:$0xf]  ;;  %v2129_v30 = vld [vmem:[%s2619_s9 + $0x34] sm:$0xf0]  ;;  %v1919_v31 = vld [vmem:[%s2619_s9 + $0x10] sm:$0xf0]  ;;  %v2795_v37 = vor.u32 %v2124_v24, %v1917_v23 }
  0x57   : > { %557 = vmatpush.bf16.msra.mxu1 %v2743_v58  ;;  %583 = vmatpush.bf16.msra.mxu3 %v2745_v59  ;;  %v2123_v32 = vld [vmem:[%s2619_s9 + $0xc] sm:$0xf]  ;;  %v1927_v36 = vld [vmem:[%s2619_s9 + $0x18] sm:$0xf0]  ;;  %v369_v38 = vld [vmem:[#allocation2] sm:$0xff]  ;;  %v2797_v39 = vor.u32 %v2129_v30, %v1941_v28  ;;  %v2801_v40 = vor.u32 %v2122_v27, %v1919_v31  ;;  %s2154_s1 = smul.u32 224, %s2476_s21 }
  0x58   : > { %v2803_v41 = vor.u32 %v2123_v32, %v1927_v36  ;;  %v1925_v44 = vld [vmem:[%s2619_s9 + $0x8] sm:$0xf]  ;;  %v2125_v45 = vld [vmem:[%s2619_s9 + $0x14] sm:$0xf0]  ;;  %v379_v48 = vpack.c.bf16 %v369_v38, %v369_v38  ;;  %s2155_s9 = smul.u32 28, %s2476_s21  ;;  %s2067_s25 = sshll.u32 %s2476_s21, 5 }
  0x59   : > { %v2811_v49 = vor.u32 %v2125_v45, %v1925_v44  ;;  %s374_s26 = scalar_lea.vmem %s2647_s23, %s2154_s1  ;;  %s2047_s17 = smul.u32 160, %s2476_s21 }
  0x5a   : > { %545 = vmatpush.bf16.msra.mxu0 %v2755_v2  ;;  %570 = vmatpush.bf16.msra.mxu2 %v2757_v3  ;;  %v375_v50 = vld [vmem:[%s374_s26] sm:$0xff]  ;;  %v376_v51 = vld [vmem:[%s374_s26 + $0x8] sm:$0xff]  ;;  %v378_v62 = vld [vmem:[%s374_s26 + $0x18] sm:$0xff]  ;;  %s661_s11 = scalar_lea.vmem %s2649_s2, %s2155_s9 [#allocation6]  ;;  %s2055_s7 = smul.u32 20, %s2476_s21 }
  0x5b   : > { %558 = vmatpush.bf16.msra.mxu1 %v2763_v7  ;;  %584 = vmatpush.bf16.msra.mxu3 %v2765_v10  ;;  %v377_v19 = vld [vmem:[%s374_s26 + $0x10] sm:$0xff]  ;;  %s1763_s5 = scalar_lea.vmem %s2647_s23, %s2047_s17  ;;  %s2057_s14 = smul.u32 96, %s2476_s21 }
  0x5c   : > { %s1767_s6 = scalar_lea.vmem %s2649_s2, %s2055_s7 [#allocation6]  ;;  %s2065_s27 = smul.u32 12, %s2476_s21 }
  0x5d   : > { %s1771_s15 = scalar_lea.vmem %s2647_s23, %s2057_s14  ;;  %s1778_s13 = scalar_lea.vmem %s2647_s23, %s2067_s25 }
  0x5e   : > { %546 = vmatpush.bf16.msra.mxu0 %v2775_v20  ;;  %571 = vmatpush.bf16.msra.mxu2 %v2777_v21  ;;  %s1775_s8 = scalar_lea.vmem %s2649_s2, %s2065_s27 [#allocation6]  ;;  %s2075_s1 = sshll.u32 %s2476_s21, 2 }
  0x5f   : > { %559 = vmatpush.bf16.msra.mxu1 %v2783_v25  ;;  %585 = vmatpush.bf16.msra.mxu3 %v2785_v26  ;;  %s1781_s26 = scalar_lea.vmem %s2649_s2, %s2075_s1 [#allocation6]  ;;  %s1058_s9 = ssub.s32 4, %s2476_s21 }
  0x60   : > { %p2113_p7 = scmp.ne.s32.totalorder %s2472_s20, 1 }
  0x62   : > { %547 = vmatpush.bf16.msra.mxu0 %v2795_v37  ;;  %572 = vmatpush.bf16.msra.mxu2 %v2797_v39 }
  0x63   : > { %560 = vmatpush.bf16.msra.mxu1 %v2801_v40  ;;  %586 = vmatpush.bf16.msra.mxu3 %v2803_v41 }
  0x65   : > { %548 = vmatmul.bf16.vlgmr.msra.gmra.mxu0 %v379_v48 }
  0x66   : > { %672 = vmatpush.bf16.msrb.mxu0 %v2657_v4  ;;  %561 = vmatmul.bf16.vlgmr.msra.gmra.mxu1 %v379_v48 }
  0x67   : > { %685 = vmatpush.bf16.msrb.mxu1 %v2662_v8  ;;  %711 = vmatpush.bf16.msrb.mxu3 %v2664_v9 }
  0x68   : > { %587 = vmatmul.bf16.vlgmr.msra.gmra.mxu3 %v379_v48  ;;  %573 = vmatpush.bf16.msra.mxu2 %v2811_v49 }
  0x6a   : > { %673 = vmatpush.bf16.msrb.mxu0 %v2670_v13 }
  0x6b   : > { %686 = vmatpush.bf16.msrb.mxu1 %v2677_v17  ;;  %712 = vmatpush.bf16.msrb.mxu3 %v2679_v18 }
  0x6c   : > { %698 = vmatpush.bf16.msrb.mxu2 %v2684_v22 }
  0x6d   : > { %574 = vmatmul.bf16.vlgmr.msra.gmra.mxu2 %v379_v48 }
  0x6e   : > { %674 = vmatpush.bf16.msrb.mxu0 %v2694_v29 }
  0x6f   : > { %687 = vmatpush.bf16.msrb.mxu1 %v2701_v33  ;;  %713 = vmatpush.bf16.msrb.mxu3 %v2703_v34 }
  0x70   : > { %699 = vmatpush.bf16.msrb.mxu2 %v2705_v35 }
  0x72   : > { %675 = vmatpush.bf16.msrb.mxu0 %v2715_v42 }
  0x73   : > { %688 = vmatpush.bf16.msrb.mxu1 %v2723_v46  ;;  %714 = vmatpush.bf16.msrb.mxu3 %v2725_v47 }
  0x74   : > { %700 = vmatpush.bf16.msrb.mxu2 %v2717_v43 }
  0x76   : > { %676 = vmatpush.bf16.msrb.mxu0 %v2735_v54 }
  0x77   : > { %689 = vmatpush.bf16.msrb.mxu1 %v2743_v58  ;;  %715 = vmatpush.bf16.msrb.mxu3 %v2745_v59 }
  0x78   : > { %701 = vmatpush.bf16.msrb.mxu2 %v2737_v55 }
  0x7a   : > { %677 = vmatpush.bf16.msrb.mxu0 %v2755_v2 }
  0x7b   : > { %690 = vmatpush.bf16.msrb.mxu1 %v2763_v7  ;;  %716 = vmatpush.bf16.msrb.mxu3 %v2765_v10 }
  0x7c   : > { %702 = vmatpush.bf16.msrb.mxu2 %v2757_v3 }
  0x7e   : > { %678 = vmatpush.bf16.msrb.mxu0 %v2775_v20 }
  0x7f   : > { %691 = vmatpush.bf16.msrb.mxu1 %v2783_v25  ;;  %717 = vmatpush.bf16.msrb.mxu3 %v2785_v26 }
  0x80   : > { %703 = vmatpush.bf16.msrb.mxu2 %v2777_v21 }
  0x82   : > { %679 = vmatpush.bf16.msrb.mxu0 %v2795_v37 }
  0x83   : > { %692 = vmatpush.bf16.msrb.mxu1 %v2801_v40  ;;  %718 = vmatpush.bf16.msrb.mxu3 %v2803_v41 }
  0x84   : > { %704 = vmatpush.bf16.msrb.mxu2 %v2797_v39 }
  0x86   : > { %804 = vmatpush.bf16.msra.mxu0 %v2657_v4 }
  0x87   : > { %817 = vmatpush.bf16.msra.mxu1 %v2662_v8  ;;  %843 = vmatpush.bf16.msra.mxu3 %v2664_v9 }
  0x88   : > { %705 = vmatpush.bf16.msrb.mxu2 %v2811_v49 }
  0x8a   : > { %805 = vmatpush.bf16.msra.mxu0 %v2670_v13 }
  0x8b   : > { %818 = vmatpush.bf16.msra.mxu1 %v2677_v17  ;;  %844 = vmatpush.bf16.msra.mxu3 %v2679_v18 }
  0x8c   : > { %830 = vmatpush.bf16.msra.mxu2 %v2684_v22 }
  0x8e   : > { %806 = vmatpush.bf16.msra.mxu0 %v2694_v29 }
  0x8f   : > { %819 = vmatpush.bf16.msra.mxu1 %v2701_v33  ;;  %845 = vmatpush.bf16.msra.mxu3 %v2703_v34 }
  0x90   : > { %831 = vmatpush.bf16.msra.mxu2 %v2705_v35 }
  0x92   : > { %807 = vmatpush.bf16.msra.mxu0 %v2715_v42 }
  0x93   : > { %820 = vmatpush.bf16.msra.mxu1 %v2723_v46  ;;  %846 = vmatpush.bf16.msra.mxu3 %v2725_v47 }
  0x94   : > { %832 = vmatpush.bf16.msra.mxu2 %v2717_v43 }
  0x96   : > { %808 = vmatpush.bf16.msra.mxu0 %v2735_v54 }
  0x97   : > { %821 = vmatpush.bf16.msra.mxu1 %v2743_v58  ;;  %847 = vmatpush.bf16.msra.mxu3 %v2745_v59 }
  0x98   : > { %833 = vmatpush.bf16.msra.mxu2 %v2737_v55 }
  0x9a   : > { %809 = vmatpush.bf16.msra.mxu0 %v2755_v2 }
  0x9b   : > { %822 = vmatpush.bf16.msra.mxu1 %v2763_v7  ;;  %848 = vmatpush.bf16.msra.mxu3 %v2765_v10 }
  0x9c   : > { %834 = vmatpush.bf16.msra.mxu2 %v2757_v3 }
  0x9e   : > { %810 = vmatpush.bf16.msra.mxu0 %v2775_v20 }
  0x9f   : > { %823 = vmatpush.bf16.msra.mxu1 %v2783_v25  ;;  %849 = vmatpush.bf16.msra.mxu3 %v2785_v26 }
  0xa0   : > { %835 = vmatpush.bf16.msra.mxu2 %v2777_v21 }
  0xa2   : > { %811 = vmatpush.bf16.msra.mxu0 %v2795_v37 }
  0xa3   : > { %824 = vmatpush.bf16.msra.mxu1 %v2801_v40  ;;  %850 = vmatpush.bf16.msra.mxu3 %v2803_v41 }
  0xa4   : > { %836 = vmatpush.bf16.msra.mxu2 %v2797_v39 }
  0xa8   : > { %837 = vmatpush.bf16.msra.mxu2 %v2811_v49 }
  0xe2   : > { %v549_v52 = vpop.f32.mrf.mxu0 }
  0xe3   : > { %v592_v53 = vadd.f32 %v549_v52, %v375_v50  ;;  %v562_v56 = vpop.f32.mrf.mxu1 }
  0xe4   : > { %v593_v57 = vadd.f32 %v562_v56, %v376_v51 }
  0xe5   : > { %v2043_v60 = vmul.f32 -1.442695, %v592_v53 }
  0xe6   : > { %v2044_v61 = vmul.f32 -1.442695, %v593_v57 }
  0xe7   : > { %2248 = vpow2.f32 %v2043_v60 }
  0xe8   : > { %2250 = vpow2.f32 %v2044_v61 }
  0xea   : > { %v551_v1 = vpop.f32.mrf.mxu0 }
  0xeb   : > { %v588_v63 = vpop.f32.mrf.mxu3  ;;  %v564_v5 = vpop.f32.mrf.mxu1 }
  0xec   : > { %v595_v0 = vadd.f32 %v588_v63, %v378_v62  ;;  %v370_v5 = vld [vmem:[#allocation3] sm:$0xff] }
  0xed   : > { %v2249_v11 = vpop.eup %2248 }
  0xee   : > { %v2045_v6 = vmul.f32 -1.442695, %v595_v0  ;;  %v2251_v14 = vpop.eup %2250  ;;  %v599_v15 = vadd.f32 1.0, %v2249_v11 }
  0xef   : > { %v618_v16 = vadd.f32 1.0, %v2251_v14 }
  0xf0   : > { %v575_v12 = vpop.f32.mrf.mxu2  ;;  %2252 = vpow2.f32 %v2045_v6  ;;  %v611_v48 = vand.u32 2147483648, %v599_v15  ;;  %v609_v52 = vand.u32 2147483647, %v599_v15  ;;  %vm605_vm2 = vweird.f32 %v599_v15 }
  0xf1   : > { %2254 = vrcp.f32 %v599_v15  ;;  %v594_v27 = vadd.f32 %v575_v12, %v377_v19  ;;  %v630_v50 = vand.u32 2147483648, %v618_v16  ;;  %v628_v56 = vand.u32 2147483647, %v618_v16 }
  0xf2   : > { %2256 = vrcp.f32 %v618_v16  ;;  %vm624_vm3 = vweird.f32 %v618_v16  ;;  %v612_v63 = vor.u32 1.1754944e-38, %v611_v48  ;;  %vm610_vm6 = vcmp.eq.f32.partialorder %v609_v52, 8.507059e+37 }
  0xf3   : > { %v590_v23 = vpop.f32.mrf.mxu3  ;;  %v631_v1 = vor.u32 1.1754944e-38, %v630_v50  ;;  %vm629_vm7 = vcmp.eq.f32.partialorder %v628_v56, 8.507059e+37  ;;  %v2049_v50 = vld [vmem:[%s1763_s5 + $0x28] sm:$0xff] }
  0xf6   : > { %v2253_v24 = vpop.eup %2252 }
  0xf7   : > { %v638_v28 = vadd.f32 1.0, %v2253_v24  ;;  %v2255_v31 = vpop.eup %2254 }
  0xf8   : > { %v577_v30 = vpop.f32.mrf.mxu2  ;;  %v2257_v32 = vpop.eup %2256  ;;  %v601_v36 = vmul.f32 %v2255_v31, %v599_v15  ;;  %vm606_vm0 = vweird.f32 %v2255_v31 }
  0xf9   : > { %2258 = vrcp.f32 %v638_v28  ;;  %v620_v38 = vmul.f32 %v2257_v32, %v618_v16  ;;  %vm625_vm1 = vweird.f32 %v2257_v32  ;;  %vm607_vm4 = vmor %vm605_vm2, %vm606_vm0  ;;  %v650_v30 = vand.u32 2147483648, %v638_v28 }
  0xfa   : > { %2260 = vtanh.f32 %v594_v27  ;;  %v602_v44 = vsub.f32 1.0, %v601_v36  ;;  %vm626_vm5 = vmor %vm624_vm3, %vm625_vm1  ;;  %vm644_vm9 = vweird.f32 %v638_v28 }
  0xfb   : > { %v621_v45 = vsub.f32 1.0, %v620_v38  ;;  %v651_v38 = vor.u32 1.1754944e-38, %v650_v30 }
  0xfc   : > { %v603_v51 = vmul.f32 %v2255_v31, %v602_v44 }
  0xfd   : > { %v622_v53 = vmul.f32 %v2257_v32, %v621_v45 }
  0xfe   : > { %v604_v60 = vadd.f32 %v2255_v31, %v603_v51 }
  0xff   : > { %v2259_v57 = vpop.eup %2258  ;;  %v623_v0 = vadd.f32 %v2257_v32, %v622_v53 }
 0x100   : > { %v2261_v61 = vpop.eup %2260  ;;  %v640_v62 = vmul.f32 %v2259_v57, %v638_v28  ;;  %v608_v6 = vsel %vm607_vm4, %v2255_v31, %v604_v60  ;;  %vm645_vm8 = vweird.f32 %v2259_v57  ;;  %v648_v31 = vand.u32 2147483647, %v638_v28  ;;  %v2048_v28 = vld [vmem:[%s1763_s5 + $0x20] sm:$0xff] }
 0x101   : > { %v613_v12 = vsel %vm610_vm6, %v612_v63, %v608_v6  ;;  %v627_v14 = vsel %vm626_vm5, %v2257_v32, %v623_v0  ;;  %vm646_vm10 = vmor %vm644_vm9, %vm645_vm8 }
 0x102   : > { %v641_v11 = vsub.f32 1.0, %v640_v62  ;;  %v632_v19 = vsel %vm629_vm7, %v631_v1, %v627_v14  ;;  %v655_v23 = vmul.f32 %v2261_v61, %v613_v12  ;;  %vm649_vm11 = vcmp.eq.f32.partialorder %v648_v31, 8.507059e+37  ;;  %v2051_v61 = vld [vmem:[%s1763_s5 + $0x38] sm:$0xff] }
 0x103   : > { %v654_v15 = vmul.f32 %v632_v19, %v370_v5 }
 0x104   : > { %v642_v24 = vmul.f32 %v2259_v57, %v641_v11 }
 0x105   : > { %v2880_v16 = vadd.f32 %v655_v23, %v654_v15  ;;  %v2050_v15 = vld [vmem:[%s1763_s5 + $0x30] sm:$0xff]  ;;  %s2082_s5 = sshll.u32 %s1058_s9, 2 }
 0x106   : > { %v643_v27 = vadd.f32 %v2259_v57, %v642_v24  ;;  %s1187_s7 = scalar_lea.vmem %s2649_s2, %s2082_s5 [#allocation6] }
 0x107   : > { %2262 = vtanh.f32 %v2880_v16 }
 0x108   : > { %v647_v36 = vsel %vm646_vm10, %v2259_v57, %v643_v27 }
 0x109   : > { %v652_v44 = vsel %vm649_vm11, %v651_v38, %v647_v36 }
 0x10d   : > { %v2263_v32 = vpop.eup %2262 }
 0x10e   : > { %v658_v45 = vmul.f32 %v2263_v32, %v652_v44 }
 0x110   : > { %v659_v48 = vpack.c.bf16 %v658_v45, %v658_v45 }
 0x112   : > { %662 = vst [vmem:[%s661_s11] sm:$0xf] %v659_v48  ;;  %680 = vmatmul.bf16.vlgmr.msrb.gmra.mxu0 %v659_v48  ;;  %693 = vmatmul.bf16.vlgmr.msrb.gmra.mxu1 %v659_v48  ;;  %s2156_s11 = sshll.u32 %s1058_s9, 5 }
 0x113   : > { %706 = vmatmul.bf16.vlgmr.msrb.gmra.mxu2 %v659_v48  ;;  %719 = vmatmul.bf16.vlgmr.msrb.gmra.mxu3 %v659_v48  ;;  %s1061_s17 = scalar_lea.vmem %s2647_s23, %s2156_s11 }
 0x114   : > { %935 = vmatpush.bf16.msrb.mxu0 %v2657_v4  ;;  %948 = vmatpush.bf16.msrb.mxu1 %v2662_v8 }
 0x115   : > { %961 = vmatpush.bf16.msrb.mxu2 %v2684_v22  ;;  %974 = vmatpush.bf16.msrb.mxu3 %v2664_v9 }
 0x118   : > { %936 = vmatpush.bf16.msrb.mxu0 %v2670_v13  ;;  %949 = vmatpush.bf16.msrb.mxu1 %v2677_v17 }
 0x119   : > { %962 = vmatpush.bf16.msrb.mxu2 %v2705_v35  ;;  %975 = vmatpush.bf16.msrb.mxu3 %v2679_v18 }
 0x11c   : > { %937 = vmatpush.bf16.msrb.mxu0 %v2694_v29  ;;  %950 = vmatpush.bf16.msrb.mxu1 %v2701_v33 }
 0x11d   : > { %963 = vmatpush.bf16.msrb.mxu2 %v2717_v43  ;;  %976 = vmatpush.bf16.msrb.mxu3 %v2703_v34 }
 0x120   : > { %938 = vmatpush.bf16.msrb.mxu0 %v2715_v42  ;;  %951 = vmatpush.bf16.msrb.mxu1 %v2723_v46 }
 0x121   : > { %964 = vmatpush.bf16.msrb.mxu2 %v2737_v55  ;;  %977 = vmatpush.bf16.msrb.mxu3 %v2725_v47 }
 0x124   : > { %939 = vmatpush.bf16.msrb.mxu0 %v2735_v54  ;;  %952 = vmatpush.bf16.msrb.mxu1 %v2743_v58 }
 0x125   : > { %965 = vmatpush.bf16.msrb.mxu2 %v2757_v3  ;;  %978 = vmatpush.bf16.msrb.mxu3 %v2745_v59 }
 0x128   : > { %940 = vmatpush.bf16.msrb.mxu0 %v2755_v2  ;;  %953 = vmatpush.bf16.msrb.mxu1 %v2763_v7 }
 0x129   : > { %966 = vmatpush.bf16.msrb.mxu2 %v2777_v21  ;;  %979 = vmatpush.bf16.msrb.mxu3 %v2765_v10 }
 0x12c   : > { %941 = vmatpush.bf16.msrb.mxu0 %v2775_v20  ;;  %954 = vmatpush.bf16.msrb.mxu1 %v2783_v25 }
 0x12d   : > { %967 = vmatpush.bf16.msrb.mxu2 %v2797_v39  ;;  %980 = vmatpush.bf16.msrb.mxu3 %v2785_v26 }
 0x130   : > { %942 = vmatpush.bf16.msrb.mxu0 %v2795_v37  ;;  %955 = vmatpush.bf16.msrb.mxu1 %v2801_v40 }
 0x131   : > { %968 = vmatpush.bf16.msrb.mxu2 %v2811_v49  ;;  %981 = vmatpush.bf16.msrb.mxu3 %v2803_v41 }
 0x18f   : > { %v681_v51 = vpop.f32.mrf.mxu0  ;;  %v694_v52 = vpop.f32.mrf.mxu1 }
 0x190   : > { %v724_v53 = vadd.f32 %v2048_v28, %v681_v51  ;;  %v725_v56 = vadd.f32 %v2049_v50, %v694_v52 }
 0x192   : > { %v2052_v57 = vmul.f32 -1.442695, %v724_v53  ;;  %v2053_v60 = vmul.f32 -1.442695, %v725_v56 }
 0x194   : > { %2264 = vpow2.f32 %v2052_v57 }
 0x195   : > { %2266 = vpow2.f32 %v2053_v60 }
 0x196   : > { %v707_v62 = vpop.f32.mrf.mxu2  ;;  %v720_v63 = vpop.f32.mrf.mxu3 }
 0x197   : > { %v727_v0 = vadd.f32 %v2051_v61, %v720_v63  ;;  %v683_v1 = vpop.f32.mrf.mxu0  ;;  %v696_v5 = vpop.f32.mrf.mxu1  ;;  %v726_v36 = vadd.f32 %v2050_v15, %v707_v62 }
 0x199   : > { %v2054_v6 = vmul.f32 -1.442695, %v727_v0 }
 0x19a   : > { %v2265_v11 = vpop.eup %2264 }
 0x19b   : > { %v2267_v12 = vpop.eup %2266  ;;  %v731_v14 = vadd.f32 1.0, %v2265_v11  ;;  %2268 = vpow2.f32 %v2054_v6 }
 0x19c   : > { %v750_v19 = vadd.f32 1.0, %v2267_v12 }
 0x19d   : > { %2270 = vrcp.f32 %v731_v14  ;;  %v743_v28 = vand.u32 2147483648, %v731_v14  ;;  %v741_v52 = vand.u32 2147483647, %v731_v14  ;;  %vm737_vm14 = vweird.f32 %v731_v14 }
 0x19e   : > { %2272 = vrcp.f32 %v750_v19  ;;  %v709_v23 = vpop.f32.mrf.mxu2  ;;  %v722_v24 = vpop.f32.mrf.mxu3  ;;  %v762_v50 = vand.u32 2147483648, %v750_v19  ;;  %v760_v56 = vand.u32 2147483647, %v750_v19  ;;  %vm756_vm15 = vweird.f32 %v750_v19 }
 0x19f   : > { %v744_v61 = vor.u32 1.1754944e-38, %v743_v28  ;;  %vm742_vm2 = vcmp.eq.f32.partialorder %v741_v52, 8.507059e+37  ;;  %v2059_v28 = vld [vmem:[%s1771_s15 + $0x48] sm:$0xff] }
 0x1a0   : > { %v763_v0 = vor.u32 1.1754944e-38, %v762_v50  ;;  %vm761_vm3 = vcmp.eq.f32.partialorder %v760_v56, 8.507059e+37 }
 0x1a1   : > { %v2269_v27 = vpop.eup %2268 }
 0x1a2   : > { %v770_v30 = vadd.f32 1.0, %v2269_v27 }
 0x1a3   : > { %v2271_v31 = vpop.eup %2270 }
 0x1a4   : > { %v2273_v38 = vpop.eup %2272  ;;  %v733_v32 = vmul.f32 %v2271_v31, %v731_v14  ;;  %2274 = vrcp.f32 %v770_v30  ;;  %vm738_vm12 = vweird.f32 %v2271_v31  ;;  %vm776_vm5 = vweird.f32 %v770_v30 }
 0x1a5   : > { %v752_v44 = vmul.f32 %v2273_v38, %v750_v19  ;;  %2276 = vtanh.f32 %v726_v36  ;;  %vm757_vm13 = vweird.f32 %v2273_v38  ;;  %vm739_vm0 = vmor %vm737_vm14, %vm738_vm12  ;;  %v780_v36 = vand.u32 2147483647, %v770_v30 }
 0x1a6   : > { %v734_v45 = vsub.f32 1.0, %v733_v32  ;;  %vm758_vm1 = vmor %vm756_vm15, %vm757_vm13 }
 0x1a7   : > { %v753_v48 = vsub.f32 1.0, %v752_v44  ;;  %vm781_vm7 = vcmp.eq.f32.partialorder %v780_v36, 8.507059e+37 }
 0x1a8   : > { %v735_v51 = vmul.f32 %v2271_v31, %v734_v45 }
 0x1a9   : > { %v754_v53 = vmul.f32 %v2273_v38, %v753_v48 }
 0x1aa   : > { %v2275_v57 = vpop.eup %2274  ;;  %v736_v60 = vadd.f32 %v2271_v31, %v735_v51 }
 0x1ab   : > { %v755_v62 = vadd.f32 %v2273_v38, %v754_v53  ;;  %v772_v63 = vmul.f32 %v2275_v57, %v770_v30  ;;  %v2277_v5 = vpop.eup %2276  ;;  %vm777_vm4 = vweird.f32 %v2275_v57 }
 0x1ac   : > { %v740_v1 = vsel %vm739_vm0, %v2271_v31, %v736_v60  ;;  %v782_v31 = vand.u32 2147483648, %v770_v30  ;;  %vm778_vm6 = vmor %vm776_vm5, %vm777_vm4  ;;  %v2058_v30 = vld [vmem:[%s1771_s15 + $0x40] sm:$0xff]  ;;  %v2061_v60 = vld [vmem:[%s1771_s15 + $0x58] sm:$0xff] }
 0x1ad   : > { %v745_v6 = vsel %vm742_vm2, %v744_v61, %v740_v1  ;;  %v759_v11 = vsel %vm758_vm1, %v2273_v38, %v755_v62  ;;  %v773_v12 = vsub.f32 1.0, %v772_v63 }
 0x1ae   : > { %v764_v23 = vsel %vm761_vm3, %v763_v0, %v759_v11  ;;  %v787_v24 = vmul.f32 %v2277_v5, %v745_v6  ;;  %v783_v32 = vor.u32 1.1754944e-38, %v782_v31 }
 0x1af   : > { %v786_v15 = vmul.f32 %v764_v23, %v2880_v16  ;;  %v774_v14 = vmul.f32 %v2275_v57, %v773_v12 }
 0x1b1   : > { %v2920_v19 = vadd.f32 %v787_v24, %v786_v15  ;;  %v775_v27 = vadd.f32 %v2275_v57, %v774_v14  ;;  %v2060_v14 = vld [vmem:[%s1771_s15 + $0x50] sm:$0xff]  ;;  %s2091_s15 = smul.u32 4294967284, %s2476_s21 }
 0x1b3   : > { %2278 = vtanh.f32 %v2920_v19  ;;  %v779_v38 = vsel %vm778_vm6, %v2275_v57, %v775_v27  ;;  %s1793_s27 = scalar_lea.vmem %s2649_s2, %s2091_s15 [#allocation6] }
 0x1b4   : > { %v784_v45 = vsel %vm781_vm7, %v783_v32, %v779_v38 }
 0x1b9   : > { %v2279_v44 = vpop.eup %2278 }
 0x1ba   : > { %v790_v48 = vmul.f32 %v2279_v44, %v784_v45 }
 0x1bc   : > { %v791_v16 = vpack.c.bf16 %v790_v48, %v790_v48 }
 0x1be   : > { %2056 = vst [vmem:[%s1767_s6 + $0x4] sm:$0xf] %v791_v16  ;;  %812 = vmatmul.bf16.vlgmr.msra.gmra.mxu0 %v791_v16  ;;  %825 = vmatmul.bf16.vlgmr.msra.gmra.mxu1 %v791_v16  ;;  %s2083_s6 = smul.u32 4294967200, %s2476_s21 }
 0x1bf   : > { %838 = vmatmul.bf16.vlgmr.msra.gmra.mxu2 %v791_v16  ;;  %851 = vmatmul.bf16.vlgmr.msra.gmra.mxu3 %v791_v16 }
 0x1c0   : > { %1066 = vmatpush.bf16.msra.mxu0 %v2657_v4  ;;  %1079 = vmatpush.bf16.msra.mxu1 %v2662_v8  ;;  %s1789_s14 = scalar_lea.vmem %s2647_s23, %s2083_s6 }
 0x1c1   : > { %1092 = vmatpush.bf16.msra.mxu2 %v2684_v22  ;;  %1105 = vmatpush.bf16.msra.mxu3 %v2664_v9 }
 0x1c4   : > { %1067 = vmatpush.bf16.msra.mxu0 %v2670_v13  ;;  %1080 = vmatpush.bf16.msra.mxu1 %v2677_v17 }
 0x1c5   : > { %1093 = vmatpush.bf16.msra.mxu2 %v2705_v35  ;;  %1106 = vmatpush.bf16.msra.mxu3 %v2679_v18 }
 0x1c8   : > { %1068 = vmatpush.bf16.msra.mxu0 %v2694_v29  ;;  %1081 = vmatpush.bf16.msra.mxu1 %v2701_v33 }
 0x1c9   : > { %1094 = vmatpush.bf16.msra.mxu2 %v2717_v43  ;;  %1107 = vmatpush.bf16.msra.mxu3 %v2703_v34 }
 0x1cc   : > { %1069 = vmatpush.bf16.msra.mxu0 %v2715_v42  ;;  %1082 = vmatpush.bf16.msra.mxu1 %v2723_v46 }
 0x1cd   : > { %1095 = vmatpush.bf16.msra.mxu2 %v2737_v55  ;;  %1108 = vmatpush.bf16.msra.mxu3 %v2725_v47 }
 0x1d0   : > { %1070 = vmatpush.bf16.msra.mxu0 %v2735_v54  ;;  %1083 = vmatpush.bf16.msra.mxu1 %v2743_v58 }
 0x1d1   : > { %1096 = vmatpush.bf16.msra.mxu2 %v2757_v3  ;;  %1109 = vmatpush.bf16.msra.mxu3 %v2745_v59 }
 0x1d4   : > { %1071 = vmatpush.bf16.msra.mxu0 %v2755_v2  ;;  %1084 = vmatpush.bf16.msra.mxu1 %v2763_v7 }
 0x1d5   : > { %1097 = vmatpush.bf16.msra.mxu2 %v2777_v21  ;;  %1110 = vmatpush.bf16.msra.mxu3 %v2765_v10 }
 0x1d8   : > { %1072 = vmatpush.bf16.msra.mxu0 %v2775_v20  ;;  %1085 = vmatpush.bf16.msra.mxu1 %v2783_v25 }
 0x1d9   : > { %1098 = vmatpush.bf16.msra.mxu2 %v2797_v39  ;;  %1111 = vmatpush.bf16.msra.mxu3 %v2785_v26 }
 0x1dc   : > { %1073 = vmatpush.bf16.msra.mxu0 %v2795_v37  ;;  %1086 = vmatpush.bf16.msra.mxu1 %v2801_v40 }
 0x1dd   : > { %1099 = vmatpush.bf16.msra.mxu2 %v2811_v49  ;;  %1112 = vmatpush.bf16.msra.mxu3 %v2803_v41 }
 0x23b   : > { %v813_v50 = vpop.f32.mrf.mxu0  ;;  %v826_v51 = vpop.f32.mrf.mxu1 }
 0x23c   : > { %v856_v52 = vadd.f32 %v2058_v30, %v813_v50  ;;  %v857_v53 = vadd.f32 %v2059_v28, %v826_v51 }
 0x23e   : > { %v2062_v56 = vmul.f32 -1.442695, %v856_v52  ;;  %v2063_v57 = vmul.f32 -1.442695, %v857_v53 }
 0x240   : > { %2280 = vpow2.f32 %v2062_v56 }
 0x241   : > { %2282 = vpow2.f32 %v2063_v57 }
 0x242   : > { %v839_v61 = vpop.f32.mrf.mxu2  ;;  %v852_v62 = vpop.f32.mrf.mxu3 }
 0x243   : > { %v859_v63 = vadd.f32 %v2061_v60, %v852_v62  ;;  %v815_v0 = vpop.f32.mrf.mxu0  ;;  %v828_v1 = vpop.f32.mrf.mxu1  ;;  %v858_v38 = vadd.f32 %v2060_v14, %v839_v61 }
 0x245   : > { %v2064_v5 = vmul.f32 -1.442695, %v859_v63 }
 0x246   : > { %v2281_v6 = vpop.eup %2280 }
 0x247   : > { %v2283_v11 = vpop.eup %2282  ;;  %v863_v12 = vadd.f32 1.0, %v2281_v6  ;;  %2284 = vpow2.f32 %v2064_v5 }
 0x248   : > { %v882_v23 = vadd.f32 1.0, %v2283_v11 }
 0x249   : > { %2286 = vrcp.f32 %v863_v12  ;;  %v875_v30 = vand.u32 2147483648, %v863_v12  ;;  %v873_v51 = vand.u32 2147483647, %v863_v12  ;;  %vm869_vm10 = vweird.f32 %v863_v12 }
 0x24a   : > { %2288 = vrcp.f32 %v882_v23  ;;  %v841_v24 = vpop.f32.mrf.mxu2  ;;  %v854_v15 = vpop.f32.mrf.mxu3  ;;  %v894_v28 = vand.u32 2147483648, %v882_v23  ;;  %v892_v53 = vand.u32 2147483647, %v882_v23  ;;  %vm888_vm11 = vweird.f32 %v882_v23 }
 0x24b   : > { %v876_v60 = vor.u32 1.1754944e-38, %v875_v30  ;;  %vm874_vm14 = vcmp.eq.f32.partialorder %v873_v51, 8.507059e+37  ;;  %v2069_v30 = vld [vmem:[%s1778_s13 + $0x68] sm:$0xff] }
 0x24c   : > { %v895_v63 = vor.u32 1.1754944e-38, %v894_v28  ;;  %vm893_vm15 = vcmp.eq.f32.partialorder %v892_v53, 8.507059e+37 }
 0x24d   : > { %v2285_v27 = vpop.eup %2284 }
 0x24e   : > { %v902_v31 = vadd.f32 1.0, %v2285_v27 }
 0x24f   : > { %v2287_v36 = vpop.eup %2286 }
 0x250   : > { %v2289_v32 = vpop.eup %2288  ;;  %v865_v44 = vmul.f32 %v2287_v36, %v863_v12  ;;  %2290 = vrcp.f32 %v902_v31  ;;  %vm870_vm8 = vweird.f32 %v2287_v36  ;;  %vm908_vm1 = vweird.f32 %v902_v31 }
 0x251   : > { %v884_v45 = vmul.f32 %v2289_v32, %v882_v23  ;;  %2292 = vtanh.f32 %v858_v38  ;;  %vm889_vm9 = vweird.f32 %v2289_v32  ;;  %vm871_vm12 = vmor %vm869_vm10, %vm870_vm8  ;;  %v912_v38 = vand.u32 2147483647, %v902_v31 }
 0x252   : > { %v866_v48 = vsub.f32 1.0, %v865_v44  ;;  %vm890_vm13 = vmor %vm888_vm11, %vm889_vm9 }
 0x253   : > { %v885_v16 = vsub.f32 1.0, %v884_v45  ;;  %vm913_vm3 = vcmp.eq.f32.partialorder %v912_v38, 8.507059e+37 }
 0x254   : > { %v867_v50 = vmul.f32 %v2287_v36, %v866_v48 }
 0x255   : > { %v886_v52 = vmul.f32 %v2289_v32, %v885_v16 }
 0x256   : > { %v2291_v56 = vpop.eup %2290  ;;  %v868_v57 = vadd.f32 %v2287_v36, %v867_v50 }
 0x257   : > { %v887_v61 = vadd.f32 %v2289_v32, %v886_v52  ;;  %v904_v62 = vmul.f32 %v2291_v56, %v902_v31  ;;  %v2293_v1 = vpop.eup %2292  ;;  %vm909_vm0 = vweird.f32 %v2291_v56 }
 0x258   : > { %v872_v0 = vsel %vm871_vm12, %v2287_v36, %v868_v57  ;;  %v914_v36 = vand.u32 2147483648, %v902_v31  ;;  %vm910_vm2 = vmor %vm908_vm1, %vm909_vm0  ;;  %v2068_v31 = vld [vmem:[%s1778_s13 + $0x60] sm:$0xff]  ;;  %v2071_v57 = vld [vmem:[%s1778_s13 + $0x78] sm:$0xff] }
 0x259   : > { %v877_v5 = vsel %vm874_vm14, %v876_v60, %v872_v0  ;;  %v891_v6 = vsel %vm890_vm13, %v2289_v32, %v887_v61  ;;  %v905_v11 = vsub.f32 1.0, %v904_v62 }
 0x25a   : > { %v896_v24 = vsel %vm893_vm15, %v895_v63, %v891_v6  ;;  %v919_v15 = vmul.f32 %v2293_v1, %v877_v5  ;;  %v915_v44 = vor.u32 1.1754944e-38, %v914_v36 }
 0x25b   : > { %v918_v14 = vmul.f32 %v896_v24, %v2920_v19  ;;  %v906_v12 = vmul.f32 %v2291_v56, %v905_v11 }
 0x25d   : > { %v2960_v23 = vadd.f32 %v919_v15, %v918_v14  ;;  %v907_v27 = vadd.f32 %v2291_v56, %v906_v12  ;;  %v2070_v12 = vld [vmem:[%s1778_s13 + $0x70] sm:$0xff]  ;;  %s2101_s13 = smul.u32 4294967276, %s2476_s21 }
 0x25f   : > { %2294 = vtanh.f32 %v2960_v23  ;;  %v911_v32 = vsel %vm910_vm2, %v2291_v56, %v907_v27  ;;  %s1801_s1 = scalar_lea.vmem %s2649_s2, %s2101_s13 [#allocation6] }
 0x260   : > { %v916_v48 = vsel %vm913_vm3, %v915_v44, %v911_v32 }
 0x265   : > { %v2295_v45 = vpop.eup %2294 }
 0x266   : > { %v922_v16 = vmul.f32 %v2295_v45, %v916_v48 }
 0x268   : > { %v923_v19 = vpack.c.bf16 %v922_v16, %v922_v16 }
 0x26a   : > { %2066 = vst [vmem:[%s1775_s8 + $0x8] sm:$0xf] %v923_v19  ;;  %943 = vmatmul.bf16.vlgmr.msrb.gmra.mxu0 %v923_v19  ;;  %956 = vmatmul.bf16.vlgmr.msrb.gmra.mxu1 %v923_v19  ;;  %s2093_s8 = smul.u32 4294967136, %s2476_s21 }
 0x26b   : > { %969 = vmatmul.bf16.vlgmr.msrb.gmra.mxu2 %v923_v19  ;;  %982 = vmatmul.bf16.vlgmr.msrb.gmra.mxu3 %v923_v19 }
 0x26c   : > { %1198 = vmatpush.bf16.msrb.mxu0 %v2657_v4  ;;  %1211 = vmatpush.bf16.msrb.mxu1 %v2662_v8  ;;  %s1797_s25 = scalar_lea.vmem %s2647_s23, %s2093_s8 }
 0x26d   : > { %1224 = vmatpush.bf16.msrb.mxu2 %v2684_v22  ;;  %1237 = vmatpush.bf16.msrb.mxu3 %v2664_v9 }
 0x270   : > { %1199 = vmatpush.bf16.msrb.mxu0 %v2670_v13  ;;  %1212 = vmatpush.bf16.msrb.mxu1 %v2677_v17 }
 0x271   : > { %1225 = vmatpush.bf16.msrb.mxu2 %v2705_v35  ;;  %1238 = vmatpush.bf16.msrb.mxu3 %v2679_v18 }
 0x274   : > { %1200 = vmatpush.bf16.msrb.mxu0 %v2694_v29  ;;  %1213 = vmatpush.bf16.msrb.mxu1 %v2701_v33 }
 0x275   : > { %1226 = vmatpush.bf16.msrb.mxu2 %v2717_v43  ;;  %1239 = vmatpush.bf16.msrb.mxu3 %v2703_v34 }
 0x278   : > { %1201 = vmatpush.bf16.msrb.mxu0 %v2715_v42  ;;  %1214 = vmatpush.bf16.msrb.mxu1 %v2723_v46 }
 0x279   : > { %1227 = vmatpush.bf16.msrb.mxu2 %v2737_v55  ;;  %1240 = vmatpush.bf16.msrb.mxu3 %v2725_v47 }
 0x27c   : > { %1202 = vmatpush.bf16.msrb.mxu0 %v2735_v54  ;;  %1215 = vmatpush.bf16.msrb.mxu1 %v2743_v58 }
 0x27d   : > { %1228 = vmatpush.bf16.msrb.mxu2 %v2757_v3  ;;  %1241 = vmatpush.bf16.msrb.mxu3 %v2745_v59 }
 0x280   : > { %1203 = vmatpush.bf16.msrb.mxu0 %v2755_v2  ;;  %1216 = vmatpush.bf16.msrb.mxu1 %v2763_v7 }
 0x281   : > { %1229 = vmatpush.bf16.msrb.mxu2 %v2777_v21  ;;  %1242 = vmatpush.bf16.msrb.mxu3 %v2765_v10 }
 0x284   : > { %1204 = vmatpush.bf16.msrb.mxu0 %v2775_v20  ;;  %1217 = vmatpush.bf16.msrb.mxu1 %v2783_v25 }
 0x285   : > { %1230 = vmatpush.bf16.msrb.mxu2 %v2797_v39  ;;  %1243 = vmatpush.bf16.msrb.mxu3 %v2785_v26 }
 0x288   : > { %1205 = vmatpush.bf16.msrb.mxu0 %v2795_v37  ;;  %1218 = vmatpush.bf16.msrb.mxu1 %v2801_v40 }
 0x289   : > { %1231 = vmatpush.bf16.msrb.mxu2 %v2811_v49  ;;  %1244 = vmatpush.bf16.msrb.mxu3 %v2803_v41 }
 0x2e7   : > { %v944_v28 = vpop.f32.mrf.mxu0  ;;  %v957_v50 = vpop.f32.mrf.mxu1 }
 0x2e8   : > { %v987_v51 = vadd.f32 %v2068_v31, %v944_v28  ;;  %v988_v52 = vadd.f32 %v2069_v30, %v957_v50 }
 0x2ea   : > { %v2072_v53 = vmul.f32 -1.442695, %v987_v51  ;;  %v2073_v56 = vmul.f32 -1.442695, %v988_v52 }
 0x2ec   : > { %2296 = vpow2.f32 %v2072_v53 }
 0x2ed   : > { %2298 = vpow2.f32 %v2073_v56 }
 0x2ee   : > { %v970_v60 = vpop.f32.mrf.mxu2  ;;  %v983_v61 = vpop.f32.mrf.mxu3 }
 0x2ef   : > { %v990_v62 = vadd.f32 %v2071_v57, %v983_v61  ;;  %v946_v63 = vpop.f32.mrf.mxu0  ;;  %v959_v0 = vpop.f32.mrf.mxu1  ;;  %v989_v32 = vadd.f32 %v2070_v12, %v970_v60 }
 0x2f1   : > { %v2074_v1 = vmul.f32 -1.442695, %v990_v62 }
 0x2f2   : > { %v2297_v5 = vpop.eup %2296 }
 0x2f3   : > { %v2299_v6 = vpop.eup %2298  ;;  %v994_v11 = vadd.f32 1.0, %v2297_v5  ;;  %2300 = vpow2.f32 %v2074_v1 }
 0x2f4   : > { %v1013_v24 = vadd.f32 1.0, %v2299_v6 }
 0x2f5   : > { %2302 = vrcp.f32 %v994_v11  ;;  %v1006_v31 = vand.u32 2147483648, %v994_v11  ;;  %v1004_v50 = vand.u32 2147483647, %v994_v11  ;;  %vm1000_vm6 = vweird.f32 %v994_v11 }
 0x2f6   : > { %2304 = vrcp.f32 %v1013_v24  ;;  %v972_v15 = vpop.f32.mrf.mxu2  ;;  %v985_v14 = vpop.f32.mrf.mxu3  ;;  %v1025_v30 = vand.u32 2147483648, %v1013_v24  ;;  %v1023_v52 = vand.u32 2147483647, %v1013_v24  ;;  %vm1019_vm7 = vweird.f32 %v1013_v24 }
 0x2f7   : > { %v1007_v57 = vor.u32 1.1754944e-38, %v1006_v31  ;;  %vm1005_vm10 = vcmp.eq.f32.partialorder %v1004_v50, 8.507059e+37  ;;  %v1063_v31 = vld [vmem:[%s1061_s17 + $0x8] sm:$0xff] }
 0x2f8   : > { %v1026_v62 = vor.u32 1.1754944e-38, %v1025_v30  ;;  %vm1024_vm11 = vcmp.eq.f32.partialorder %v1023_v52, 8.507059e+37 }
 0x2f9   : > { %v2301_v27 = vpop.eup %2300 }
 0x2fa   : > { %v1033_v36 = vadd.f32 1.0, %v2301_v27 }
 0x2fb   : > { %v2303_v38 = vpop.eup %2302 }
 0x2fc   : > { %v2305_v44 = vpop.eup %2304  ;;  %v996_v45 = vmul.f32 %v2303_v38, %v994_v11  ;;  %2306 = vrcp.f32 %v1033_v36  ;;  %vm1001_vm4 = vweird.f32 %v2303_v38  ;;  %vm1039_vm13 = vweird.f32 %v1033_v36 }
 0x2fd   : > { %v1015_v48 = vmul.f32 %v2305_v44, %v1013_v24  ;;  %2308 = vtanh.f32 %v989_v32  ;;  %vm1020_vm5 = vweird.f32 %v2305_v44  ;;  %vm1002_vm8 = vmor %vm1000_vm6, %vm1001_vm4  ;;  %v1043_v32 = vand.u32 2147483647, %v1033_v36 }
 0x2fe   : > { %v997_v16 = vsub.f32 1.0, %v996_v45  ;;  %vm1021_vm9 = vmor %vm1019_vm7, %vm1020_vm5 }
 0x2ff   : > { %v1016_v19 = vsub.f32 1.0, %v1015_v48  ;;  %vm1044_vm15 = vcmp.eq.f32.partialorder %v1043_v32, 8.507059e+37 }
 0x300   : > { %v998_v28 = vmul.f32 %v2303_v38, %v997_v16 }
 0x301   : > { %v1017_v51 = vmul.f32 %v2305_v44, %v1016_v19 }
 0x302   : > { %v2307_v53 = vpop.eup %2306  ;;  %v999_v56 = vadd.f32 %v2303_v38, %v998_v28 }
 0x303   : > { %v1018_v60 = vadd.f32 %v2305_v44, %v1017_v51  ;;  %v1035_v61 = vmul.f32 %v2307_v53, %v1033_v36  ;;  %v2309_v0 = vpop.eup %2308  ;;  %vm1040_vm12 = vweird.f32 %v2307_v53 }
 0x304   : > { %v1003_v63 = vsel %vm1002_vm8, %v2303_v38, %v999_v56  ;;  %v1045_v38 = vand.u32 2147483648, %v1033_v36  ;;  %vm1041_vm14 = vmor %vm1039_vm13, %vm1040_vm12  ;;  %v1062_v36 = vld [vmem:[%s1061_s17] sm:$0xff]  ;;  %v1065_v56 = vld [vmem:[%s1061_s17 + $0x18] sm:$0xff] }
 0x305   : > { %v1008_v1 = vsel %vm1005_vm10, %v1007_v57, %v1003_v63  ;;  %v1022_v5 = vsel %vm1021_vm9, %v2305_v44, %v1018_v60  ;;  %v1036_v6 = vsub.f32 1.0, %v1035_v61 }
 0x306   : > { %v1027_v15 = vsel %vm1024_vm11, %v1026_v62, %v1022_v5  ;;  %v1050_v14 = vmul.f32 %v2309_v0, %v1008_v1  ;;  %v1046_v45 = vor.u32 1.1754944e-38, %v1045_v38 }
 0x307   : > { %v1049_v12 = vmul.f32 %v1027_v15, %v2960_v23  ;;  %v1037_v11 = vmul.f32 %v2307_v53, %v1036_v6 }
 0x309   : > { %v3000_v24 = vadd.f32 %v1050_v14, %v1049_v12  ;;  %v1038_v27 = vadd.f32 %v2307_v53, %v1037_v11  ;;  %v1064_v11 = vld [vmem:[%s1061_s17 + $0x10] sm:$0xff] }
 0x30b   : > { %2310 = vtanh.f32 %v3000_v24  ;;  %v1042_v44 = vsel %vm1041_vm14, %v2307_v53, %v1038_v27 }
 0x30c   : > { %v1047_v16 = vsel %vm1044_vm15, %v1046_v45, %v1042_v44 }
 0x311   : > { %v2311_v48 = vpop.eup %2310 }
 0x312   : > { %v1053_v19 = vmul.f32 %v2311_v48, %v1047_v16 }
 0x314   : > { %v1054_v23 = vpack.c.bf16 %v1053_v19, %v1053_v19 }
 0x316   : > { %2076 = vst [vmem:[%s1781_s26 + $0xc] sm:$0xf] %v1054_v23  ;;  %1074 = vmatmul.bf16.vlgmr.msra.gmra.mxu0 %v1054_v23  ;;  %1087 = vmatmul.bf16.vlgmr.msra.gmra.mxu1 %v1054_v23  ;;  %s2103_s26 = smul.u32 4294967072, %s2476_s21 }
 0x317   : > { %1100 = vmatmul.bf16.vlgmr.msra.gmra.mxu2 %v1054_v23  ;;  %1113 = vmatmul.bf16.vlgmr.msra.gmra.mxu3 %v1054_v23 }
 0x318   : > { %1330 = vmatpush.bf16.msra.mxu0 %v2657_v4  ;;  %1343 = vmatpush.bf16.msra.mxu1 %v2662_v8  ;;  %s1805_s9 = scalar_lea.vmem %s2647_s23, %s2103_s26  ;;  %s2111_s23 = smul.u32 4294967268, %s2476_s21 }
 0x319   : > { %1356 = vmatpush.bf16.msra.mxu2 %v2684_v22  ;;  %1369 = vmatpush.bf16.msra.mxu3 %v2664_v9 }
 0x31a   : > { %s1809_s11 = scalar_lea.vmem %s2649_s2, %s2111_s23 [#allocation6] }
 0x31c   : > { %1331 = vmatpush.bf16.msra.mxu0 %v2670_v13  ;;  %1344 = vmatpush.bf16.msra.mxu1 %v2677_v17 }
 0x31d   : > { %1357 = vmatpush.bf16.msra.mxu2 %v2705_v35  ;;  %1370 = vmatpush.bf16.msra.mxu3 %v2679_v18 }
 0x320   : > { %1332 = vmatpush.bf16.msra.mxu0 %v2694_v29  ;;  %1345 = vmatpush.bf16.msra.mxu1 %v2701_v33 }
 0x321   : > { %1358 = vmatpush.bf16.msra.mxu2 %v2717_v43  ;;  %1371 = vmatpush.bf16.msra.mxu3 %v2703_v34 }
 0x324   : > { %1333 = vmatpush.bf16.msra.mxu0 %v2715_v42  ;;  %1346 = vmatpush.bf16.msra.mxu1 %v2723_v46 }
 0x325   : > { %1359 = vmatpush.bf16.msra.mxu2 %v2737_v55  ;;  %1372 = vmatpush.bf16.msra.mxu3 %v2725_v47 }
 0x328   : > { %1334 = vmatpush.bf16.msra.mxu0 %v2735_v54  ;;  %1347 = vmatpush.bf16.msra.mxu1 %v2743_v58 }
 0x329   : > { %1360 = vmatpush.bf16.msra.mxu2 %v2757_v3  ;;  %1373 = vmatpush.bf16.msra.mxu3 %v2745_v59 }
 0x32c   : > { %1335 = vmatpush.bf16.msra.mxu0 %v2755_v2  ;;  %1348 = vmatpush.bf16.msra.mxu1 %v2763_v7 }
 0x32d   : > { %1361 = vmatpush.bf16.msra.mxu2 %v2777_v21  ;;  %1374 = vmatpush.bf16.msra.mxu3 %v2765_v10 }
 0x330   : > { %1336 = vmatpush.bf16.msra.mxu0 %v2775_v20  ;;  %1349 = vmatpush.bf16.msra.mxu1 %v2783_v25 }
 0x331   : > { %1362 = vmatpush.bf16.msra.mxu2 %v2797_v39  ;;  %1375 = vmatpush.bf16.msra.mxu3 %v2785_v26 }
 0x334   : > { %1337 = vmatpush.bf16.msra.mxu0 %v2795_v37  ;;  %1350 = vmatpush.bf16.msra.mxu1 %v2801_v40 }
 0x335   : > { %1363 = vmatpush.bf16.msra.mxu2 %v2811_v49  ;;  %1376 = vmatpush.bf16.msra.mxu3 %v2803_v41 }
 0x393   : > { %v1075_v30 = vpop.f32.mrf.mxu0  ;;  %v1088_v28 = vpop.f32.mrf.mxu1 }
 0x394   : > { %v1118_v50 = vadd.f32 %v1075_v30, %v1062_v36  ;;  %v1119_v51 = vadd.f32 %v1088_v28, %v1063_v31 }
 0x396   : > { %v2079_v52 = vmul.f32 -1.442695, %v1118_v50  ;;  %v2080_v53 = vmul.f32 -1.442695, %v1119_v51 }
 0x398   : > { %2312 = vpow2.f32 %v2079_v52 }
 0x399   : > { %2314 = vpow2.f32 %v2080_v53 }
 0x39a   : > { %v1101_v57 = vpop.f32.mrf.mxu2  ;;  %v1114_v60 = vpop.f32.mrf.mxu3 }
 0x39b   : > { %v1121_v61 = vadd.f32 %v1114_v60, %v1065_v56  ;;  %v1077_v62 = vpop.f32.mrf.mxu0  ;;  %v1090_v63 = vpop.f32.mrf.mxu1  ;;  %v1120_v44 = vadd.f32 %v1101_v57, %v1064_v11 }
 0x39d   : > { %v2081_v0 = vmul.f32 -1.442695, %v1121_v61 }
 0x39e   : > { %v2313_v1 = vpop.eup %2312 }
 0x39f   : > { %v2315_v5 = vpop.eup %2314  ;;  %v1125_v6 = vadd.f32 1.0, %v2313_v1  ;;  %2316 = vpow2.f32 %v2081_v0 }
 0x3a0   : > { %v1144_v15 = vadd.f32 1.0, %v2315_v5 }
 0x3a1   : > { %2318 = vrcp.f32 %v1125_v6  ;;  %v1137_v36 = vand.u32 2147483648, %v1125_v6  ;;  %v1135_v28 = vand.u32 2147483647, %v1125_v6  ;;  %vm1131_vm2 = vweird.f32 %v1125_v6 }
 0x3a2   : > { %2320 = vrcp.f32 %v1144_v15  ;;  %v1103_v14 = vpop.f32.mrf.mxu2  ;;  %v1116_v12 = vpop.f32.mrf.mxu3  ;;  %v1156_v31 = vand.u32 2147483648, %v1144_v15  ;;  %v1154_v51 = vand.u32 2147483647, %v1144_v15  ;;  %vm1150_vm3 = vweird.f32 %v1144_v15 }
 0x3a3   : > { %v1138_v56 = vor.u32 1.1754944e-38, %v1137_v36  ;;  %vm1136_vm6 = vcmp.eq.f32.partialorder %v1135_v28, 8.507059e+37 }
 0x3a4   : > { %v1157_v61 = vor.u32 1.1754944e-38, %v1156_v31  ;;  %vm1155_vm7 = vcmp.eq.f32.partialorder %v1154_v51, 8.507059e+37 }
 0x3a5   : > { %v2317_v27 = vpop.eup %2316 }
 0x3a6   : > { %v1164_v38 = vadd.f32 1.0, %v2317_v27 }
 0x3a7   : > { %v2319_v32 = vpop.eup %2318 }
 0x3a8   : > { %v2321_v45 = vpop.eup %2320  ;;  %v1127_v48 = vmul.f32 %v2319_v32, %v1125_v6  ;;  %2322 = vrcp.f32 %v1164_v38  ;;  %vm1132_vm0 = vweird.f32 %v2319_v32  ;;  %vm1170_vm9 = vweird.f32 %v1164_v38 }
 0x3a9   : > { %v1146_v16 = vmul.f32 %v2321_v45, %v1144_v15  ;;  %2324 = vtanh.f32 %v1120_v44  ;;  %vm1151_vm1 = vweird.f32 %v2321_v45  ;;  %vm1133_vm4 = vmor %vm1131_vm2, %vm1132_vm0  ;;  %v1174_v44 = vand.u32 2147483647, %v1164_v38 }
 0x3aa   : > { %v1128_v19 = vsub.f32 1.0, %v1127_v48  ;;  %vm1152_vm5 = vmor %vm1150_vm3, %vm1151_vm1 }
 0x3ab   : > { %v1147_v23 = vsub.f32 1.0, %v1146_v16  ;;  %vm1175_vm11 = vcmp.eq.f32.partialorder %v1174_v44, 8.507059e+37 }
 0x3ac   : > { %v1129_v30 = vmul.f32 %v2319_v32, %v1128_v19 }
 0x3ad   : > { %v1148_v50 = vmul.f32 %v2321_v45, %v1147_v23 }
 0x3ae   : > { %v2323_v52 = vpop.eup %2322  ;;  %v1130_v53 = vadd.f32 %v2319_v32, %v1129_v30 }
 0x3af   : > { %v1149_v57 = vadd.f32 %v2321_v45, %v1148_v50  ;;  %v1166_v60 = vmul.f32 %v2323_v52, %v1164_v38  ;;  %v2325_v63 = vpop.eup %2324  ;;  %vm1171_vm8 = vweird.f32 %v2323_v52 }
 0x3b0   : > { %v1134_v62 = vsel %vm1133_vm4, %v2319_v32, %v1130_v53  ;;  %v1176_v32 = vand.u32 2147483648, %v1164_v38  ;;  %vm1172_vm10 = vmor %vm1170_vm9, %vm1171_vm8 }
 0x3b1   : > { %v1139_v0 = vsel %vm1136_vm6, %v1138_v56, %v1134_v62  ;;  %v1153_v1 = vsel %vm1152_vm5, %v2321_v45, %v1149_v57  ;;  %v1167_v5 = vsub.f32 1.0, %v1166_v60 }
 0x3b2   : > { %v1158_v14 = vsel %vm1155_vm7, %v1157_v61, %v1153_v1  ;;  %v1181_v12 = vmul.f32 %v2325_v63, %v1139_v0  ;;  %v1177_v48 = vor.u32 1.1754944e-38, %v1176_v32 }
 0x3b3   : > { %v1180_v11 = vmul.f32 %v1158_v14, %v3000_v24  ;;  %v1168_v6 = vmul.f32 %v2323_v52, %v1167_v5 }
 0x3b5   : > { %v3042_v15 = vadd.f32 %v1181_v12, %v1180_v11  ;;  %v1169_v27 = vadd.f32 %v2323_v52, %v1168_v6 }
 0x3b7   : > { %2326 = vtanh.f32 %v3042_v15  ;;  %v1173_v45 = vsel %vm1172_vm10, %v2323_v52, %v1169_v27 }
 0x3b8   : > { %v1178_v19 = vsel %vm1175_vm11, %v1177_v48, %v1173_v45 }
 0x3bd   : > { %v2327_v16 = vpop.eup %2326 }
 0x3be   : > { %v1184_v24 = vmul.f32 %v2327_v16, %v1178_v19 }
 0x3c0   : > { %v1185_v23 = vpack.c.bf16 %v1184_v24, %v1184_v24  ;;  %v2094_v24 = vld [vmem:[%s1797_s25 + $0xc0] sm:$0xff] }
 0x3c2   : > { %1188 = vst [vmem:[%s1187_s7] sm:$0xf] %v1185_v23  ;;  %1206 = vmatmul.bf16.vlgmr.msrb.gmra.mxu0 %v1185_v23  ;;  %1219 = vmatmul.bf16.vlgmr.msrb.gmra.mxu1 %v1185_v23 }
 0x3c3   : > { %1232 = vmatmul.bf16.vlgmr.msrb.gmra.mxu2 %v1185_v23  ;;  %1245 = vmatmul.bf16.vlgmr.msrb.gmra.mxu3 %v1185_v23  ;;  %v2095_v23 = vld [vmem:[%s1797_s25 + $0xc8] sm:$0xff] }
 0x3c4   : > { %1462 = vmatpush.bf16.msrb.mxu0 %v2657_v4  ;;  %1475 = vmatpush.bf16.msrb.mxu1 %v2662_v8  ;;  %v2084_v4 = vld [vmem:[%s1789_s14 + $0xa0] sm:$0xff]  ;;  %v2085_v8 = vld [vmem:[%s1789_s14 + $0xa8] sm:$0xff] }
 0x3c5   : > { %1488 = vmatpush.bf16.msrb.mxu2 %v2684_v22  ;;  %1501 = vmatpush.bf16.msrb.mxu3 %v2664_v9 }
 0x3c8   : > { %1463 = vmatpush.bf16.msrb.mxu0 %v2670_v13  ;;  %1476 = vmatpush.bf16.msrb.mxu1 %v2677_v17 }
 0x3c9   : > { %1489 = vmatpush.bf16.msrb.mxu2 %v2705_v35  ;;  %1502 = vmatpush.bf16.msrb.mxu3 %v2679_v18 }
 0x3cc   : > { %1464 = vmatpush.bf16.msrb.mxu0 %v2694_v29  ;;  %1477 = vmatpush.bf16.msrb.mxu1 %v2701_v33  ;;  %v2087_v33 = vld [vmem:[%s1789_s14 + $0xb8] sm:$0xff] }
 0x3cd   : > { %1490 = vmatpush.bf16.msrb.mxu2 %v2717_v43  ;;  %1503 = vmatpush.bf16.msrb.mxu3 %v2703_v34 }
 0x3d0   : > { %1465 = vmatpush.bf16.msrb.mxu0 %v2715_v42  ;;  %1478 = vmatpush.bf16.msrb.mxu1 %v2723_v46 }
 0x3d1   : > { %1491 = vmatpush.bf16.msrb.mxu2 %v2737_v55  ;;  %1504 = vmatpush.bf16.msrb.mxu3 %v2725_v47 }
 0x3d4   : > { %1466 = vmatpush.bf16.msrb.mxu0 %v2735_v54  ;;  %1479 = vmatpush.bf16.msrb.mxu1 %v2743_v58 }
 0x3d5   : > { %1492 = vmatpush.bf16.msrb.mxu2 %v2757_v3  ;;  %1505 = vmatpush.bf16.msrb.mxu3 %v2745_v59 }
 0x3d8   : > { %1467 = vmatpush.bf16.msrb.mxu0 %v2755_v2  ;;  %1480 = vmatpush.bf16.msrb.mxu1 %v2763_v7  ;;  %v2086_v7 = vld [vmem:[%s1789_s14 + $0xb0] sm:$0xff] }
 0x3d9   : > { %1493 = vmatpush.bf16.msrb.mxu2 %v2777_v21  ;;  %1506 = vmatpush.bf16.msrb.mxu3 %v2765_v10 }
 0x3dc   : > { %1468 = vmatpush.bf16.msrb.mxu0 %v2775_v20  ;;  %1481 = vmatpush.bf16.msrb.mxu1 %v2783_v25 }
 0x3dd   : > { %1494 = vmatpush.bf16.msrb.mxu2 %v2797_v39  ;;  %1507 = vmatpush.bf16.msrb.mxu3 %v2785_v26 }
 0x3e0   : > { %1469 = vmatpush.bf16.msrb.mxu0 %v2795_v37  ;;  %1482 = vmatpush.bf16.msrb.mxu1 %v2801_v40 }
 0x3e1   : > { %1495 = vmatpush.bf16.msrb.mxu2 %v2811_v49  ;;  %1508 = vmatpush.bf16.msrb.mxu3 %v2803_v41 }
 0x43f   : > { %v1207_v9 = vpop.f32.mrf.mxu0  ;;  %v1220_v13 = vpop.f32.mrf.mxu1 }
 0x440   : > { %v1250_v17 = vadd.f32 %v2084_v4, %v1207_v9  ;;  %v1251_v18 = vadd.f32 %v2085_v8, %v1220_v13 }
 0x442   : > { %v2088_v22 = vmul.f32 -1.442695, %v1250_v17  ;;  %v2089_v29 = vmul.f32 -1.442695, %v1251_v18 }
 0x444   : > { %2328 = vpow2.f32 %v2088_v22  ;;  %v2097_v22 = vld [vmem:[%s1797_s25 + $0xd8] sm:$0xff] }
 0x445   : > { %2330 = vpow2.f32 %v2089_v29 }
 0x446   : > { %v1233_v34 = vpop.f32.mrf.mxu2  ;;  %v1246_v35 = vpop.f32.mrf.mxu3 }
 0x447   : > { %v1253_v42 = vadd.f32 %v2087_v33, %v1246_v35  ;;  %v1209_v43 = vpop.f32.mrf.mxu0  ;;  %v1222_v46 = vpop.f32.mrf.mxu1  ;;  %v1252_v25 = vadd.f32 %v2086_v7, %v1233_v34 }
 0x449   : > { %v2090_v47 = vmul.f32 -1.442695, %v1253_v42 }
 0x44a   : > { %v2329_v54 = vpop.eup %2328 }
 0x44b   : > { %v2331_v55 = vpop.eup %2330  ;;  %v1257_v58 = vadd.f32 1.0, %v2329_v54  ;;  %2332 = vpow2.f32 %v2090_v47 }
 0x44c   : > { %v1276_v59 = vadd.f32 1.0, %v2331_v55 }
 0x44d   : > { %2334 = vrcp.f32 %v1257_v58  ;;  %v1269_v49 = vand.u32 2147483648, %v1257_v58  ;;  %v1267_v31 = vand.u32 2147483647, %v1257_v58  ;;  %vm1263_vm14 = vweird.f32 %v1257_v58 }
 0x44e   : > { %2336 = vrcp.f32 %v1276_v59  ;;  %v1235_v2 = vpop.f32.mrf.mxu2  ;;  %v1248_v3 = vpop.f32.mrf.mxu3  ;;  %v1288_v38 = vand.u32 2147483648, %v1276_v59  ;;  %v1286_v28 = vand.u32 2147483647, %v1276_v59  ;;  %vm1282_vm15 = vweird.f32 %v1276_v59 }
 0x44f   : > { %v1270_v52 = vor.u32 1.1754944e-38, %v1269_v49  ;;  %vm1268_vm2 = vcmp.eq.f32.partialorder %v1267_v31, 8.507059e+37  ;;  %v2096_v2 = vld [vmem:[%s1797_s25 + $0xd0] sm:$0xff] }
 0x450   : > { %v1289_v57 = vor.u32 1.1754944e-38, %v1288_v38  ;;  %vm1287_vm3 = vcmp.eq.f32.partialorder %v1286_v28, 8.507059e+37 }
 0x451   : > { %v2333_v10 = vpop.eup %2332 }
 0x452   : > { %v1296_v20 = vadd.f32 1.0, %v2333_v10 }
 0x453   : > { %v2335_v21 = vpop.eup %2334 }
 0x454   : > { %v2337_v26 = vpop.eup %2336  ;;  %v1259_v37 = vmul.f32 %v2335_v21, %v1257_v58  ;;  %2338 = vrcp.f32 %v1296_v20  ;;  %vm1264_vm12 = vweird.f32 %v2335_v21  ;;  %v1308_v27 = vand.u32 2147483648, %v1296_v20 }
 0x455   : > { %v1278_v39 = vmul.f32 %v2337_v26, %v1276_v59  ;;  %2340 = vtanh.f32 %v1252_v25  ;;  %vm1283_vm13 = vweird.f32 %v2337_v26  ;;  %vm1265_vm0 = vmor %vm1263_vm14, %vm1264_vm12  ;;  %vm1302_vm5 = vweird.f32 %v1296_v20 }
 0x456   : > { %v1260_v40 = vsub.f32 1.0, %v1259_v37  ;;  %vm1284_vm1 = vmor %vm1282_vm15, %vm1283_vm13  ;;  %v1306_v32 = vand.u32 2147483647, %v1296_v20  ;;  %v1309_v45 = vor.u32 1.1754944e-38, %v1308_v27 }
 0x457   : > { %v1279_v41 = vsub.f32 1.0, %v1278_v39 }
 0x458   : > { %v1261_v36 = vmul.f32 %v2335_v21, %v1260_v40  ;;  %vm1307_vm7 = vcmp.eq.f32.partialorder %v1306_v32, 8.507059e+37 }
 0x459   : > { %v1280_v30 = vmul.f32 %v2337_v26, %v1279_v41 }
 0x45a   : > { %v2339_v50 = vpop.eup %2338  ;;  %v1262_v51 = vadd.f32 %v2335_v21, %v1261_v36 }
 0x45b   : > { %v1281_v53 = vadd.f32 %v2337_v26, %v1280_v30  ;;  %v1298_v56 = vmul.f32 %v2339_v50, %v1296_v20  ;;  %v2341_v61 = vpop.eup %2340  ;;  %vm1303_vm4 = vweird.f32 %v2339_v50 }
 0x45c   : > { %v1266_v60 = vsel %vm1265_vm0, %v2335_v21, %v1262_v51  ;;  %vm1304_vm6 = vmor %vm1302_vm5, %vm1303_vm4 }
 0x45d   : > { %v1271_v62 = vsel %vm1268_vm2, %v1270_v52, %v1266_v60  ;;  %v1285_v63 = vsel %vm1284_vm1, %v2337_v26, %v1281_v53  ;;  %v1299_v0 = vsub.f32 1.0, %v1298_v56 }
 0x45e   : > { %v1290_v1 = vsel %vm1287_vm3, %v1289_v57, %v1285_v63  ;;  %v1313_v5 = vmul.f32 %v2341_v61, %v1271_v62 }
 0x45f   : > { %v1312_v14 = vmul.f32 %v1290_v1, %v3042_v15  ;;  %v1300_v12 = vmul.f32 %v2339_v50, %v1299_v0 }
 0x461   : > { %v3083_v11 = vadd.f32 %v1313_v5, %v1312_v14  ;;  %v1301_v6 = vadd.f32 %v2339_v50, %v1300_v12 }
 0x463   : > { %2342 = vtanh.f32 %v3083_v11  ;;  %v1305_v44 = vsel %vm1304_vm6, %v2339_v50, %v1301_v6 }
 0x464   : > { %v1310_v15 = vsel %vm1307_vm7, %v1309_v45, %v1305_v44 }
 0x469   : > { %v2343_v48 = vpop.eup %2342 }
 0x46a   : > { %v1316_v16 = vmul.f32 %v2343_v48, %v1310_v15 }
 0x46c   : > { %v1317_v19 = vpack.c.bf16 %v1316_v16, %v1316_v16  ;;  %v2104_v16 = vld [vmem:[%s1805_s9 + $0xe0] sm:$0xff] }
 0x46e   : > { %2092 = vst [vmem:[%s1793_s27 + $0x14] sm:$0xf] %v1317_v19  ;;  %1338 = vmatmul.bf16.vlgmr.msra.gmra.mxu0 %v1317_v19  ;;  %1351 = vmatmul.bf16.vlgmr.msra.gmra.mxu1 %v1317_v19 }
 0x46f   : > { %1364 = vmatmul.bf16.vlgmr.msra.gmra.mxu2 %v1317_v19  ;;  %1377 = vmatmul.bf16.vlgmr.msra.gmra.mxu3 %v1317_v19  ;;  %v2105_v19 = vld [vmem:[%s1805_s9 + $0xe8] sm:$0xff] }
 0x4eb   : > { %v1339_v4 = vpop.f32.mrf.mxu0  ;;  %v1352_v8 = vpop.f32.mrf.mxu1 }
 0x4ec   : > { %v1382_v9 = vadd.f32 %v2094_v24, %v1339_v4  ;;  %v1383_v13 = vadd.f32 %v2095_v23, %v1352_v8 }
 0x4ee   : > { %v2098_v17 = vmul.f32 -1.442695, %v1382_v9  ;;  %v2099_v18 = vmul.f32 -1.442695, %v1383_v13 }
 0x4f0   : > { %2344 = vpow2.f32 %v2098_v17  ;;  %v2107_v17 = vld [vmem:[%s1805_s9 + $0xf8] sm:$0xff] }
 0x4f1   : > { %2346 = vpow2.f32 %v2099_v18 }
 0x4f2   : > { %v1365_v29 = vpop.f32.mrf.mxu2  ;;  %v1378_v33 = vpop.f32.mrf.mxu3 }
 0x4f3   : > { %v1385_v34 = vadd.f32 %v2097_v22, %v1378_v33  ;;  %v1341_v35 = vpop.f32.mrf.mxu0  ;;  %v1354_v42 = vpop.f32.mrf.mxu1  ;;  %v1384_v20 = vadd.f32 %v2096_v2, %v1365_v29 }
 0x4f5   : > { %v2100_v43 = vmul.f32 -1.442695, %v1385_v34 }
 0x4f6   : > { %v2345_v46 = vpop.eup %2344 }
 0x4f7   : > { %v2347_v47 = vpop.eup %2346  ;;  %v1389_v54 = vadd.f32 1.0, %v2345_v46  ;;  %2348 = vpow2.f32 %v2100_v43 }
 0x4f8   : > { %v1408_v55 = vadd.f32 1.0, %v2347_v47 }
 0x4f9   : > { %2350 = vrcp.f32 %v1389_v54  ;;  %v1401_v40 = vand.u32 2147483648, %v1389_v54  ;;  %v1399_v38 = vand.u32 2147483647, %v1389_v54  ;;  %vm1395_vm10 = vweird.f32 %v1389_v54 }
 0x4fa   : > { %2352 = vrcp.f32 %v1408_v55  ;;  %v1367_v58 = vpop.f32.mrf.mxu2  ;;  %v1380_v59 = vpop.f32.mrf.mxu3  ;;  %v1420_v41 = vand.u32 2147483648, %v1408_v55  ;;  %v1418_v31 = vand.u32 2147483647, %v1408_v55  ;;  %vm1414_vm11 = vweird.f32 %v1408_v55 }
 0x4fb   : > { %v1402_v50 = vor.u32 1.1754944e-38, %v1401_v40  ;;  %vm1400_vm14 = vcmp.eq.f32.partialorder %v1399_v38, 8.507059e+37  ;;  %v2106_v58 = vld [vmem:[%s1805_s9 + $0xf0] sm:$0xff] }
 0x4fc   : > { %v1421_v53 = vor.u32 1.1754944e-38, %v1420_v41  ;;  %vm1419_vm15 = vcmp.eq.f32.partialorder %v1418_v31, 8.507059e+37 }
 0x4fd   : > { %v2349_v3 = vpop.eup %2348 }
 0x4fe   : > { %v1428_v7 = vadd.f32 1.0, %v2349_v3 }
 0x4ff   : > { %v2351_v10 = vpop.eup %2350 }
 0x500   : > { %v2353_v21 = vpop.eup %2352  ;;  %v1391_v25 = vmul.f32 %v2351_v10, %v1389_v54  ;;  %2354 = vrcp.f32 %v1428_v7  ;;  %vm1396_vm8 = vweird.f32 %v2351_v10  ;;  %v1440_v6 = vand.u32 2147483648, %v1428_v7 }
 0x501   : > { %v1410_v26 = vmul.f32 %v2353_v21, %v1408_v55  ;;  %2356 = vtanh.f32 %v1384_v20  ;;  %vm1415_vm9 = vweird.f32 %v2353_v21  ;;  %vm1397_vm12 = vmor %vm1395_vm10, %vm1396_vm8  ;;  %vm1434_vm1 = vweird.f32 %v1428_v7 }
 0x502   : > { %v1392_v37 = vsub.f32 1.0, %v1391_v25  ;;  %vm1416_vm13 = vmor %vm1414_vm11, %vm1415_vm9  ;;  %v1438_v27 = vand.u32 2147483647, %v1428_v7  ;;  %v1441_v44 = vor.u32 1.1754944e-38, %v1440_v6 }
 0x503   : > { %v1411_v39 = vsub.f32 1.0, %v1410_v26 }
 0x504   : > { %v1393_v49 = vmul.f32 %v2351_v10, %v1392_v37  ;;  %vm1439_vm3 = vcmp.eq.f32.partialorder %v1438_v27, 8.507059e+37 }
 0x505   : > { %v1412_v36 = vmul.f32 %v2353_v21, %v1411_v39 }
 0x506   : > { %v2355_v30 = vpop.eup %2354  ;;  %v1394_v28 = vadd.f32 %v2351_v10, %v1393_v49 }
 0x507   : > { %v1413_v51 = vadd.f32 %v2353_v21, %v1412_v36  ;;  %v1430_v52 = vmul.f32 %v2355_v30, %v1428_v7  ;;  %v2357_v57 = vpop.eup %2356  ;;  %vm1435_vm0 = vweird.f32 %v2355_v30 }
 0x508   : > { %v1398_v56 = vsel %vm1397_vm12, %v2351_v10, %v1394_v28  ;;  %vm1436_vm2 = vmor %vm1434_vm1, %vm1435_vm0 }
 0x509   : > { %v1403_v60 = vsel %vm1400_vm14, %v1402_v50, %v1398_v56  ;;  %v1417_v61 = vsel %vm1416_vm13, %v2353_v21, %v1413_v51  ;;  %v1431_v62 = vsub.f32 1.0, %v1430_v52 }
 0x50a   : > { %v1422_v63 = vsel %vm1419_vm15, %v1421_v53, %v1417_v61  ;;  %v1445_v0 = vmul.f32 %v2357_v57, %v1403_v60 }
 0x50b   : > { %v1444_v1 = vmul.f32 %v1422_v63, %v3083_v11  ;;  %v1432_v5 = vmul.f32 %v2355_v30, %v1431_v62 }
 0x50d   : > { %v3091_v14 = vadd.f32 %v1445_v0, %v1444_v1  ;;  %v1433_v12 = vadd.f32 %v2355_v30, %v1432_v5 }
 0x50f   : > { %2358 = vtanh.f32 %v3091_v14  ;;  %v1437_v32 = vsel %vm1436_vm2, %v2355_v30, %v1433_v12 }
 0x510   : > { %v1442_v11 = vsel %vm1439_vm3, %v1441_v44, %v1437_v32 }
 0x515   : > { %v2359_v45 = vpop.eup %2358 }
 0x516   : > { %v1448_v48 = vmul.f32 %v2359_v45, %v1442_v11 }
 0x518   : > { %v1449_v15 = vpack.c.bf16 %v1448_v48, %v1448_v48 }
 0x51a   : > { %2102 = vst [vmem:[%s1801_s1 + $0x18] sm:$0xf] %v1449_v15  ;;  %1470 = vmatmul.bf16.vlgmr.msrb.gmra.mxu0 %v1449_v15  ;;  %1483 = vmatmul.bf16.vlgmr.msrb.gmra.mxu1 %v1449_v15 }
 0x51b   : > { %1496 = vmatmul.bf16.vlgmr.msrb.gmra.mxu2 %v1449_v15  ;;  %1509 = vmatmul.bf16.vlgmr.msrb.gmra.mxu3 %v1449_v15 }
 0x597   : > { %v1471_v24 = vpop.f32.mrf.mxu0  ;;  %v1484_v23 = vpop.f32.mrf.mxu1 }
 0x598   : > { %v1514_v4 = vadd.f32 %v2104_v16, %v1471_v24  ;;  %v1515_v8 = vadd.f32 %v2105_v19, %v1484_v23 }
 0x59a   : > { %v2108_v9 = vmul.f32 -1.442695, %v1514_v4  ;;  %v2109_v13 = vmul.f32 -1.442695, %v1515_v8 }
 0x59c   : > { %2360 = vpow2.f32 %v2108_v9 }
 0x59d   : > { %2362 = vpow2.f32 %v2109_v13 }
 0x59e   : > { %v1497_v18 = vpop.f32.mrf.mxu2  ;;  %v1510_v22 = vpop.f32.mrf.mxu3 }
 0x59f   : > { %v1517_v29 = vadd.f32 %v2107_v17, %v1510_v22  ;;  %v1473_v33 = vpop.f32.mrf.mxu0  ;;  %v1486_v34 = vpop.f32.mrf.mxu1  ;;  %v1516_v7 = vadd.f32 %v2106_v58, %v1497_v18 }
 0x5a1   : > { %v2110_v35 = vmul.f32 -1.442695, %v1517_v29 }
 0x5a2   : > { %v2361_v42 = vpop.eup %2360 }
 0x5a3   : > { %v2363_v43 = vpop.eup %2362  ;;  %v1521_v46 = vadd.f32 1.0, %v2361_v42  ;;  %2364 = vpow2.f32 %v2110_v35 }
 0x5a4   : > { %v1540_v47 = vadd.f32 1.0, %v2363_v43 }
 0x5a5   : > { %2366 = vrcp.f32 %v1521_v46  ;;  %v1533_v37 = vand.u32 2147483648, %v1521_v46  ;;  %v1531_v41 = vand.u32 2147483647, %v1521_v46  ;;  %vm1527_vm6 = vweird.f32 %v1521_v46 }
 0x5a6   : > { %2368 = vrcp.f32 %v1540_v47  ;;  %v1499_v54 = vpop.f32.mrf.mxu2  ;;  %v1512_v55 = vpop.f32.mrf.mxu3  ;;  %v1552_v39 = vand.u32 2147483648, %v1540_v47  ;;  %v1550_v38 = vand.u32 2147483647, %v1540_v47  ;;  %vm1546_vm7 = vweird.f32 %v1540_v47 }
 0x5a7   : > { %v1534_v30 = vor.u32 1.1754944e-38, %v1533_v37  ;;  %vm1532_vm10 = vcmp.eq.f32.partialorder %v1531_v41, 8.507059e+37 }
 0x5a8   : > { %v1553_v51 = vor.u32 1.1754944e-38, %v1552_v39  ;;  %vm1551_vm11 = vcmp.eq.f32.partialorder %v1550_v38, 8.507059e+37 }
 0x5a9   : > { %v2365_v59 = vpop.eup %2364 }
 0x5aa   : > { %v1560_v2 = vadd.f32 1.0, %v2365_v59 }
 0x5ab   : > { %v2367_v3 = vpop.eup %2366 }
 0x5ac   : > { %v2369_v10 = vpop.eup %2368  ;;  %v1523_v20 = vmul.f32 %v2367_v3, %v1521_v46  ;;  %2370 = vrcp.f32 %v1560_v2  ;;  %vm1528_vm4 = vweird.f32 %v2367_v3  ;;  %v1572_v12 = vand.u32 2147483648, %v1560_v2 }
 0x5ad   : > { %v1542_v21 = vmul.f32 %v2369_v10, %v1540_v47  ;;  %2372 = vtanh.f32 %v1516_v7  ;;  %vm1547_vm5 = vweird.f32 %v2369_v10  ;;  %vm1529_vm8 = vmor %vm1527_vm6, %vm1528_vm4  ;;  %vm1566_vm13 = vweird.f32 %v1560_v2 }
 0x5ae   : > { %v1524_v25 = vsub.f32 1.0, %v1523_v20  ;;  %vm1548_vm9 = vmor %vm1546_vm7, %vm1547_vm5  ;;  %v1570_v6 = vand.u32 2147483647, %v1560_v2  ;;  %v1573_v32 = vor.u32 1.1754944e-38, %v1572_v12 }
 0x5af   : > { %v1543_v26 = vsub.f32 1.0, %v1542_v21 }
 0x5b0   : > { %v1525_v40 = vmul.f32 %v2367_v3, %v1524_v25  ;;  %vm1571_vm15 = vcmp.eq.f32.partialorder %v1570_v6, 8.507059e+37 }
 0x5b1   : > { %v1544_v49 = vmul.f32 %v2369_v10, %v1543_v26 }
 0x5b2   : > { %v2371_v36 = vpop.eup %2370  ;;  %v1526_v31 = vadd.f32 %v2367_v3, %v1525_v40 }
 0x5b3   : > { %v1545_v28 = vadd.f32 %v2369_v10, %v1544_v49  ;;  %v1562_v50 = vmul.f32 %v2371_v36, %v1560_v2  ;;  %v2373_v53 = vpop.eup %2372  ;;  %vm1567_vm12 = vweird.f32 %v2371_v36 }
 0x5b4   : > { %v1530_v52 = vsel %vm1529_vm8, %v2367_v3, %v1526_v31  ;;  %vm1568_vm14 = vmor %vm1566_vm13, %vm1567_vm12 }
 0x5b5   : > { %v1535_v56 = vsel %vm1532_vm10, %v1534_v30, %v1530_v52  ;;  %v1549_v57 = vsel %vm1548_vm9, %v2369_v10, %v1545_v28  ;;  %v1563_v60 = vsub.f32 1.0, %v1562_v50 }
 0x5b6   : > { %v1554_v61 = vsel %vm1551_vm11, %v1553_v51, %v1549_v57  ;;  %v1577_v62 = vmul.f32 %v2373_v53, %v1535_v56 }
 0x5b7   : > { %v1576_v63 = vmul.f32 %v1554_v61, %v3091_v14  ;;  %v1564_v0 = vmul.f32 %v2371_v36, %v1563_v60 }
 0x5b9   : > { %v1578_v1 = vadd.f32 %v1577_v62, %v1576_v63  ;;  %v1565_v5 = vadd.f32 %v2371_v36, %v1564_v0 }
 0x5bb   : > { %2374 = vtanh.f32 %v1578_v1  ;;  %1586 = vst [vmem:[#allocation3] sm:$0xff] %v1578_v1  ;;  %v1569_v27 = vsel %vm1568_vm14, %v2371_v36, %v1565_v5 }
 0x5bc   : > { %v1574_v45 = vsel %vm1571_vm15, %v1573_v32, %v1569_v27 }
 0x5c1   : > { %v2375_v44 = vpop.eup %2374 }
 0x5c2   : > { %v1580_v11 = vmul.f32 %v2375_v44, %v1574_v45  ;;  %1590 = sbr.rel (%p2113_p7) target bundleno = 1481 (0x5c9), region = 40 }
 0x5c4   : > { %v1581_v14 = vpack.c.bf16 %v1580_v11, %v1580_v11  ;;  %1585 = vst [vmem:[#allocation2] sm:$0xff] %v1580_v11 }
 0x5c6   : > { %2112 = vst [vmem:[%s1809_s11 + $0x1c] sm:$0xf] %v1581_v14 }
 0x5c7   : > { %1591 = vst [vmem:[%s2637_s22] sm:$0xff] %v1580_v11 }
 0x5c8   : > { %1592 = vst [vmem:[%s2642_s29] sm:$0xff] %v1578_v1 }
 0x5c9 PF: > { %1607 = sbr.rel (!%p2601_p11) target bundleno = 1497 (0x5d9), region = 44  ;;  %s2157_s17 = sshll.u32 (%p2601_p11), %s2630_s10, 4 }
 0x5ca   : > { %s1614_s20 = sadd.s32 (%p2601_p11), %s2476_s21, %s2157_s17  ;;  %s3168_s7 = sld [smem:[#allocation13_spill]] (%p2601_p11) }
 0x5cb   : > { %s2118_s5 = sshll.u32 (%p2601_p11), %s1614_s20, 2 }
 0x5cf   : > { %v1633_v48 = vld [vmem:[%s2649_s2] sm:$0xf]  ;;  %v1635_v15 = vld [vmem:[%s2649_s2 + $0x4] sm:$0xf]  ;;  %v1637_v16 = vld [vmem:[%s2649_s2 + $0x8] sm:$0xf] }
 0x5d0   : > { %s1616_s30 = scalar_lea.vmem %s3168_s7, %s2118_s5  ;;  %v1639_v19 = vld [vmem:[%s2649_s2 + $0xc] sm:$0xf]  ;;  %v1641_v24 = vld [vmem:[%s2649_s2 + $0x10] sm:$0xf]  ;;  %v1643_v23 = vld [vmem:[%s2649_s2 + $0x14] sm:$0xf] }
 0x5d1   : > { %1634 = vst [vmem:[%s1616_s30] sm:$0xf] %v1633_v48  ;;  %v1645_v4 = vld [vmem:[%s2649_s2 + $0x18] sm:$0xf]  ;;  %v1647_v8 = vld [vmem:[%s2649_s2 + $0x1c] sm:$0xf] }
 0x5d2   : > { %1636 = vst [vmem:[%s1616_s30 + $0x8] sm:$0xf] %v1635_v15 }
 0x5d3   : > { %1638 = vst [vmem:[%s1616_s30 + $0x10] sm:$0xf] %v1637_v16 }
 0x5d4   : > { %1640 = vst [vmem:[%s1616_s30 + $0x18] sm:$0xf] %v1639_v19 }
 0x5d5   : > { %1642 = vst [vmem:[%s1616_s30 + $0x20] sm:$0xf] %v1641_v24 }
 0x5d6   : > { %1644 = vst [vmem:[%s1616_s30 + $0x28] sm:$0xf] %v1643_v23 }
 0x5d7   : > { %1646 = vst [vmem:[%s1616_s30 + $0x30] sm:$0xf] %v1645_v4 }
 0x5d8   : > { %1648 = vst [vmem:[%s1616_s30 + $0x38] sm:$0xf] %v1647_v8 }
 0x5d9 PF: > { %s18_s24 = sadd.s32 1, %s2488_s24   ;;  %s3169_s20 = sld [smem:[#allocation8_spill]] }
 0x5da   : > { %p15_p8 = scmp.ge.s32.totalorder %s18_s24, 6   ;;  %s3170_s21 = sld [smem:[#allocation9_spill]] }
 0x5db   : > { %s3171_s22 = sld [smem:[#allocation10_spill]]  ;;  %s3173_s15 = smov %s2456_s16 }
 0x5dc   : > { %s3172_s23 = sld [smem:[#allocation11_spill]]  ;;  %s3174_s16 = smov %s2608_s28 }
 0x5dd   : > { %s3175_s17 = smov %s2464_s18  ;;  %s3176_s18 = smov %s2468_s19 }
 0x5de   : > { %s3177_s19 = smov %s2594_s12  ;;  %17 = sbr.rel (!%p15_p8) target bundleno = 9 (0x9), region = 160 }
 0x5e3   :  { %1718 = vsyncpa [#allocation5], 1 }
 0x5e4   :  { %1720 = vsyncpa [#allocation5 + $0x1], 1 }

</bundles_post_ra>
